<compile_context>
chip_gen: v6e
topology: v6e:2x2x1
jax: 0.10.0
libtpu: 0.0.40
codegen_flags: <defaults>
</compile_context>

<pallas_src>
import functools

import jax
import jax.numpy as jnp
from jax.experimental import pallas as pl
from jax.experimental.pallas import tpu as pltpu

E_MODEL = 768          # hard-coded in the PyTorch module
NUM_HEADS = 6          # head_dim = 768 / 6 = 128 -> lane aligned
EMBED_DIM = 128        # FusionLayer(embed_dim=...)


# ----------------------------------------------------------------------------
# Kernel: one (branch, batch) element per grid step.  Query is a single row.
# ----------------------------------------------------------------------------
def fusion_kernel(xq_ref, xkv_ref, mask_ref,
                  wq_ref, bq_ref, wkv_ref, bkv_ref,
                  wom_ref, bom_ref, w2_ref, b2_ref,
                  o_ref, ctx_ref, *, num_heads, head_dim):
    E = num_heads * head_dim

    x_q = xq_ref[0]            # (1, E)    bf16
    x_kv = xkv_ref[0, 0]       # (Skv, E)  bf16
    mask = mask_ref[0]         # (1, Skv)  f32 (0 for valid keys, -1e30 for pad)

    # Q projection.  Scale 1/sqrt(head_dim) is already folded into wq/bq.
    q = jnp.dot(x_q, wq_ref[0], preferred_element_type=jnp.float32) + bq_ref[0]      # (1, E)

    # Fused K/V projection: one MXU op with N = 2E.
    kv = jnp.dot(x_kv, wkv_ref[0], preferred_element_type=jnp.float32) + bkv_ref[0]  # (Skv, 2E)
    k = kv[:, :E]
    v = kv[:, E:]

    # Per-head attention for the single query row; each head writes its output
    # into a lane-aligned 128-wide slot of the VMEM scratch (no concat).
    for h in range(num_heads):
        lo, hi = h * head_dim, (h + 1) * head_dim
        qh = q[:, lo:hi]                               # (1, Dh)
        kh = k[:, lo:hi]                               # (Skv, Dh)
        vh = v[:, lo:hi]                               # (Skv, Dh)
        s = jax.lax.dot_general(
            qh, kh, (((1,), (1,)), ((), ())),
            preferred_element_type=jnp.float32)        # (1, Skv)
        s = s + mask
        s = s - jnp.max(s, axis=-1, keepdims=True)
        p = jnp.exp(s)
        p = p * pl.reciprocal(jnp.sum(p, axis=-1, keepdims=True), approx=True)
        ctx_ref[:, lo:hi] = jnp.dot(p, vh, preferred_element_type=jnp.float32)

    ctx = ctx_ref[...].astype(jnp.bfloat16)            # (1, E)

    # Fused (attention out-proj ∘ MLP layer 1), then ReLU, then MLP layer 2.
    h1 = jnp.dot(ctx, wom_ref[0], preferred_element_type=jnp.float32) + bom_ref[0]   # (1, D)
    h1 = jnp.maximum(h1, 0.0)
    y = (jnp.dot(h1.astype(jnp.bfloat16), w2_ref[0],
                 preferred_element_type=jnp.float32) + b2_ref[0])                     # (1, D)

    o_ref[0, 0] = y.astype(o_ref.dtype)


# ----------------------------------------------------------------------------
# Wrapper: weight prep (transpose / fuse / fold) + a single pallas_call.
# ----------------------------------------------------------------------------
def _prep_branch(p, num_heads):
    """PyTorch-layout params -> kernel layout (pre-transposed, fused, bf16)."""
    E = p["out_w"].shape[0]
    head_dim = E // num_heads
    scale = 1.0 / (head_dim ** 0.5)
    wq, wk, wv = p["in_w"][:E], p["in_w"][E:2 * E], p["in_w"][2 * E:]
    bq, bk, bv = p["in_b"][0, :E], p["in_b"][0, E:2 * E], p["in_b"][0, 2 * E:]

    # Fold out_proj into the first MLP layer (exact in f32, single bf16 cast):
    #   (ctx @ Wo^T + bo) @ W1^T + b1  ==  ctx @ (Wo^T @ W1^T) + (bo @ W1^T + b1)
    wom = p["out_w"].T.astype(jnp.float32) @ p["w1"].T.astype(jnp.float32)    # (E, D)
    bom = p["out_b"][0].astype(jnp.float32) @ p["w1"].T.astype(jnp.float32) + p["b1"][0]

    return dict(
        wq_t=(wq.T * scale).astype(jnp.bfloat16),                            # (E, E)
        bq=(bq * scale).reshape(1, E).astype(jnp.float32),                   # (1, E)
        wkv_t=jnp.concatenate([wk, wv], axis=0).T.astype(jnp.bfloat16),      # (E, 2E)
        bkv=jnp.concatenate([bk, bv]).reshape(1, 2 * E).astype(jnp.float32),
        wom_t=wom.astype(jnp.bfloat16),                                      # (E, D)
        bom=bom.reshape(1, -1).astype(jnp.float32),                          # (1, D)
        w2_t=p["w2"].T.astype(jnp.bfloat16),                                 # (D, D)
        b2=p["b2"].reshape(1, -1).astype(jnp.float32),
    )


def _pad_kv(x, skv_max):
    B, S, E = x.shape
    if S < skv_max:
        x = jnp.pad(x, ((0, 0), (0, skv_max - S), (0, 0)))
    return x


def fusion_layer_forward(z, params, *, num_heads=NUM_HEADS):
    """z = (z_i, z_t, z_m), each (B, S, 768). Returns (B, 3, embed_dim) f32."""
    z_i, z_t, z_m = z
    B, _, E = z_t.shape
    D = params["i"]["w2"].shape[0]
    head_dim = E // num_heads

    # Branch order matches the PyTorch concat: [i, m, t].
    kvs = [z_i, z_m, z_t]
    lens = [x.shape[1] for x in kvs]
    skv_max = max(lens)
    skv_max = ((skv_max + 7) // 8) * 8          # sublane-align the padded kv length

    # Activations: single query row (only row 0 is consumed), padded kv stack.
    x_q = z_t[:, 0:1, :].astype(jnp.bfloat16)                                      # (B, 1, E)
    x_kv = jnp.stack([_pad_kv(x, skv_max) for x in kvs], 0).astype(jnp.bfloat16)   # (3,B,Skv,E)

    # Additive key mask (0 valid / -1e30 pad), per branch.
    col = jnp.arange(skv_max)
    mask = jnp.stack([jnp.where(col < L, 0.0, -1e30) for L in lens], axis=0)
    mask = mask.reshape(3, 1, skv_max).astype(jnp.float32)                         # (3, 1, Skv)

    # Stacked per-branch weights.
    preps = [_prep_branch(params[key], num_heads) for key in ("i", "m", "t")]
    stk = {k: jnp.stack([pr[k] for pr in preps], axis=0) for k in preps[0]}

    kernel = functools.partial(fusion_kernel, num_heads=num_heads, head_dim=head_dim)

    out = pl.pallas_call(
        kernel,
        out_shape=jax.ShapeDtypeStruct((3, B, 1, D), jnp.float32),
        grid=(3, B),
        in_specs=[
            pl.BlockSpec((1, 1, E), lambda br, b: (b, 0, 0)),               # x_q (shared)
            pl.BlockSpec((1, 1, skv_max, E), lambda br, b: (br, b, 0, 0)),  # x_kv
            pl.BlockSpec((1, 1, skv_max), lambda br, b: (br, 0, 0)),        # key mask
            pl.BlockSpec((1, E, E), lambda br, b: (br, 0, 0)),              # wq_t
            pl.BlockSpec((1, 1, E), lambda br, b: (br, 0, 0)),              # bq
            pl.BlockSpec((1, E, 2 * E), lambda br, b: (br, 0, 0)),          # wkv_t
            pl.BlockSpec((1, 1, 2 * E), lambda br, b: (br, 0, 0)),          # bkv
            pl.BlockSpec((1, E, D), lambda br, b: (br, 0, 0)),              # wom_t (out∘mlp1)
            pl.BlockSpec((1, 1, D), lambda br, b: (br, 0, 0)),              # bom
            pl.BlockSpec((1, D, D), lambda br, b: (br, 0, 0)),              # w2_t
            pl.BlockSpec((1, 1, D), lambda br, b: (br, 0, 0)),              # b2
        ],
        out_specs=pl.BlockSpec((1, 1, 1, D), lambda br, b: (br, b, 0, 0)),
        scratch_shapes=[pltpu.VMEM((1, E), jnp.float32)],                   # ctx buffer
        compiler_params=pltpu.CompilerParams(
            dimension_semantics=("parallel", "parallel")),
    )(x_q, x_kv, mask,
      stk["wq_t"], stk["bq"], stk["wkv_t"], stk["bkv"],
      stk["wom_t"], stk["bom"], stk["w2_t"], stk["b2"])

    # (3, B, 1, D) -> (B, 3, D), branch order [i, m, t] as in the PyTorch cat.
    return jnp.transpose(out[:, :, 0, :], (1, 0, 2))


# ----------------------------------------------------------------------------
# Deterministic parameter init (synthetic; mirrors the PyTorch shapes).
# ----------------------------------------------------------------------------
def init_branch_params(key, embed_dim, E=E_MODEL):
    ks = jax.random.split(key, 8)
    s = 0.02
    return dict(
        in_w=jax.random.normal(ks[0], (3 * E, E), jnp.float32) * s,
        in_b=jax.random.normal(ks[1], (1, 3 * E), jnp.float32) * s,
        out_w=jax.random.normal(ks[2], (E, E), jnp.float32) * s,
        out_b=jax.random.normal(ks[3], (1, E), jnp.float32) * s,
        w1=jax.random.normal(ks[4], (embed_dim, E), jnp.float32) * s,
        b1=jax.random.normal(ks[5], (1, embed_dim), jnp.float32) * s,
        w2=jax.random.normal(ks[6], (embed_dim, embed_dim), jnp.float32) * s,
        b2=jax.random.normal(ks[7], (1, embed_dim), jnp.float32) * s,
    )


# ----------------------------------------------------------------------------
# Pure-JAX f32 reference (correctness check only).
# ----------------------------------------------------------------------------
def ref_branch(x_q, x_kv, p, num_heads):
    E = x_q.shape[-1]
    Dh = E // num_heads
    q = x_q @ p["in_w"][:E].T + p["in_b"][0, :E]
    k = x_kv @ p["in_w"][E:2 * E].T + p["in_b"][0, E:2 * E]
    v = x_kv @ p["in_w"][2 * E:].T + p["in_b"][0, 2 * E:]
    B, Sq, _ = q.shape
    Skv = k.shape[1]
    qh = q.reshape(B, Sq, num_heads, Dh).transpose(0, 2, 1, 3)
    kh = k.reshape(B, Skv, num_heads, Dh).transpose(0, 2, 1, 3)
    vh = v.reshape(B, Skv, num_heads, Dh).transpose(0, 2, 1, 3)
    s = jnp.einsum("bhqd,bhkd->bhqk", qh, kh) / jnp.sqrt(jnp.float32(Dh))
    attn = jax.nn.softmax(s, axis=-1)
    ctx = jnp.einsum("bhqk,bhkd->bhqd", attn, vh).transpose(0, 2, 1, 3).reshape(B, Sq, E)
    a = ctx @ p["out_w"].T + p["out_b"][0]
    h = jax.nn.relu(a @ p["w1"].T + p["b1"][0])
    return h @ p["w2"].T + p["b2"][0]


def ref_fusion_layer(z, params, num_heads):
    z_i, z_t, z_m = z
    y_i = ref_branch(z_t, z_i, params["i"], num_heads)
    y_m = ref_branch(z_t, z_m, params["m"], num_heads)
    y_t = ref_branch(z_t, z_t, params["t"], num_heads)
    return jnp.concatenate([y_i[:, 0:1], y_m[:, 0:1], y_t[:, 0:1]], axis=1)


if __name__ == "__main__":
    B = 2
    S_T = 8      # text sequence length (query stream)
    S_I = 16     # image sequence length
    S_M = 8      # multimodal sequence length

    key = jax.random.PRNGKey(0)
    k_zi, k_zt, k_zm, k_pi, k_pm, k_pt = jax.random.split(key, 6)

    z_i = jax.random.normal(k_zi, (B, S_I, E_MODEL), jnp.float32)
    z_t = jax.random.normal(k_zt, (B, S_T, E_MODEL), jnp.float32)
    z_m = jax.random.normal(k_zm, (B, S_M, E_MODEL), jnp.float32)

    params = dict(
        i=init_branch_params(k_pi, EMBED_DIM),
        m=init_branch_params(k_pm, EMBED_DIM),
        t=init_branch_params(k_pt, EMBED_DIM),
    )

    out = jax.block_until_ready(
        fusion_layer_forward((z_i, z_t, z_m), params, num_heads=NUM_HEADS))
    assert out.shape == (B, 3, EMBED_DIM), out.shape

    ref = jax.block_until_ready(
        ref_fusion_layer((z_i, z_t, z_m), params, NUM_HEADS))
    # bf16 weights/activations with f32 accumulation -> looser tolerance vs f32 ref.
    max_diff = float(jnp.max(jnp.abs(out - ref)))
    assert jnp.allclose(out, ref, rtol=5e-2, atol=2e-2), max_diff

    print("KERNEL_OK")
</pallas_src>

<mosaic_0001>
module attributes {stable_mosaic.version = 11 : i64} {
  func.func @fusion_kernel(%arg0: i32, %arg1: i32, %arg2: memref<1x1x768xbf16, #tpu.memory_space<vmem>>, %arg3: memref<1x1x16x768xbf16, #tpu.memory_space<vmem>>, %arg4: memref<1x1x16xf32, #tpu.memory_space<vmem>>, %arg5: memref<1x768x768xbf16, #tpu.memory_space<vmem>>, %arg6: memref<1x1x768xf32, #tpu.memory_space<vmem>>, %arg7: memref<1x768x1536xbf16, #tpu.memory_space<vmem>>, %arg8: memref<1x1x1536xf32, #tpu.memory_space<vmem>>, %arg9: memref<1x768x128xbf16, #tpu.memory_space<vmem>>, %arg10: memref<1x1x128xf32, #tpu.memory_space<vmem>>, %arg11: memref<1x128x128xbf16, #tpu.memory_space<vmem>>, %arg12: memref<1x1x128xf32, #tpu.memory_space<vmem>>, %arg13: memref<1x1x1x128xf32, #tpu.memory_space<vmem>>, %arg14: memref<1x768xf32, #tpu.memory_space<vmem>>) attributes {dimension_semantics = [#tpu.dimension_semantics<parallel>, #tpu.dimension_semantics<parallel>], iteration_bounds = array<i64: 3, 2>, scalar_prefetch = 0 : i64, scratch_operands = 1 : i64, tpu.core_type = #tpu.core_type<tc>, window_params = [{transform_indices = @transform_0, window_bounds = array<i64: 1, 1, 768>}, {transform_indices = @transform_1, window_bounds = array<i64: 1, 1, 16, 768>}, {transform_indices = @transform_2, window_bounds = array<i64: 1, 1, 16>}, {transform_indices = @transform_3, window_bounds = array<i64: 1, 768, 768>}, {transform_indices = @transform_4, window_bounds = array<i64: 1, 1, 768>}, {transform_indices = @transform_5, window_bounds = array<i64: 1, 768, 1536>}, {transform_indices = @transform_6, window_bounds = array<i64: 1, 1, 1536>}, {transform_indices = @transform_7, window_bounds = array<i64: 1, 768, 128>}, {transform_indices = @transform_8, window_bounds = array<i64: 1, 1, 128>}, {transform_indices = @transform_9, window_bounds = array<i64: 1, 128, 128>}, {transform_indices = @transform_10, window_bounds = array<i64: 1, 1, 128>}, {transform_indices = @transform_11, window_bounds = array<i64: 1, 1, 1, 128>}]} {
    %c0 = arith.constant 0 : index
    %c0_0 = arith.constant 0 : index
    %c0_1 = arith.constant 0 : index
    %0 = vector.load %arg2[%c0, %c0_0, %c0_1] : memref<1x1x768xbf16, #tpu.memory_space<vmem>>, vector<1x1x768xbf16>
    %1 = vector.shape_cast %0 : vector<1x1x768xbf16> to vector<1x768xbf16>
    %c0_2 = arith.constant 0 : index
    %c0_3 = arith.constant 0 : index
    %c0_4 = arith.constant 0 : index
    %c0_5 = arith.constant 0 : index
    %2 = vector.load %arg3[%c0_2, %c0_3, %c0_4, %c0_5] : memref<1x1x16x768xbf16, #tpu.memory_space<vmem>>, vector<1x1x16x768xbf16>
    %3 = vector.shape_cast %2 : vector<1x1x16x768xbf16> to vector<16x768xbf16>
    %c0_6 = arith.constant 0 : index
    %c0_7 = arith.constant 0 : index
    %c0_8 = arith.constant 0 : index
    %4 = vector.load %arg4[%c0_6, %c0_7, %c0_8] : memref<1x1x16xf32, #tpu.memory_space<vmem>>, vector<1x1x16xf32>
    %5 = vector.shape_cast %4 : vector<1x1x16xf32> to vector<1x16xf32>
    %c0_9 = arith.constant 0 : index
    %c0_10 = arith.constant 0 : index
    %c0_11 = arith.constant 0 : index
    %6 = vector.load %arg5[%c0_9, %c0_10, %c0_11] : memref<1x768x768xbf16, #tpu.memory_space<vmem>>, vector<1x768x768xbf16>
    %7 = vector.shape_cast %6 : vector<1x768x768xbf16> to vector<768x768xbf16>
    %cst = arith.constant dense<0.000000e+00> : vector<1x768xf32>
    %8 = tpu.matmul %1, %7, %cst {dimension_numbers = #tpu.dot_dimension_numbers<[1], [0], [0], [1], [0, 0, 1, 1], [], []>} : vector<1x768xbf16>, vector<768x768xbf16>, vector<1x768xf32> -> vector<1x768xf32>
    %c0_12 = arith.constant 0 : index
    %c0_13 = arith.constant 0 : index
    %c0_14 = arith.constant 0 : index
    %9 = vector.load %arg6[%c0_12, %c0_13, %c0_14] : memref<1x1x768xf32, #tpu.memory_space<vmem>>, vector<1x1x768xf32>
    %10 = vector.shape_cast %9 : vector<1x1x768xf32> to vector<1x768xf32>
    %11 = arith.addf %8, %10 : vector<1x768xf32>
    %c0_15 = arith.constant 0 : index
    %c0_16 = arith.constant 0 : index
    %c0_17 = arith.constant 0 : index
    %12 = vector.load %arg7[%c0_15, %c0_16, %c0_17] : memref<1x768x1536xbf16, #tpu.memory_space<vmem>>, vector<1x768x1536xbf16>
    %13 = vector.shape_cast %12 : vector<1x768x1536xbf16> to vector<768x1536xbf16>
    %cst_18 = arith.constant dense<0.000000e+00> : vector<16x1536xf32>
    %14 = tpu.matmul %3, %13, %cst_18 {dimension_numbers = #tpu.dot_dimension_numbers<[1], [0], [0], [1], [0, 0, 1, 1], [], []>} : vector<16x768xbf16>, vector<768x1536xbf16>, vector<16x1536xf32> -> vector<16x1536xf32>
    %c0_19 = arith.constant 0 : index
    %c0_20 = arith.constant 0 : index
    %c0_21 = arith.constant 0 : index
    %15 = vector.load %arg8[%c0_19, %c0_20, %c0_21] : memref<1x1x1536xf32, #tpu.memory_space<vmem>>, vector<1x1x1536xf32>
    %16 = vector.shape_cast %15 : vector<1x1x1536xf32> to vector<1x1536xf32>
    %17 = vector.broadcast %16 : vector<1x1536xf32> to vector<16x1536xf32>
    %18 = arith.addf %14, %17 : vector<16x1536xf32>
    %19 = vector.extract_strided_slice %18 {offsets = [0, 0], sizes = [16, 768], strides = [1, 1]} : vector<16x1536xf32> to vector<16x768xf32>
    %20 = vector.extract_strided_slice %18 {offsets = [0, 768], sizes = [16, 768], strides = [1, 1]} : vector<16x1536xf32> to vector<16x768xf32>
    %21 = vector.extract_strided_slice %11 {offsets = [0, 0], sizes = [1, 128], strides = [1, 1]} : vector<1x768xf32> to vector<1x128xf32>
    %22 = vector.extract_strided_slice %19 {offsets = [0, 0], sizes = [16, 128], strides = [1, 1]} : vector<16x768xf32> to vector<16x128xf32>
    %23 = vector.extract_strided_slice %20 {offsets = [0, 0], sizes = [16, 128], strides = [1, 1]} : vector<16x768xf32> to vector<16x128xf32>
    %cst_22 = arith.constant dense<0.000000e+00> : vector<1x16xf32>
    %24 = tpu.matmul %21, %22, %cst_22 {dimension_numbers = #tpu.dot_dimension_numbers<[1], [1], [0], [0], [0, 0, 1, 0], [], []>} : vector<1x128xf32>, vector<16x128xf32>, vector<1x16xf32> -> vector<1x16xf32>
    %25 = arith.addf %24, %5 : vector<1x16xf32>
    %cst_23 = arith.constant dense<0xFF800000> : vector<1xf32>
    %26 = vector.multi_reduction <maximumf>, %25, %cst_23 [1] : vector<1x16xf32> to vector<1xf32>
    %27 = vector.shape_cast %26 : vector<1xf32> to vector<1x1xf32>
    %28 = vector.broadcast %27 : vector<1x1xf32> to vector<1x16xf32>
    %29 = arith.subf %25, %28 : vector<1x16xf32>
    %30 = math.exp %29 : vector<1x16xf32>
    %cst_24 = arith.constant dense<0.000000e+00> : vector<1xf32>
    %31 = vector.multi_reduction <add>, %30, %cst_24 [1] : vector<1x16xf32> to vector<1xf32>
    %32 = vector.shape_cast %31 : vector<1xf32> to vector<1x1xf32>
    %33 = tpu.reciprocal %32 {approx = true} : vector<1x1xf32> -> vector<1x1xf32>
    %34 = vector.broadcast %33 : vector<1x1xf32> to vector<1x16xf32>
    %35 = arith.mulf %30, %34 : vector<1x16xf32>
    %cst_25 = arith.constant dense<0.000000e+00> : vector<1x128xf32>
    %36 = tpu.matmul %35, %23, %cst_25 {dimension_numbers = #tpu.dot_dimension_numbers<[1], [0], [0], [1], [0, 0, 1, 1], [], []>} : vector<1x16xf32>, vector<16x128xf32>, vector<1x128xf32> -> vector<1x128xf32>
    %c0_26 = arith.constant 0 : index
    %c0_27 = arith.constant 0 : index
    %37 = vector.load %arg14[%c0_26, %c0_27] : memref<1x768xf32, #tpu.memory_space<vmem>>, vector<1x128xf32>
    tpu.vector_store %arg14[%c0_26, %c0_27], %36 {strides = array<i32>} : memref<1x768xf32, #tpu.memory_space<vmem>>, vector<1x128xf32>,
    %38 = vector.extract_strided_slice %11 {offsets = [0, 128], sizes = [1, 128], strides = [1, 1]} : vector<1x768xf32> to vector<1x128xf32>
    %39 = vector.extract_strided_slice %19 {offsets = [0, 128], sizes = [16, 128], strides = [1, 1]} : vector<16x768xf32> to vector<16x128xf32>
    %40 = vector.extract_strided_slice %20 {offsets = [0, 128], sizes = [16, 128], strides = [1, 1]} : vector<16x768xf32> to vector<16x128xf32>
    %cst_28 = arith.constant dense<0.000000e+00> : vector<1x16xf32>
    %41 = tpu.matmul %38, %39, %cst_28 {dimension_numbers = #tpu.dot_dimension_numbers<[1], [1], [0], [0], [0, 0, 1, 0], [], []>} : vector<1x128xf32>, vector<16x128xf32>, vector<1x16xf32> -> vector<1x16xf32>
    %42 = arith.addf %41, %5 : vector<1x16xf32>
    %cst_29 = arith.constant dense<0xFF800000> : vector<1xf32>
    %43 = vector.multi_reduction <maximumf>, %42, %cst_29 [1] : vector<1x16xf32> to vector<1xf32>
    %44 = vector.shape_cast %43 : vector<1xf32> to vector<1x1xf32>
    %45 = vector.broadcast %44 : vector<1x1xf32> to vector<1x16xf32>
    %46 = arith.subf %42, %45 : vector<1x16xf32>
    %47 = math.exp %46 : vector<1x16xf32>
    %cst_30 = arith.constant dense<0.000000e+00> : vector<1xf32>
    %48 = vector.multi_reduction <add>, %47, %cst_30 [1] : vector<1x16xf32> to vector<1xf32>
    %49 = vector.shape_cast %48 : vector<1xf32> to vector<1x1xf32>
    %50 = tpu.reciprocal %49 {approx = true} : vector<1x1xf32> -> vector<1x1xf32>
    %51 = vector.broadcast %50 : vector<1x1xf32> to vector<1x16xf32>
    %52 = arith.mulf %47, %51 : vector<1x16xf32>
    %cst_31 = arith.constant dense<0.000000e+00> : vector<1x128xf32>
    %53 = tpu.matmul %52, %40, %cst_31 {dimension_numbers = #tpu.dot_dimension_numbers<[1], [0], [0], [1], [0, 0, 1, 1], [], []>} : vector<1x16xf32>, vector<16x128xf32>, vector<1x128xf32> -> vector<1x128xf32>
    %c0_32 = arith.constant 0 : index
    %c128 = arith.constant 128 : index
    %54 = vector.load %arg14[%c0_32, %c128] : memref<1x768xf32, #tpu.memory_space<vmem>>, vector<1x128xf32>
    tpu.vector_store %arg14[%c0_32, %c128], %53 {strides = array<i32>} : memref<1x768xf32, #tpu.memory_space<vmem>>, vector<1x128xf32>,
    %55 = vector.extract_strided_slice %11 {offsets = [0, 256], sizes = [1, 128], strides = [1, 1]} : vector<1x768xf32> to vector<1x128xf32>
    %56 = vector.extract_strided_slice %19 {offsets = [0, 256], sizes = [16, 128], strides = [1, 1]} : vector<16x768xf32> to vector<16x128xf32>
    %57 = vector.extract_strided_slice %20 {offsets = [0, 256], sizes = [16, 128], strides = [1, 1]} : vector<16x768xf32> to vector<16x128xf32>
    %cst_33 = arith.constant dense<0.000000e+00> : vector<1x16xf32>
    %58 = tpu.matmul %55, %56, %cst_33 {dimension_numbers = #tpu.dot_dimension_numbers<[1], [1], [0], [0], [0, 0, 1, 0], [], []>} : vector<1x128xf32>, vector<16x128xf32>, vector<1x16xf32> -> vector<1x16xf32>
    %59 = arith.addf %58, %5 : vector<1x16xf32>
    %cst_34 = arith.constant dense<0xFF800000> : vector<1xf32>
    %60 = vector.multi_reduction <maximumf>, %59, %cst_34 [1] : vector<1x16xf32> to vector<1xf32>
    %61 = vector.shape_cast %60 : vector<1xf32> to vector<1x1xf32>
    %62 = vector.broadcast %61 : vector<1x1xf32> to vector<1x16xf32>
    %63 = arith.subf %59, %62 : vector<1x16xf32>
    %64 = math.exp %63 : vector<1x16xf32>
    %cst_35 = arith.constant dense<0.000000e+00> : vector<1xf32>
    %65 = vector.multi_reduction <add>, %64, %cst_35 [1] : vector<1x16xf32> to vector<1xf32>
    %66 = vector.shape_cast %65 : vector<1xf32> to vector<1x1xf32>
    %67 = tpu.reciprocal %66 {approx = true} : vector<1x1xf32> -> vector<1x1xf32>
    %68 = vector.broadcast %67 : vector<1x1xf32> to vector<1x16xf32>
    %69 = arith.mulf %64, %68 : vector<1x16xf32>
    %cst_36 = arith.constant dense<0.000000e+00> : vector<1x128xf32>
    %70 = tpu.matmul %69, %57, %cst_36 {dimension_numbers = #tpu.dot_dimension_numbers<[1], [0], [0], [1], [0, 0, 1, 1], [], []>} : vector<1x16xf32>, vector<16x128xf32>, vector<1x128xf32> -> vector<1x128xf32>
    %c0_37 = arith.constant 0 : index
    %c256 = arith.constant 256 : index
    %71 = vector.load %arg14[%c0_37, %c256] : memref<1x768xf32, #tpu.memory_space<vmem>>, vector<1x128xf32>
    tpu.vector_store %arg14[%c0_37, %c256], %70 {strides = array<i32>} : memref<1x768xf32, #tpu.memory_space<vmem>>, vector<1x128xf32>,
    %72 = vector.extract_strided_slice %11 {offsets = [0, 384], sizes = [1, 128], strides = [1, 1]} : vector<1x768xf32> to vector<1x128xf32>
    %73 = vector.extract_strided_slice %19 {offsets = [0, 384], sizes = [16, 128], strides = [1, 1]} : vector<16x768xf32> to vector<16x128xf32>
    %74 = vector.extract_strided_slice %20 {offsets = [0, 384], sizes = [16, 128], strides = [1, 1]} : vector<16x768xf32> to vector<16x128xf32>
    %cst_38 = arith.constant dense<0.000000e+00> : vector<1x16xf32>
    %75 = tpu.matmul %72, %73, %cst_38 {dimension_numbers = #tpu.dot_dimension_numbers<[1], [1], [0], [0], [0, 0, 1, 0], [], []>} : vector<1x128xf32>, vector<16x128xf32>, vector<1x16xf32> -> vector<1x16xf32>
    %76 = arith.addf %75, %5 : vector<1x16xf32>
    %cst_39 = arith.constant dense<0xFF800000> : vector<1xf32>
    %77 = vector.multi_reduction <maximumf>, %76, %cst_39 [1] : vector<1x16xf32> to vector<1xf32>
    %78 = vector.shape_cast %77 : vector<1xf32> to vector<1x1xf32>
    %79 = vector.broadcast %78 : vector<1x1xf32> to vector<1x16xf32>
    %80 = arith.subf %76, %79 : vector<1x16xf32>
    %81 = math.exp %80 : vector<1x16xf32>
    %cst_40 = arith.constant dense<0.000000e+00> : vector<1xf32>
    %82 = vector.multi_reduction <add>, %81, %cst_40 [1] : vector<1x16xf32> to vector<1xf32>
    %83 = vector.shape_cast %82 : vector<1xf32> to vector<1x1xf32>
    %84 = tpu.reciprocal %83 {approx = true} : vector<1x1xf32> -> vector<1x1xf32>
    %85 = vector.broadcast %84 : vector<1x1xf32> to vector<1x16xf32>
    %86 = arith.mulf %81, %85 : vector<1x16xf32>
    %cst_41 = arith.constant dense<0.000000e+00> : vector<1x128xf32>
    %87 = tpu.matmul %86, %74, %cst_41 {dimension_numbers = #tpu.dot_dimension_numbers<[1], [0], [0], [1], [0, 0, 1, 1], [], []>} : vector<1x16xf32>, vector<16x128xf32>, vector<1x128xf32> -> vector<1x128xf32>
    %c0_42 = arith.constant 0 : index
    %c384 = arith.constant 384 : index
    %88 = vector.load %arg14[%c0_42, %c384] : memref<1x768xf32, #tpu.memory_space<vmem>>, vector<1x128xf32>
    tpu.vector_store %arg14[%c0_42, %c384], %87 {strides = array<i32>} : memref<1x768xf32, #tpu.memory_space<vmem>>, vector<1x128xf32>,
    %89 = vector.extract_strided_slice %11 {offsets = [0, 512], sizes = [1, 128], strides = [1, 1]} : vector<1x768xf32> to vector<1x128xf32>
    %90 = vector.extract_strided_slice %19 {offsets = [0, 512], sizes = [16, 128], strides = [1, 1]} : vector<16x768xf32> to vector<16x128xf32>
    %91 = vector.extract_strided_slice %20 {offsets = [0, 512], sizes = [16, 128], strides = [1, 1]} : vector<16x768xf32> to vector<16x128xf32>
    %cst_43 = arith.constant dense<0.000000e+00> : vector<1x16xf32>
    %92 = tpu.matmul %89, %90, %cst_43 {dimension_numbers = #tpu.dot_dimension_numbers<[1], [1], [0], [0], [0, 0, 1, 0], [], []>} : vector<1x128xf32>, vector<16x128xf32>, vector<1x16xf32> -> vector<1x16xf32>
    %93 = arith.addf %92, %5 : vector<1x16xf32>
    %cst_44 = arith.constant dense<0xFF800000> : vector<1xf32>
    %94 = vector.multi_reduction <maximumf>, %93, %cst_44 [1] : vector<1x16xf32> to vector<1xf32>
    %95 = vector.shape_cast %94 : vector<1xf32> to vector<1x1xf32>
    %96 = vector.broadcast %95 : vector<1x1xf32> to vector<1x16xf32>
    %97 = arith.subf %93, %96 : vector<1x16xf32>
    %98 = math.exp %97 : vector<1x16xf32>
    %cst_45 = arith.constant dense<0.000000e+00> : vector<1xf32>
    %99 = vector.multi_reduction <add>, %98, %cst_45 [1] : vector<1x16xf32> to vector<1xf32>
    %100 = vector.shape_cast %99 : vector<1xf32> to vector<1x1xf32>
    %101 = tpu.reciprocal %100 {approx = true} : vector<1x1xf32> -> vector<1x1xf32>
    %102 = vector.broadcast %101 : vector<1x1xf32> to vector<1x16xf32>
    %103 = arith.mulf %98, %102 : vector<1x16xf32>
    %cst_46 = arith.constant dense<0.000000e+00> : vector<1x128xf32>
    %104 = tpu.matmul %103, %91, %cst_46 {dimension_numbers = #tpu.dot_dimension_numbers<[1], [0], [0], [1], [0, 0, 1, 1], [], []>} : vector<1x16xf32>, vector<16x128xf32>, vector<1x128xf32> -> vector<1x128xf32>
    %c0_47 = arith.constant 0 : index
    %c512 = arith.constant 512 : index
    %105 = vector.load %arg14[%c0_47, %c512] : memref<1x768xf32, #tpu.memory_space<vmem>>, vector<1x128xf32>
    tpu.vector_store %arg14[%c0_47, %c512], %104 {strides = array<i32>} : memref<1x768xf32, #tpu.memory_space<vmem>>, vector<1x128xf32>,
    %106 = vector.extract_strided_slice %11 {offsets = [0, 640], sizes = [1, 128], strides = [1, 1]} : vector<1x768xf32> to vector<1x128xf32>
    %107 = vector.extract_strided_slice %19 {offsets = [0, 640], sizes = [16, 128], strides = [1, 1]} : vector<16x768xf32> to vector<16x128xf32>
    %108 = vector.extract_strided_slice %20 {offsets = [0, 640], sizes = [16, 128], strides = [1, 1]} : vector<16x768xf32> to vector<16x128xf32>
    %cst_48 = arith.constant dense<0.000000e+00> : vector<1x16xf32>
    %109 = tpu.matmul %106, %107, %cst_48 {dimension_numbers = #tpu.dot_dimension_numbers<[1], [1], [0], [0], [0, 0, 1, 0], [], []>} : vector<1x128xf32>, vector<16x128xf32>, vector<1x16xf32> -> vector<1x16xf32>
    %110 = arith.addf %109, %5 : vector<1x16xf32>
    %cst_49 = arith.constant dense<0xFF800000> : vector<1xf32>
    %111 = vector.multi_reduction <maximumf>, %110, %cst_49 [1] : vector<1x16xf32> to vector<1xf32>
    %112 = vector.shape_cast %111 : vector<1xf32> to vector<1x1xf32>
    %113 = vector.broadcast %112 : vector<1x1xf32> to vector<1x16xf32>
    %114 = arith.subf %110, %113 : vector<1x16xf32>
    %115 = math.exp %114 : vector<1x16xf32>
    %cst_50 = arith.constant dense<0.000000e+00> : vector<1xf32>
    %116 = vector.multi_reduction <add>, %115, %cst_50 [1] : vector<1x16xf32> to vector<1xf32>
    %117 = vector.shape_cast %116 : vector<1xf32> to vector<1x1xf32>
    %118 = tpu.reciprocal %117 {approx = true} : vector<1x1xf32> -> vector<1x1xf32>
    %119 = vector.broadcast %118 : vector<1x1xf32> to vector<1x16xf32>
    %120 = arith.mulf %115, %119 : vector<1x16xf32>
    %cst_51 = arith.constant dense<0.000000e+00> : vector<1x128xf32>
    %121 = tpu.matmul %120, %108, %cst_51 {dimension_numbers = #tpu.dot_dimension_numbers<[1], [0], [0], [1], [0, 0, 1, 1], [], []>} : vector<1x16xf32>, vector<16x128xf32>, vector<1x128xf32> -> vector<1x128xf32>
    %c0_52 = arith.constant 0 : index
    %c640 = arith.constant 640 : index
    %122 = vector.load %arg14[%c0_52, %c640] : memref<1x768xf32, #tpu.memory_space<vmem>>, vector<1x128xf32>
    tpu.vector_store %arg14[%c0_52, %c640], %121 {strides = array<i32>} : memref<1x768xf32, #tpu.memory_space<vmem>>, vector<1x128xf32>,
    %c0_53 = arith.constant 0 : index
    %c0_54 = arith.constant 0 : index
    %123 = vector.load %arg14[%c0_53, %c0_54] : memref<1x768xf32, #tpu.memory_space<vmem>>, vector<1x768xf32>
    %124 = arith.truncf %123 : vector<1x768xf32> to vector<1x768xbf16>
    %c0_55 = arith.constant 0 : index
    %c0_56 = arith.constant 0 : index
    %c0_57 = arith.constant 0 : index
    %125 = vector.load %arg9[%c0_55, %c0_56, %c0_57] : memref<1x768x128xbf16, #tpu.memory_space<vmem>>, vector<1x768x128xbf16>
    %126 = vector.shape_cast %125 : vector<1x768x128xbf16> to vector<768x128xbf16>
    %cst_58 = arith.constant dense<0.000000e+00> : vector<1x128xf32>
    %127 = tpu.matmul %124, %126, %cst_58 {dimension_numbers = #tpu.dot_dimension_numbers<[1], [0], [0], [1], [0, 0, 1, 1], [], []>} : vector<1x768xbf16>, vector<768x128xbf16>, vector<1x128xf32> -> vector<1x128xf32>
    %c0_59 = arith.constant 0 : index
    %c0_60 = arith.constant 0 : index
    %c0_61 = arith.constant 0 : index
    %128 = vector.load %arg10[%c0_59, %c0_60, %c0_61] : memref<1x1x128xf32, #tpu.memory_space<vmem>>, vector<1x1x128xf32>
    %129 = vector.shape_cast %128 : vector<1x1x128xf32> to vector<1x128xf32>
    %130 = arith.addf %127, %129 : vector<1x128xf32>
    %cst_62 = arith.constant 0.000000e+00 : f32
    %131 = vector.broadcast %cst_62 : f32 to vector<1x128xf32>
    %132 = arith.maximumf %130, %131 : vector<1x128xf32>
    %133 = arith.truncf %132 : vector<1x128xf32> to vector<1x128xbf16>
    %c0_63 = arith.constant 0 : index
    %c0_64 = arith.constant 0 : index
    %c0_65 = arith.constant 0 : index
    %134 = vector.load %arg11[%c0_63, %c0_64, %c0_65] : memref<1x128x128xbf16, #tpu.memory_space<vmem>>, vector<1x128x128xbf16>
    %135 = vector.shape_cast %134 : vector<1x128x128xbf16> to vector<128x128xbf16>
    %cst_66 = arith.constant dense<0.000000e+00> : vector<1x128xf32>
    %136 = tpu.matmul %133, %135, %cst_66 {dimension_numbers = #tpu.dot_dimension_numbers<[1], [0], [0], [1], [0, 0, 1, 1], [], []>} : vector<1x128xbf16>, vector<128x128xbf16>, vector<1x128xf32> -> vector<1x128xf32>
    %c0_67 = arith.constant 0 : index
    %c0_68 = arith.constant 0 : index
    %c0_69 = arith.constant 0 : index
    %137 = vector.load %arg12[%c0_67, %c0_68, %c0_69] : memref<1x1x128xf32, #tpu.memory_space<vmem>>, vector<1x1x128xf32>
    %138 = vector.shape_cast %137 : vector<1x1x128xf32> to vector<1x128xf32>
    %139 = arith.addf %136, %138 : vector<1x128xf32>
    %c0_70 = arith.constant 0 : index
    %c0_71 = arith.constant 0 : index
    %c0_72 = arith.constant 0 : index
    %c0_73 = arith.constant 0 : index
    %140 = vector.load %arg13[%c0_70, %c0_71, %c0_72, %c0_73] : memref<1x1x1x128xf32, #tpu.memory_space<vmem>>, vector<1x1x1x128xf32>
    %141 = vector.shape_cast %140 : vector<1x1x1x128xf32> to vector<1x128xf32>
    %142 = vector.shape_cast %139 : vector<1x128xf32> to vector<1x1x1x128xf32>
    tpu.vector_store %arg13[%c0_70, %c0_71, %c0_72, %c0_73], %142 {strides = array<i32>} : memref<1x1x1x128xf32, #tpu.memory_space<vmem>>, vector<1x1x1x128xf32>,
    return
  }
  func.func @transform_0(%arg0: i32, %arg1: i32) -> (i32, i32, i32) {
    %c0_i32 = arith.constant 0 : i32
    %c0_i32_0 = arith.constant 0 : i32
    %c0_i32_1 = arith.constant 0 : i32
    return %arg1, %c0_i32, %c0_i32_0 : i32, i32, i32
  }
  func.func @transform_1(%arg0: i32, %arg1: i32) -> (i32, i32, i32, i32) {
    %c0_i32 = arith.constant 0 : i32
    %c0_i32_0 = arith.constant 0 : i32
    %c0_i32_1 = arith.constant 0 : i32
    return %arg0, %arg1, %c0_i32, %c0_i32_0 : i32, i32, i32, i32
  }
  func.func @transform_2(%arg0: i32, %arg1: i32) -> (i32, i32, i32) {
    %c0_i32 = arith.constant 0 : i32
    %c0_i32_0 = arith.constant 0 : i32
    %c0_i32_1 = arith.constant 0 : i32
    return %arg0, %c0_i32, %c0_i32_0 : i32, i32, i32
  }
  func.func @transform_3(%arg0: i32, %arg1: i32) -> (i32, i32, i32) {
    %c0_i32 = arith.constant 0 : i32
    %c0_i32_0 = arith.constant 0 : i32
    %c0_i32_1 = arith.constant 0 : i32
    return %arg0, %c0_i32, %c0_i32_0 : i32, i32, i32
  }
  func.func @transform_4(%arg0: i32, %arg1: i32) -> (i32, i32, i32) {
    %c0_i32 = arith.constant 0 : i32
    %c0_i32_0 = arith.constant 0 : i32
    %c0_i32_1 = arith.constant 0 : i32
    return %arg0, %c0_i32, %c0_i32_0 : i32, i32, i32
  }
  func.func @transform_5(%arg0: i32, %arg1: i32) -> (i32, i32, i32) {
    %c0_i32 = arith.constant 0 : i32
    %c0_i32_0 = arith.constant 0 : i32
    %c0_i32_1 = arith.constant 0 : i32
    return %arg0, %c0_i32, %c0_i32_0 : i32, i32, i32
  }
  func.func @transform_6(%arg0: i32, %arg1: i32) -> (i32, i32, i32) {
    %c0_i32 = arith.constant 0 : i32
    %c0_i32_0 = arith.constant 0 : i32
    %c0_i32_1 = arith.constant 0 : i32
    return %arg0, %c0_i32, %c0_i32_0 : i32, i32, i32
  }
  func.func @transform_7(%arg0: i32, %arg1: i32) -> (i32, i32, i32) {
    %c0_i32 = arith.constant 0 : i32
    %c0_i32_0 = arith.constant 0 : i32
    %c0_i32_1 = arith.constant 0 : i32
    return %arg0, %c0_i32, %c0_i32_0 : i32, i32, i32
  }
  func.func @transform_8(%arg0: i32, %arg1: i32) -> (i32, i32, i32) {
    %c0_i32 = arith.constant 0 : i32
    %c0_i32_0 = arith.constant 0 : i32
    %c0_i32_1 = arith.constant 0 : i32
    return %arg0, %c0_i32, %c0_i32_0 : i32, i32, i32
  }
  func.func @transform_9(%arg0: i32, %arg1: i32) -> (i32, i32, i32) {
    %c0_i32 = arith.constant 0 : i32
    %c0_i32_0 = arith.constant 0 : i32
    %c0_i32_1 = arith.constant 0 : i32
    return %arg0, %c0_i32, %c0_i32_0 : i32, i32, i32
  }
  func.func @transform_10(%arg0: i32, %arg1: i32) -> (i32, i32, i32) {
    %c0_i32 = arith.constant 0 : i32
    %c0_i32_0 = arith.constant 0 : i32
    %c0_i32_1 = arith.constant 0 : i32
    return %arg0, %c0_i32, %c0_i32_0 : i32, i32, i32
  }
  func.func @transform_11(%arg0: i32, %arg1: i32) -> (i32, i32, i32, i32) {
    %c0_i32 = arith.constant 0 : i32
    %c0_i32_0 = arith.constant 0 : i32
    %c0_i32_1 = arith.constant 0 : i32
    return %arg0, %arg1, %c0_i32, %c0_i32_0 : i32, i32, i32, i32
  }
}

</mosaic_0001>

<bundles_post_ra>
// kernel: tpu_custom_call.1
= control target key start
LH: loop header
LB: loop body
LE: loop exit
PB: predicated region body
PF: predicated region fallthrough
CT: control target
= control target key end

     0   :  { %s14171_s0 = inlined_call_operand.vmem [shape: bf16[2,1,768], index: 0, kind: input, shape index: {}]   ;;  %s14172_s1 = inlined_call_operand.hbm [shape: bf16[3,2,16,768], index: 1, kind: input, shape index: {}]   ;;  %s14173_s2 = inlined_call_operand.hbm [shape: f32[3,1,16], index: 2, kind: input, shape index: {}]   ;;  %s14174_s3 = inlined_call_operand.hbm [shape: bf16[3,768,768], index: 3, kind: input, shape index: {}]   ;;  %s14175_s4 = inlined_call_operand.hbm [shape: f32[3,1,768], index: 4, kind: input, shape index: {}]   ;;  %s14176_s5 = inlined_call_operand.hbm [shape: bf16[3,768,1536], index: 5, kind: input, shape index: {}]   ;;  %s14177_s6 = inlined_call_operand.hbm [shape: f32[3,1,1536], index: 6, kind: input, shape index: {}]   ;;  %s14178_s7 = inlined_call_operand.hbm [shape: bf16[3,768,128], index: 7, kind: input, shape index: {}]   ;;  %s14179_s8 = inlined_call_operand.hbm [shape: f32[3,1,128], index: 8, kind: input, shape index: {}]   ;;  %s14180_s9 = inlined_call_operand.hbm [shape: bf16[3,128,128], index: 9, kind: input, shape index: {}]   ;;  %s14181_s10 = inlined_call_operand.hbm [shape: f32[3,1,128], index: 10, kind: input, shape index: {}]   ;;  %s14182_s11 = inlined_call_operand.hbm [shape: f32[3,2,1,128], index: 11, kind: output, shape index: {}]  }
   0x1   :  { %14202 = sst [smem:[#allocation41_spill]] %s14171_s0 }
   0x2   :  { %14203 = sst [smem:[#allocation42_spill]] %s14172_s1 }
   0x3   :  { %14204 = sst [smem:[#allocation43_spill]] %s14173_s2 }
   0x4   :  { %14205 = sst [smem:[#allocation44_spill]] %s14174_s3 }
   0x5   :  { %14206 = sst [smem:[#allocation45_spill]] %s14175_s4 }
   0x6   :  { %14207 = sst [smem:[#allocation46_spill]] %s14176_s5 }
   0x7   :  { %14208 = sst [smem:[#allocation47_spill]] %s14177_s6 }
   0x8   :  { %14209 = sst [smem:[#allocation48_spill]] %s14178_s7 }
   0x9   :  { %14210 = sst [smem:[#allocation49_spill]] %s14179_s8 }
   0xa   :  { %14211 = sst [smem:[#allocation50_spill]] %s14180_s9 }
   0xb   :  { %14212 = sst [smem:[#allocation51_spill]] %s14181_s10 }
   0xc   :  { %14213 = sst [smem:[#allocation52_spill]] %s14182_s11 }
   0xd   :  { %16 = vsyncpa [#allocation4], 0 }
   0xe   :  { %18 = vsyncpa [#allocation4 + $0x1], 0 }
   0xf   :  { %19 = vsyncpa [#allocation7], 0 }
  0x10   :  { %21 = vsyncpa [#allocation7 + $0x1], 0 }
  0x11   :  { %22 = vsyncpa [#allocation10], 0 }
  0x12   :  { %24 = vsyncpa [#allocation10 + $0x1], 0 }
  0x13   :  { %25 = vsyncpa [#allocation13], 0 }
  0x14   :  { %27 = vsyncpa [#allocation13 + $0x1], 0 }
  0x15   :  { %28 = vsyncpa [#allocation16], 0 }
  0x16   :  { %30 = vsyncpa [#allocation16 + $0x1], 0 }
  0x17   :  { %31 = vsyncpa [#allocation19], 0 }
  0x18   :  { %33 = vsyncpa [#allocation19 + $0x1], 0 }
  0x19   :  { %34 = vsyncpa [#allocation5], 0 }
  0x1a   :  { %36 = vsyncpa [#allocation5 + $0x1], 0  ;;  %s12411_s17 = smov 0   ;;  %s12413_s18 = smov 0  }
  0x1b   :  { %s12415_s19 = smov 0   ;;  %s12417_s20 = smov 0  }
  0x1c   :  { %s12419_s21 = smov 0   ;;  %s12421_s22 = smov 0  }
  0x1d   :  { %s12423_s23 = smov 0   ;;  %s12425_s24 = smov 0  }
  0x1e   :  { %s12427_s25 = smov 0   ;;  %s12429_s26 = smov 0  }
  0x1f   :  { %s12431_s27 = smov 0  }
  0x20 LB: > { %14214 = sst [smem:[#allocation28_spill]] %s12297_s19  ;;  %p97_p0 = scmp.eq.s32.totalorder %s12329_s27, 0  ;;  %s12329_s27 = sphi %s12431_s27, %s42_s27   ;;  %s12325_s26 = sphi %s12429_s26, %s14276_s26   ;;  %s12321_s25 = sphi %s12427_s25, %s14269_s25   ;;  %s12317_s24 = sphi %s12425_s24, %s14275_s24   ;;  %s12313_s23 = sphi %s12423_s23, %s14268_s23   ;;  %s12309_s22 = sphi %s12421_s22, %s14267_s22   ;;  %s12305_s21 = sphi %s12419_s21, %s14274_s21   ;;  %s12301_s20 = sphi %s12417_s20, %s14273_s20   ;;  %s12297_s19 = sphi %s12415_s19, %s14265_s19   ;;  %s12293_s18 = sphi %s12413_s18, %s14272_s18   ;;  %s12289_s17 = sphi %s12411_s17, %s14271_s17  }
  0x21   : > { %14215 = sst [smem:[#allocation29_spill]] %s12301_s20  ;;  %p122_p1 = scmp.ne.s32.totalorder %s12297_s19, %s12293_s18 }
  0x22   : > { %14216 = sst [smem:[#allocation30_spill]] %s12309_s22  ;;  %p14187_p2 = scmp.lt.s32.totalorder %s12329_s27, 6 }
  0x23   : > { %14217 = sst [smem:[#allocation31_spill]] %s12313_s23  ;;  %p124_p3 = por %p122_p1, %p97_p0 }
  0x24   : > { %14218 = sst [smem:[#allocation32_spill]] %s12317_s24  ;;  %s12473_s28 = sand.u32 1, %s12329_s27  }
  0x25   : > { %14219 = sst [smem:[#allocation33_spill]] %s12321_s25  ;;  %s12476_s29 = sand.u32 1, %s12297_s19  }
  0x26   : > { %14220 = sst [smem:[#allocation34_spill]] %s12329_s27  ;;  %s12479_s30 = sshll.u32 %s12325_s26, 4 }
  0x27   : > { %s14221_s2 = sld [smem:[#allocation43_spill]]  ;;  %s421_s15 = scalar_lea.vmem [#allocation6], %s12476_s29 }
  0x28   : > { %s428_s16 = sshll.u32 %s421_s15, 4  ;;  %p12488_p4 = pnand %p14187_p2, %p124_p3  ;;  %s429_s16 = int_to_ptr.vmem [resolvable:$true] %s428_s16 }
  0x29   : > { %p9179_p5 = scmp.ge.s32.totalorder %s12329_s27, 1  ;;  %p589_p6 = scmp.lt.s32.totalorder %s12329_s27, 7 }
  0x2a   : > { %s14185_s24 = scalar_lea.sflag [#allocation7], %s12473_s28  ;;  %p12497_p7 = pneg %p12488_p4 }
  0x2b   : > { %s11922_s12 = scalar_lea.vmem %s429_s16, 16  ;;  %s12331_s13 = smov [#allocation6]  }
  0x2c   : > { %p11923_p8 = scmp.ne.s32.totalorder %s429_s16, %s11922_s12  ;;  %s11927_s15 = sshll.u32 %s12331_s13, 4  ;;  %s11928_s15 = int_to_ptr.vmem [resolvable:$false] %s11927_s15 }
  0x2d   : > { %s426_s14 = scalar_lea.hbm %s14221_s2, %s12479_s30  ;;  %s11929_s2 = scalar_lea.vmem %s11928_s15, 32 }
  0x2e   : > { %p11925_p9 = pnand %p11923_p8, %p12497_p7  ;;  %p11930_p11 = scmp.lt.s32.totalorder %s429_s16, %s11928_s15 }
  0x2f   : > { %p11931_p12 = scmp.lt.s32.totalorder %s11929_s2, %s11922_s12 }
  0x30   : > { %p11926_p10 = pneg %p11925_p9 }
  0x31   : > { %p11932_p13 = por %p11931_p12, %p11930_p11 }
  0x33   : > { %p11933_p1 = pnand %p11932_p13, %p11926_p10 }
  0x35   : > { %11936 = shalt.err (!%p11933_p1)
}
  0x36   : > { %10381 = dma.hbm_to_vmem [thread:$0]  (!%p12488_p4), %s426_s14, 16, %s429_s16, %s14185_s24  }
  0x37   : > { %p12511_p3 = pnand %p9179_p5, %p589_p6  ;;  %s10338_s2 = smul.u32 6, %s12476_s29 }
  0x38   : > { %s10339_s12 = smul.u32 96, %s12325_s26  ;;  %s14226_s4 = sld [smem:[#allocation45_spill]] }
  0x39   : > { %s14224_s13 = scalar_select %p12511_p3, 1, 0 }
  0x3a   : > { %s10342_s15 = smul.u32 12, %s12476_s29  ;;  %s460_s7 = scalar_lea.vmem [#allocation9], %s10338_s2 }
  0x3b   : > { %14225 = sst [smem:[#allocation35_spill]] %s14224_s13  ;;  %s468_s5 = sshll.u32 %s460_s7, 4  ;;  %s469_s5 = int_to_ptr.vmem [resolvable:$true] %s468_s5 }
  0x3c   : > { %s14190_s3 = scalar_lea.sflag [#allocation10], %s12473_s28  ;;  %s11950_s1 = scalar_lea.vmem %s469_s5, 96 }
  0x3d   : > { %p11951_p8 = scmp.ne.s32.totalorder %s469_s5, %s11950_s1  ;;  %s12332_s14 = smov [#allocation9]  }
  0x3e   : > { %s466_s9 = scalar_lea.hbm %s14226_s4, %s10339_s12  ;;  %s11955_s16 = sshll.u32 %s12332_s14, 4  ;;  %s11956_s16 = int_to_ptr.vmem [resolvable:$false] %s11955_s16 }
  0x3f   : > { %p11953_p9 = pnand %p11951_p8, %p12497_p7  ;;  %s11957_s24 = scalar_lea.vmem %s11956_s16, 192 }
  0x40   : > { %p11958_p5 = scmp.lt.s32.totalorder %s469_s5, %s11956_s16  ;;  %p11959_p6 = scmp.lt.s32.totalorder %s11957_s24, %s11950_s1 }
  0x41   : > { %p11954_p10 = pneg %p11953_p9 }
  0x42   : > { %p11960_p11 = por %p11959_p6, %p11958_p5 }
  0x44   : > { %p11961_p12 = pnand %p11960_p11, %p11954_p10 }
  0x46   : > { %11964 = shalt.err (!%p11961_p12)
}
  0x47   : > { %10387 = dma.hbm_to_vmem [thread:$0]  (!%p12488_p4), %s466_s9, 96, %s469_s5, %s14190_s3  }
  0x48   : > { %s10343_s7 = smul.u32 192, %s12325_s26  ;;  %s500_s10 = scalar_lea.vmem [#allocation12], %s10342_s15 }
  0x49   : > { %s508_s23 = sshll.u32 %s500_s10, 4  ;;  %s14227_s6 = sld [smem:[#allocation47_spill]]  ;;  %s509_s23 = int_to_ptr.vmem [resolvable:$true] %s508_s23 }
  0x4a   : > { %s14189_s1 = scalar_lea.sflag [#allocation13], %s12473_s28  ;;  %s11978_s24 = scalar_lea.vmem %s509_s23, 192 }
  0x4b   : > { %p11979_p13 = scmp.ne.s32.totalorder %s509_s23, %s11978_s24  ;;  %s12333_s16 = smov [#allocation12]  }
  0x4c   : > { %s11983_s4 = sshll.u32 %s12333_s16, 4  ;;  %s11984_s4 = int_to_ptr.vmem [resolvable:$false] %s11983_s4 }
  0x4d   : > { %p11981_p1 = pnand %p11979_p13, %p12497_p7  ;;  %s11985_s13 = scalar_lea.vmem %s11984_s4, 384 }
  0x4e   : > { %p11986_p9 = scmp.lt.s32.totalorder %s509_s23, %s11984_s4  ;;  %p11987_p10 = scmp.lt.s32.totalorder %s11985_s13, %s11978_s24 }
  0x4f   : > { %s506_s14 = scalar_lea.hbm %s14227_s6, %s10343_s7  ;;  %p11982_p8 = pneg %p11981_p1 }
  0x50   : > { %p11988_p5 = por %p11987_p10, %p11986_p9 }
  0x52   : > { %p11989_p6 = pnand %p11988_p5, %p11982_p8 }
  0x54   : > { %11992 = shalt.err (!%p11989_p6)
}
  0x55   : > { %10393 = dma.hbm_to_vmem [thread:$0]  (!%p12488_p4), %s506_s14, 192, %s509_s23, %s14189_s1  }
  0x56   : > { %s14228_s8 = sld [smem:[#allocation49_spill]]  ;;  %s539_s7 = scalar_lea.vmem [#allocation15], %s12476_s29 }
  0x57   : > { %s546_s10 = sshll.u32 %s539_s7, 4  ;;  %s14188_s4 = scalar_lea.sflag [#allocation16], %s12473_s28  ;;  %s547_s10 = int_to_ptr.vmem [resolvable:$true] %s546_s10 }
  0x58   : > { %s12006_s13 = scalar_lea.vmem %s547_s10, 16  ;;  %s12334_s2 = smov [#allocation15]  }
  0x59   : > { %p12007_p11 = scmp.ne.s32.totalorder %s547_s10, %s12006_s13  ;;  %s12011_s12 = sshll.u32 %s12334_s2, 4  ;;  %s12012_s12 = int_to_ptr.vmem [resolvable:$false] %s12011_s12 }
  0x5a   : > { %s12013_s24 = scalar_lea.vmem %s12012_s12, 32  ;;  %p12014_p1 = scmp.lt.s32.totalorder %s547_s10, %s12012_s12 }
  0x5b   : > { %p12009_p12 = pnand %p12007_p11, %p12497_p7  ;;  %p12015_p8 = scmp.lt.s32.totalorder %s12013_s24, %s12006_s13 }
  0x5c   : > { %s544_s15 = scalar_lea.hbm %s14228_s8, %s12479_s30 }
  0x5d   : > { %p12010_p13 = pneg %p12009_p12  ;;  %p12016_p9 = por %p12015_p8, %p12014_p1 }
  0x5f   : > { %p12017_p10 = pnand %p12016_p9, %p12010_p13 }
  0x61   : > { %12020 = shalt.err (!%p12017_p10)
}
  0x62   : > { %10399 = dma.hbm_to_vmem [thread:$0]  (!%p12488_p4), %s544_s15, 16, %s547_s10, %s14188_s4  }
  0x63   : > { %s12552_s23 = sadd.s32 4294967295, %s12329_s27   ;;  %s9164_s14 = sadd.s32 4294967294, %s12329_s27  }
  0x64   : > { %s51_s16 = sadd.s32 1, %s12321_s25  ;;  %s54_s5 = sadd.s32 1, %s12325_s26 }
  0x65   : > { %p52_p5 = scmp.ge.s32.totalorder %s51_s16, 2  ;;  %s89_s9 = sadd.s32 1, %s12309_s22 }
  0x66   : > { %p96_p6 = scmp.ne.s32.totalorder %s12309_s22, %s12305_s21  ;;  %p14191_p13 = scmp.ne.s32.totalorder %s12305_s21, %s12301_s20 }
  0x67   : > { %s14278_s16 = smov (%p52_p5, %s51_s16), 0  ;;  %s14280_s5 = smov (!%p52_p5, %s54_s5), %s12325_s26 }
  0x68   : > { %14229 = sst [smem:[#allocation36_spill]] %s14278_s16  ;;  %s85_s15 = ssub.s32 %s12321_s25, %s14278_s16 }
  0x69   : > { %p12570_p11 = por %p97_p0, %p96_p6  ;;  %p56_p12 = scmp.ge.s32.totalorder %s14280_s5, 3 }
  0x6a   : > { %p103_p1 = scmp.eq.s32.totalorder %s12552_s23, 0  ;;  %s115_s10 = sadd.s32 1, %s12297_s19 }
  0x6b   : > { %s14282_s5 = smov (%p56_p12, %s14280_s5), 0  ;;  %p128_p0 = scmp.ne.s32.totalorder %s12293_s18, %s12289_s17 }
  0x6c   : > { %14231 = sst [smem:[#allocation37_spill]] %s14282_s5  ;;  %p12583_p8 = por %p103_p1, %p14191_p13 }
  0x6d   : > { %s84_s2 = ssub.s32 %s12325_s26, %s14282_s5  ;;  %p362_p9 = scmp.eq.s32.totalorder %s12552_s23, 5 }
  0x6e   : > { %s14232_s13 = scalar_select %p12583_p8, 1, 0 }
  0x6f   : > { %s86_s12 = sor.u32 %s85_s15, %s84_s2  ;;  %p113_p10 = scmp.eq.s32.totalorder %s84_s2, 0 }
  0x70   : > { %p87_p5 = scmp.eq.s32.totalorder %s86_s12, 0  ;;  %p12592_p2 = por %p128_p0, %p103_p1 }
  0x71   : > { %s12597_s4 = scalar_select %p113_p10, %s12297_s19, %s115_s10  }
  0x72   : > { %s12600_s1 = scalar_select %p87_p5, %s12309_s22, %s89_s9  }
  0x73   : > { %14234 = sst [smem:[#allocation38_spill]] %s12597_s4  ;;  %p12605_p12 = por %p362_p9, %p96_p6 }
  0x74   : > { %14235 = sst [smem:[#allocation39_spill]] %s12600_s1  ;;  %p368_p13 = scmp.eq.s32.totalorder %s9164_s14, 5 }
  0x75   : > { %s395_s17 = sand.u32 1, %s12309_s22   ;;  %s10334_s6 = smul.u32 12, %s12321_s25 }
  0x76   : > { %p14237_p8 = scmp.ne.s32.totalorder %s12305_s21, %s12301_s20  ;;  %s10333_s2 = smul.u32 48, %s395_s17 }
  0x77   : > { %p14240_p1 = scmp.lt.s32.totalorder %s12329_s27, 6  ;;  %s10335_s9 = smul.u32 24, %s12325_s26 }
  0x78   : > { %p12614_p3 = por %p368_p13, %p14237_p8  ;;  %s399_s8 = scalar_lea.vmem [#allocation3], %s10333_s2 }
  0x79   : > { %p12622_p0 = pnand %p14240_p1, %p12570_p11  ;;  %s405_s12 = sadd.s32 %s10335_s9, %s10334_s6 }
  0x7a   : > { %s14238_s15 = scalar_select %p12614_p3, 1, 0 }
  0x7b   : > { %s408_s5 = sshll.u32 %s399_s8, 4  ;;  %s9167_s14 = sshll.u32 %s405_s12, 6  ;;  %s409_s5 = int_to_ptr.vmem [resolvable:$true] %s408_s5 }
  0x7c   : > { %14239 = sst [smem:[#allocation40_spill]] %s14238_s15  ;;  %s396_s4 = scalar_lea.sflag [#allocation4], %s395_s17 }
  0x7d   : > { %s14242_s1 = sld [smem:[#allocation42_spill]]  ;;  %p12023_p6 = pneg %p12622_p0 }
  0x7e   : > { %s12034_s7 = scalar_lea.vmem %s409_s5, 768  ;;  %s12335_s19 = smov [#allocation3]  }
  0x7f   : > { %p12035_p13 = scmp.ne.s32.totalorder %s409_s5, %s12034_s7  ;;  %s12039_s15 = sshll.u32 %s12335_s19, 4  ;;  %s12040_s15 = int_to_ptr.vmem [resolvable:$false] %s12039_s15 }
  0x80   : > { %s12041_s20 = scalar_lea.vmem %s12040_s15, 1536  ;;  %p12042_p9 = scmp.lt.s32.totalorder %s409_s5, %s12040_s15 }
  0x81   : > { %p12037_p11 = pnand %p12035_p13, %p12023_p6  ;;  %p12043_p10 = scmp.lt.s32.totalorder %s12041_s20, %s12034_s7 }
  0x83   : > { %s407_s22 = scalar_lea.hbm %s14242_s1, %s9167_s14  ;;  %p12038_p8 = pneg %p12037_p11 }
  0x84   : > { %p12044_p5 = por %p12043_p10, %p12042_p9 }
  0x86   : > { %p12045_p1 = pnand %p12044_p5, %p12038_p8 }
  0x88   : > { %12048 = shalt.err (!%p12045_p1)
}
  0x89   : > { %s12336_s6 = smov 384   ;;  %s12337_s8 = smov 24  }
  0x8a   : > { %10378 = dma.hbm_to_vmem [thread:$0]  (!%p12622_p0), %s407_s22, 768, %s409_s5, %s396_s4, %s12336_s6, %s12336_s6, %s12337_s8  }
  0x8b   : > { %s10336_s25 = smul.u32 2304, %s12476_s29  ;;  %s14243_s2 = sld [smem:[#allocation44_spill]] }
  0x8c   : > { %s10337_s1 = smul.u32 36864, %s12325_s26  ;;  %s12338_s14 = smov [#allocation8]  }
  0x8d   : > { %s10340_s16 = smul.u32 4608, %s12476_s29  ;;  %s439_s20 = scalar_lea.vmem [#allocation8], %s10336_s25 }
  0x8e   : > { %s446_s9 = sshll.u32 %s439_s20, 4  ;;  %s12067_s7 = sshll.u32 %s12338_s14, 4  ;;  %s447_s9 = int_to_ptr.vmem [resolvable:$true] %s446_s9  ;;  %s12068_s7 = int_to_ptr.vmem [resolvable:$false] %s12067_s7 }
  0x8f   : > { %s12062_s12 = scalar_lea.vmem %s447_s9, 36864  ;;  %s12069_s10 = scalar_lea.vmem %s12068_s7, 73728 }
  0x90   : > { %p12063_p6 = scmp.ne.s32.totalorder %s447_s9, %s12062_s12  ;;  %p12070_p0 = scmp.lt.s32.totalorder %s447_s9, %s12068_s7 }
  0x91   : > { %s445_s15 = scalar_lea.hbm %s14243_s2, %s10337_s1  ;;  %p12071_p8 = scmp.lt.s32.totalorder %s12069_s10, %s12062_s12 }
  0x92   : > { %p12065_p13 = pnand %p12063_p6, %p12497_p7 }
  0x93   : > { %p12072_p9 = por %p12071_p8, %p12070_p0 }
  0x94   : > { %p12066_p11 = pneg %p12065_p13 }
  0x96   : > { %p12073_p10 = pnand %p12072_p9, %p12066_p11 }
  0x98   : > { %12076 = shalt.err (!%p12073_p10)
}
  0x99   : > { %s14244_s22 = scalar_lea.sflag [#allocation7], %s12473_s28  ;;  %s10341_s4 = smul.u32 73728, %s12325_s26 }
  0x9a   : > { %10384 = dma.hbm_to_vmem [thread:$0]  (!%p12488_p4), %s445_s15, 36864, %s447_s9, %s14244_s22, %s12336_s6, %s12336_s6, %s12337_s8  }
  0x9b   : > { %s479_s5 = scalar_lea.vmem [#allocation11], %s10340_s16  ;;  %s10344_s1 = smul.u32 384, %s12476_s29 }
  0x9c   : > { %s486_s25 = sshll.u32 %s479_s5, 4  ;;  %s14245_s2 = sld [smem:[#allocation46_spill]]  ;;  %s487_s25 = int_to_ptr.vmem [resolvable:$true] %s486_s25 }
  0x9d   : > { %s10345_s12 = smul.u32 6144, %s12325_s26  ;;  %s12090_s14 = scalar_lea.vmem %s487_s25, 73728 }
  0x9e   : > { %p12091_p5 = scmp.ne.s32.totalorder %s487_s25, %s12090_s14  ;;  %s12339_s7 = smov [#allocation11]  }
  0x9f   : > { %s12095_s10 = sshll.u32 %s12339_s7, 4  ;;  %s12096_s10 = int_to_ptr.vmem [resolvable:$false] %s12095_s10 }
  0xa0   : > { %p12093_p1 = pnand %p12091_p5, %p12497_p7  ;;  %s12097_s27 = scalar_lea.vmem %s12096_s10, 147456 }
  0xa1   : > { %p12098_p13 = scmp.lt.s32.totalorder %s487_s25, %s12096_s10  ;;  %p12099_p11 = scmp.lt.s32.totalorder %s12097_s27, %s12090_s14 }
  0xa2   : > { %s485_s20 = scalar_lea.hbm %s14245_s2, %s10341_s4  ;;  %p12094_p6 = pneg %p12093_p1 }
  0xa3   : > { %p12100_p0 = por %p12099_p11, %p12098_p13 }
  0xa5   : > { %p12101_p8 = pnand %p12100_p0, %p12094_p6 }
  0xa7   : > { %12104 = shalt.err (!%p12101_p8)
}
  0xa8   : > { %s12340_s6 = smov 768   ;;  %s12341_s8 = smov 48  }
  0xa9   : > { %s14246_s16 = scalar_lea.sflag [#allocation10], %s12473_s28  ;;  %s14247_s22 = sld [smem:[#allocation48_spill]] }
  0xaa   : > { %10390 = dma.hbm_to_vmem [thread:$0]  (!%p12488_p4), %s485_s20, 73728, %s487_s25, %s14246_s16, %s12340_s6, %s12340_s6, %s12341_s8  }
  0xab   : > { %s519_s5 = scalar_lea.vmem [#allocation14], %s10344_s1  ;;  %s12342_s27 = smov [#allocation14]  }
  0xac   : > { %s526_s19 = sshll.u32 %s519_s5, 4  ;;  %s12123_s2 = sshll.u32 %s12342_s27, 4  ;;  %s527_s19 = int_to_ptr.vmem [resolvable:$true] %s526_s19  ;;  %s12124_s2 = int_to_ptr.vmem [resolvable:$false] %s12123_s2 }
  0xad   : > { %s12118_s17 = scalar_lea.vmem %s527_s19, 6144  ;;  %s12125_s14 = scalar_lea.vmem %s12124_s2, 12288 }
  0xae   : > { %p12119_p9 = scmp.ne.s32.totalorder %s527_s19, %s12118_s17  ;;  %p12126_p1 = scmp.lt.s32.totalorder %s527_s19, %s12124_s2 }
  0xaf   : > { %s525_s4 = scalar_lea.hbm %s14247_s22, %s10345_s12  ;;  %p12127_p6 = scmp.lt.s32.totalorder %s12125_s14, %s12118_s17 }
  0xb0   : > { %p12121_p10 = pnand %p12119_p9, %p12497_p7 }
  0xb1   : > { %p12128_p13 = por %p12127_p6, %p12126_p1 }
  0xb2   : > { %p12122_p5 = pneg %p12121_p10 }
  0xb4   : > { %p12129_p11 = pnand %p12128_p13, %p12122_p5 }
  0xb6   : > { %12132 = shalt.err (!%p12129_p11)
}
  0xb7   : > { %s12343_s25 = smov 64   ;;  %s12344_s1 = smov 4  }
  0xb8   : > { %s14248_s20 = scalar_lea.sflag [#allocation13], %s12473_s28  ;;  %s9175_s12 = sshll.u32 %s12476_s29, 6 }
  0xb9   : > { %10396 = dma.hbm_to_vmem [thread:$0]  (!%p12488_p4), %s525_s4, 6144, %s527_s19, %s14248_s20, %s12343_s25, %s12343_s25, %s12344_s1  }
  0xba   : > { %s10117_s7 = sshll.u32 %s12325_s26, 10  ;;  %s14249_s8 = sld [smem:[#allocation50_spill]] }
  0xbb   : > { %s557_s15 = scalar_lea.vmem [#allocation17], %s9175_s12  ;;  %s12345_s5 = smov [#allocation17]  }
  0xbc   : > { %s564_s9 = sshll.u32 %s557_s15, 4  ;;  %s12151_s17 = sshll.u32 %s12345_s5, 4  ;;  %s565_s9 = int_to_ptr.vmem [resolvable:$true] %s564_s9  ;;  %s12152_s17 = int_to_ptr.vmem [resolvable:$false] %s12151_s17 }
  0xbd   : > { %s12146_s22 = scalar_lea.vmem %s565_s9, 1024  ;;  %s12153_s27 = scalar_lea.vmem %s12152_s17, 2048 }
  0xbe   : > { %p12147_p0 = scmp.ne.s32.totalorder %s565_s9, %s12146_s22  ;;  %p12154_p10 = scmp.lt.s32.totalorder %s565_s9, %s12152_s17 }
  0xbf   : > { %p12155_p5 = scmp.lt.s32.totalorder %s12153_s27, %s12146_s22 }
  0xc0   : > { %s563_s16 = scalar_lea.hbm %s14249_s8, %s10117_s7  ;;  %p12149_p8 = pnand %p12147_p0, %p12497_p7 }
  0xc1   : > { %p12156_p1 = por %p12155_p5, %p12154_p10 }
  0xc2   : > { %p12150_p9 = pneg %p12149_p8 }
  0xc4   : > { %p12157_p6 = pnand %p12156_p1, %p12150_p9 }
  0xc6   : > { %12160 = shalt.err (!%p12157_p6)
}
  0xc7   : > { %s14250_s4 = scalar_lea.sflag [#allocation16], %s12473_s28  ;;  %s14251_s14 = sld [smem:[#allocation51_spill]] }
  0xc8   : > { %10402 = dma.hbm_to_vmem [thread:$0]  (!%p12488_p4), %s563_s16, 1024, %s565_s9, %s14250_s4, %s12343_s25, %s12343_s25, %s12344_s1  }
  0xc9   : > { %s577_s12 = scalar_lea.vmem [#allocation18], %s12476_s29  ;;  %s575_s10 = scalar_lea.sflag [#allocation19], %s12476_s29 }
  0xca   : > { %s584_s7 = sshll.u32 %s577_s12, 4  ;;  %s12346_s8 = smov [#allocation18]   ;;  %s585_s7 = int_to_ptr.vmem [resolvable:$true] %s584_s7 }
  0xcb   : > { %s12174_s6 = scalar_lea.vmem %s585_s7, 16  ;;  %s12179_s28 = sshll.u32 %s12346_s8, 4  ;;  %s12180_s28 = int_to_ptr.vmem [resolvable:$false] %s12179_s28 }
  0xcc   : > { %p12175_p13 = scmp.ne.s32.totalorder %s585_s7, %s12174_s6  ;;  %s12181_s15 = scalar_lea.vmem %s12180_s28, 32 }
  0xcd   : > { %s582_s20 = scalar_lea.hbm %s14251_s14, %s12479_s30  ;;  %p12182_p8 = scmp.lt.s32.totalorder %s585_s7, %s12180_s28 }
  0xce   : > { %p12177_p11 = pnand %p12175_p13, %p12497_p7  ;;  %p12183_p9 = scmp.lt.s32.totalorder %s12181_s15, %s12174_s6 }
  0xd0   : > { %p12178_p0 = pneg %p12177_p11  ;;  %p12184_p10 = por %p12183_p9, %p12182_p8 }
  0xd2   : > { %p12185_p5 = pnand %p12184_p10, %p12178_p0 }
  0xd4   : > { %12188 = shalt.err (!%p12185_p5)
}
  0xd5   : > { %10405 = dma.hbm_to_vmem [thread:$0]  (!%p12488_p4), %s582_s20, 16, %s585_s7, %s575_s10  }
  0xd6   : > { %s14252_s30 = sld [smem:[#allocation35_spill]] }
  0xdc   : > { %p14253_p1 = scmp.ne.s32.totalorder %s14252_s30, 0 }
  0xdd   : > { %s12691_s0 = sand.u32 (!%p14253_p1), 1, %s12305_s21   ;;  %p14254_p7 = scmp.ne.s32.totalorder (!%p14253_p1), %s14232_s13, 0 }
  0xde   : > { %593 = sbr.rel (%p14253_p1) target bundleno = 4822 (0x12d6), region = 64  ;;  %s596_s25 = scalar_lea.sflag (!%p14253_p1), [#allocation4], %s12691_s0 }
  0xdf   : > { %s10346_s29 = smul.u32 (!%p14253_p1), 48, %s12691_s0 }
  0xe1   : > { %s12695_s1 = scalar_lea.vmem (!%p14253_p1), [#allocation3], %s10346_s29 }
  0xe3   : > { %12260 = dma.done.wait (%p14254_p7), %s596_s25, 768  }
  0xe4   : > { %12262 = vsyncadd (%p14254_p7), %s596_s25, 4294966528  ;;  %s604_s11 = sand.u32 1, %s12552_s23   ;;  %s12703_s16 = sand.u32 1, %s12293_s18  }
  0xe5   : > { %s605_s9 = scalar_lea.sflag [#allocation7], %s604_s11  ;;  %s607_s22 = scalar_lea.vmem [#allocation6], %s12703_s16 }
  0xe6   : > { %12264 = dma.done.wait (%p12592_p2), %s605_s9, 36880  }
  0xe7   : > { %12266 = vsyncadd (%p12592_p2), %s605_s9, 4294930416  ;;  %s10347_s5 = smul.u32 2304, %s12703_s16  ;;  %s622_s27 = scalar_lea.sflag [#allocation10], %s604_s11 }
  0xe8   : > { %s10348_s13 = smul.u32 6, %s12703_s16 }
  0xe9   : > { %s12712_s17 = scalar_lea.vmem [#allocation8], %s10347_s5 }
  0xea   : > { %s12714_s4 = scalar_lea.vmem [#allocation9], %s10348_s13 }
  0xeb   : > { %12268 = dma.done.wait (%p12592_p2), %s622_s27, 73824  }
  0xec   : > { %12270 = vsyncadd (%p12592_p2), %s622_s27, 4294893472  ;;  %s10349_s23 = smul.u32 4608, %s12703_s16  ;;  %s640_s14 = scalar_lea.sflag [#allocation13], %s604_s11 }
  0xed   : > { %s10350_s19 = smul.u32 12, %s12703_s16 }
  0xee   : > { %s12722_s2 = scalar_lea.vmem [#allocation11], %s10349_s23 }
  0xef   : > { %s12724_s20 = scalar_lea.vmem [#allocation12], %s10350_s19 }
  0xf0   : > { %12272 = dma.done.wait (%p12592_p2), %s640_s14, 6336  }
  0xf1   : > { %12274 = vsyncadd (%p12592_p2), %s640_s14, 4294960960  ;;  %s10351_s12 = smul.u32 384, %s12703_s16  ;;  %s658_s10 = scalar_lea.sflag [#allocation16], %s604_s11 }
  0xf2   : > { %s660_s6 = scalar_lea.vmem [#allocation15], %s12703_s16 }
  0xf3   : > { %s12731_s7 = scalar_lea.vmem [#allocation14], %s10351_s12 }
  0xf4   : > { %12276 = dma.done.wait (%p12592_p2), %s658_s10, 1040  }
  0xf5   : > { %12278 = vsyncadd (%p12592_p2), %s658_s10, 4294966256  ;;  %s9180_s8 = sshll.u32 %s12703_s16, 6  ;;  %s675_s15 = scalar_lea.sflag [#allocation19], %s12703_s16 }
  0xf6   : > { %s12739_s28 = scalar_lea.vmem [#allocation17], %s9180_s8  ;;  %s677_s30 = scalar_lea.vmem [#allocation18], %s12703_s16 }
  0xf7   : > { %12280 = dma.done.wait (%p12592_p2), %s675_s15, 16  }
  0xf8   : > { %12282 = vsyncadd (%p12592_p2), %s675_s15, 4294967280  ;;  %v10509_v0 = vld [vmem:[%s12712_s17 + $0x154] ss:$24 sps:$4 sm:$0xff]   ;;  %v10513_v2 = vld [vmem:[%s12712_s17 + $0x150] ss:$24 sps:$4 sm:$0xff]   ;;  %s14255_s24 = sld [smem:[#allocation31_spill]]  ;;  %v1068_v38 = vlaneseq }
  0xf9   : > { %v10511_v1 = vld [vmem:[%s12712_s17 + $0x454] ss:$24 sps:$4 sm:$0xff]   ;;  %2588 = vmatprep.subr.bf16.mxu0 %v10509_v0  ;;  %v10514_v3 = vld [vmem:[%s12712_s17 + $0x450] ss:$24 sps:$4 sm:$0xff]   ;;  %v10515_v4 = vld [vmem:[%s12712_s17 + $0x124] ss:$24 sps:$4 sm:$0xff]  }
  0xfa   : > { %2629 = vmatprep.subr.bf16.mxu1 %v10511_v1  ;;  %2589 = vmatpush1.bf16.msra.mxu0 %v10513_v2  ;;  %v10517_v5 = vld [vmem:[%s12712_s17 + $0x424] ss:$24 sps:$4 sm:$0xff]   ;;  %v10519_v6 = vld [vmem:[%s12712_s17 + $0x120] ss:$24 sps:$4 sm:$0xff]   ;;  %v10521_v8 = vld [vmem:[%s12712_s17 + $0xf4] ss:$24 sps:$4 sm:$0xff]  }
  0xfb   : > { %2630 = vmatpush1.bf16.msra.mxu1 %v10514_v3  ;;  %2590 = vmatprep.subr.bf16.mxu0 %v10515_v4  ;;  %v10520_v7 = vld [vmem:[%s12712_s17 + $0x420] ss:$24 sps:$4 sm:$0xff]   ;;  %v10523_v9 = vld [vmem:[%s12712_s17 + $0x3f4] ss:$24 sps:$4 sm:$0xff]   ;;  %v10525_v10 = vld [vmem:[%s12712_s17 + $0xf0] ss:$24 sps:$4 sm:$0xff]  }
  0xfc   : > { %2631 = vmatprep.subr.bf16.mxu1 %v10517_v5  ;;  %v10526_v11 = vld [vmem:[%s12712_s17 + $0x3f0] ss:$24 sps:$4 sm:$0xff]   ;;  %v10527_v12 = vld [vmem:[%s12712_s17 + $0xc4] ss:$24 sps:$4 sm:$0xff]   ;;  %v10531_v14 = vld [vmem:[%s12712_s17 + $0xc0] ss:$24 sps:$4 sm:$0xff]  }
  0xfd   : > { %v10529_v13 = vld [vmem:[%s12712_s17 + $0x3c4] ss:$24 sps:$4 sm:$0xff]   ;;  %v10532_v15 = vld [vmem:[%s12712_s17 + $0x3c0] ss:$24 sps:$4 sm:$0xff]   ;;  %v10533_v16 = vld [vmem:[%s12712_s17 + $0x94] ss:$24 sps:$4 sm:$0xff]  }
  0xfe   : > { %2591 = vmatpush1.bf16.msra.mxu0 %v10519_v6  ;;  %v10535_v17 = vld [vmem:[%s12712_s17 + $0x394] ss:$24 sps:$4 sm:$0xff]   ;;  %v10537_v18 = vld [vmem:[%s12712_s17 + $0x90] ss:$24 sps:$4 sm:$0xff]   ;;  %v10539_v20 = vld [vmem:[%s12712_s17 + $0x64] ss:$24 sps:$4 sm:$0xff]  }
  0xff   : > { %2632 = vmatpush1.bf16.msra.mxu1 %v10520_v7  ;;  %2592 = vmatprep.subr.bf16.mxu0 %v10521_v8  ;;  %v10538_v19 = vld [vmem:[%s12712_s17 + $0x390] ss:$24 sps:$4 sm:$0xff]   ;;  %v10541_v21 = vld [vmem:[%s12712_s17 + $0x364] ss:$24 sps:$4 sm:$0xff]   ;;  %v10543_v22 = vld [vmem:[%s12712_s17 + $0x60] ss:$24 sps:$4 sm:$0xff]  }
 0x100   : > { %2633 = vmatprep.subr.bf16.mxu1 %v10523_v9  ;;  %v10544_v23 = vld [vmem:[%s12712_s17 + $0x360] ss:$24 sps:$4 sm:$0xff]   ;;  %v10545_v24 = vld [vmem:[%s12712_s17 + $0x34] ss:$24 sps:$4 sm:$0xff]   ;;  %v10549_v26 = vld [vmem:[%s12712_s17 + $0x30] ss:$24 sps:$4 sm:$0xff]  }
 0x101   : > { %v10547_v25 = vld [vmem:[%s12712_s17 + $0x334] ss:$24 sps:$4 sm:$0xff]   ;;  %v10550_v27 = vld [vmem:[%s12712_s17 + $0x330] ss:$24 sps:$4 sm:$0xff]   ;;  %v10551_v28 = vld [vmem:[%s12712_s17 + $0x4] ss:$24 sps:$4 sm:$0xff]  }
 0x102   : > { %2593 = vmatpush1.bf16.msra.mxu0 %v10525_v10  ;;  %v10553_v29 = vld [vmem:[%s12712_s17 + $0x304] ss:$24 sps:$4 sm:$0xff]   ;;  %p761_p2 = scmp.lt.s32.totalorder %s14255_s24, 1  ;;  %v10555_v30 = vld [vmem:[%s12712_s17] ss:$24 sps:$4 sm:$0xff]   ;;  %v12789_v43 = vshrl.u32 %v1068_v38, 7 }
 0x103   : > { %2634 = vmatpush1.bf16.msra.mxu1 %v10526_v11  ;;  %2594 = vmatprep.subr.bf16.mxu0 %v10527_v12  ;;  %v10556_v31 = vld [vmem:[%s12712_s17 + $0x300] ss:$24 sps:$4 sm:$0xff]   ;;  %v10557_v32 = vld [vmem:[%s12712_s17 + $0x2d4] ss:$24 sps:$4 sm:$0xff]   ;;  %v10561_v34 = vld [vmem:[%s12712_s17 + $0x2d0] ss:$24 sps:$4 sm:$0xff]  }
 0x104   : > { %2635 = vmatprep.subr.bf16.mxu1 %v10529_v13  ;;  %v10559_v33 = vld [vmem:[%s12712_s17 + $0x5d4] ss:$24 sps:$4 sm:$0xff]   ;;  %v10562_v35 = vld [vmem:[%s12712_s17 + $0x5d0] ss:$24 sps:$4 sm:$0xff]   ;;  %s762_s29 = scalar_select %p761_p2, %s14255_s24, 1  ;;  %vm12349_vm0 = vmmov 0  }
 0x105   : > { %v12347_v36 = vmov 1966171168   ;;  %v10563_v39 = vld [vmem:[%s12712_s17 + $0x2a4] ss:$24 sps:$4 sm:$0xff]   ;;  %v10567_v41 = vld [vmem:[%s12712_s17 + $0x2a0] ss:$24 sps:$4 sm:$0xff]  }
 0x106   : > { %2595 = vmatpush1.bf16.msra.mxu0 %v10531_v14  ;;  %v1066_v37 = vunpack.c.l.s4 %v12347_v36  ;;  %v10565_v40 = vld [vmem:[%s12712_s17 + $0x5a4] ss:$24 sps:$4 sm:$0xff]   ;;  %s10352_s25 = smul.u32 6, %s762_s29  ;;  %v10568_v44 = vld [vmem:[%s12712_s17 + $0x5a0] ss:$24 sps:$4 sm:$0xff]   ;;  %s14256_s5 = sld [smem:[#allocation41_spill]] }
 0x107   : > { %2636 = vmatpush1.bf16.msra.mxu1 %v10532_v15  ;;  %2596 = vmatprep.subr.bf16.mxu0 %v10533_v16  ;;  %v10569_v45 = vld [vmem:[%s12712_s17 + $0x274] ss:$24 sps:$4 sm:$0xff]   ;;  %v10573_v47 = vld [vmem:[%s12712_s17 + $0x270] ss:$24 sps:$4 sm:$0xff]   ;;  %v10575_v50 = vld [vmem:[%s12712_s17 + $0x244] ss:$24 sps:$4 sm:$0xff]  }
 0x108   : > { %2637 = vmatprep.subr.bf16.mxu1 %v10535_v17  ;;  %v1067_v42 = vunpack.c.0.s8 %v1066_v37  ;;  %v10571_v46 = vld [vmem:[%s12712_s17 + $0x574] ss:$24 sps:$4 sm:$0xff]   ;;  %v10574_v48 = vld [vmem:[%s12712_s17 + $0x570] ss:$24 sps:$4 sm:$0xff]   ;;  %v10577_v51 = vld [vmem:[%s12712_s17 + $0x544] ss:$24 sps:$4 sm:$0xff]  }
 0x109   : > { %v10579_v53 = vld [vmem:[%s12712_s17 + $0x240] ss:$24 sps:$4 sm:$0xff]   ;;  %v10581_v57 = vld [vmem:[%s12712_s17 + $0x214] ss:$24 sps:$4 sm:$0xff]   ;;  %v10585_v61 = vld [vmem:[%s12712_s17 + $0x210] ss:$24 sps:$4 sm:$0xff]  }
 0x10a   : > { %2597 = vmatpush1.bf16.msra.mxu0 %v10537_v18  ;;  %v12800_v49 = vsub.s32 %v1067_v42, %v12789_v43  ;;  %v10580_v56 = vld [vmem:[%s12712_s17 + $0x540] ss:$24 sps:$4 sm:$0xff]   ;;  %v10583_v58 = vld [vmem:[%s12712_s17 + $0x514] ss:$24 sps:$4 sm:$0xff]   ;;  %v10586_v0 = vld [vmem:[%s12712_s17 + $0x510] ss:$24 sps:$4 sm:$0xff]  }
 0x10b   : > { %2638 = vmatpush1.bf16.msra.mxu1 %v10538_v19  ;;  %2598 = vmatprep.subr.bf16.mxu0 %v10539_v20  ;;  %v10587_v1 = vld [vmem:[%s12712_s17 + $0x1e4] ss:$24 sps:$4 sm:$0xff]   ;;  %v10591_v4 = vld [vmem:[%s12712_s17 + $0x1e0] ss:$24 sps:$4 sm:$0xff]   ;;  %v10593_v6 = vld [vmem:[%s12712_s17 + $0x1b4] ss:$24 sps:$4 sm:$0xff]  }
 0x10c   : > { %2639 = vmatprep.subr.bf16.mxu1 %v10541_v21  ;;  %s764_s13 = scalar_lea.vmem %s14256_s5, %s10352_s25  ;;  %v10589_v2 = vld [vmem:[%s12712_s17 + $0x4e4] ss:$24 sps:$4 sm:$0xff]   ;;  %v10592_v5 = vld [vmem:[%s12712_s17 + $0x4e0] ss:$24 sps:$4 sm:$0xff]   ;;  %v10595_v7 = vld [vmem:[%s12712_s17 + $0x4b4] ss:$24 sps:$4 sm:$0xff]  }
 0x10d   : > { %v766_v52 = vld [vmem:[%s764_s13] sm:$0x3f]  ;;  %v10597_v8 = vld [vmem:[%s12712_s17 + $0x1b0] ss:$24 sps:$4 sm:$0xff]   ;;  %v10607_v15 = vld [vmem:[%s12712_s17 + $0x754] ss:$24 sps:$4 sm:$0xff]  }
 0x10e   : > { %2599 = vmatpush1.bf16.msra.mxu0 %v10543_v22  ;;  %v1071_v54 = vrot.slane %v766_v52, %v12800_v49  ;;  %v1064_v55 = vcombine.high %v766_v52, %v766_v52  ;;  %v10598_v9 = vld [vmem:[%s12712_s17 + $0x4b0] ss:$24 sps:$4 sm:$0xff]   ;;  %v10599_v10 = vld [vmem:[%s12712_s17 + $0x184] ss:$24 sps:$4 sm:$0xff]   ;;  %v10603_v12 = vld [vmem:[%s12712_s17 + $0x180] ss:$24 sps:$4 sm:$0xff]  }
 0x10f   : > { %2640 = vmatpush1.bf16.msra.mxu1 %v10544_v23  ;;  %2600 = vmatprep.subr.bf16.mxu0 %v10545_v24  ;;  %v10601_v11 = vld [vmem:[%s12712_s17 + $0x484] ss:$24 sps:$4 sm:$0xff]   ;;  %v10604_v14 = vld [vmem:[%s12712_s17 + $0x480] ss:$24 sps:$4 sm:$0xff]   ;;  %v10605_v19 = vld [vmem:[%s12712_s17 + $0x750] ss:$24 sps:$4 sm:$0xff]  }
 0x110   : > { %2641 = vmatprep.subr.bf16.mxu1 %v10547_v25  ;;  %v1079_v59 = vcombine.high %v1071_v54, %v1071_v54  ;;  %v1078_v60 = vrot.slane %v1064_v55, %v12800_v49  ;;  %v12836_v13 = vrot.slane %v1071_v54, %v12800_v49  ;;  %v10610_v16 = vld [vmem:[%s12712_s17 + $0x15c] ss:$24 sps:$4 sm:$0xff]   ;;  %v10608_v20 = vld [vmem:[%s12712_s17 + $0x158] ss:$24 sps:$4 sm:$0xff]   ;;  %v10616_v22 = vld [vmem:[%s12712_s17 + $0x12c] ss:$24 sps:$4 sm:$0xff]  }
 0x111   : > { %v10613_v21 = vld [vmem:[%s12712_s17 + $0x724] ss:$24 sps:$4 sm:$0xff]   ;;  %v10611_v24 = vld [vmem:[%s12712_s17 + $0x720] ss:$24 sps:$4 sm:$0xff]   ;;  %v10629_v36 = vld [vmem:[%s12712_s17 + $0x690] ss:$24 sps:$4 sm:$0xff]  }
 0x112   : > { %2601 = vmatpush1.bf16.msra.mxu0 %v10549_v26  ;;  %v12812_v62 = vrot.slane %v1079_v59, %v12800_v49  ;;  %v12815_v63 = vrot.slane %v1078_v60, %v12800_v49  ;;  %v1080_v17 = vcombine.high %v1078_v60, %v1078_v60  ;;  %v12843_v18 = vcombine.high %v12836_v13, %v12836_v13  ;;  %v10614_v25 = vld [vmem:[%s12712_s17 + $0x128] ss:$24 sps:$4 sm:$0xff]   ;;  %v10619_v26 = vld [vmem:[%s12712_s17 + $0x6f4] ss:$24 sps:$4 sm:$0xff]   ;;  %v10632_v37 = vld [vmem:[%s12712_s17 + $0x98] ss:$24 sps:$4 sm:$0xff]  }
 0x113   : > { %2642 = vmatpush1.bf16.msra.mxu1 %v10550_v27  ;;  %2602 = vmatprep.subr.bf16.mxu0 %v10551_v28  ;;  %v10622_v27 = vld [vmem:[%s12712_s17 + $0xfc] ss:$24 sps:$4 sm:$0xff]   ;;  %v10617_v28 = vld [vmem:[%s12712_s17 + $0x6f0] ss:$24 sps:$4 sm:$0xff]   ;;  %vm7351_vm1 = vcmask 122880   ;;  %vm7363_vm2 = vcmask 130048  }
 0x114   : > { %2643 = vmatprep.subr.bf16.mxu1 %v10553_v29  ;;  %v12822_v3 = vcombine.high %v12812_v62, %v12812_v62  ;;  %2620 = vmatprep.mubr.bf16.mxu0 %v12812_v62  ;;  %v12850_v23 = vrot.slane %v1080_v17, %v12800_v49  ;;  %v10620_v29 = vld [vmem:[%s12712_s17 + $0xf8] ss:$24 sps:$4 sm:$0xff]   ;;  %v10638_v42 = vld [vmem:[%s12712_s17 + $0x68] ss:$24 sps:$4 sm:$0xff]   ;;  %v10652_v49 = vld [vmem:[%s12712_s17 + $0xc] ss:$24 sps:$4 sm:$0xff]  }
 0x115   : > { %v10655_v52 = vld [vmem:[%s12712_s17 + $0x8d4] ss:$24 sps:$4 sm:$0xff]   ;;  %v10653_v54 = vld [vmem:[%s12712_s17 + $0x8d0] ss:$24 sps:$4 sm:$0xff]   ;;  %vm13946_vm3 = vcmp.lt.s32.totalorder %v1068_v38, 128  ;;  %s14260_s14 = sld [smem:[#allocation52_spill]] }
 0x116   : > { %2603 = vmatpush1.bf16.msra.mxu0 %v10555_v30  ;;  %2661 = vmatprep.mubr.bf16.mxu1 %v12822_v3  ;;  %v10625_v30 = vld [vmem:[%s12712_s17 + $0x6c4] ss:$24 sps:$4 sm:$0xff]   ;;  %v10656_v55 = vld [vmem:[%s12712_s17 + $0x2d8] ss:$24 sps:$4 sm:$0xff]   ;;  %v10662_v59 = vld [vmem:[%s12712_s17 + $0x2a8] ss:$24 sps:$4 sm:$0xff]  }
 0x117   : > { %2644 = vmatpush1.bf16.msra.mxu1 %v10556_v31  ;;  %2604 = vmatprep.subr.bf16.mxu0 %v10557_v32  ;;  %v10628_v31 = vld [vmem:[%s12712_s17 + $0xcc] ss:$24 sps:$4 sm:$0xff]   ;;  %v10623_v32 = vld [vmem:[%s12712_s17 + $0x6c0] ss:$24 sps:$4 sm:$0xff]   ;;  %v10694_v17 = vld [vmem:[%s12712_s17 + $0x1bc] ss:$24 sps:$4 sm:$0xff]  }
 0x118   : > { %2645 = vmatprep.subr.bf16.mxu1 %v10559_v33  ;;  %v10626_v33 = vld [vmem:[%s12712_s17 + $0xc8] ss:$24 sps:$4 sm:$0xff]   ;;  %v10667_v60 = vld [vmem:[%s12712_s17 + $0x874] ss:$24 sps:$4 sm:$0xff]   ;;  %s8869_s16 = scalar_lea.sflag [#allocation5], %s12691_s0 }
 0x11a   : > { %2605 = vmatpush2.bf16.msra.mxu0 %v10561_v34  ;;  %v10631_v34 = vld [vmem:[%s12712_s17 + $0x694] ss:$24 sps:$4 sm:$0xff]  }
 0x11b   : > { %2646 = vmatpush2.bf16.msra.mxu1 %v10562_v35  ;;  %2606 = vmatprep.subr.bf16.mxu0 %v10563_v39  ;;  %v10634_v35 = vld [vmem:[%s12712_s17 + $0x9c] ss:$24 sps:$4 sm:$0xff]  }
 0x11c   : > { %2647 = vmatprep.subr.bf16.mxu1 %v10565_v40  ;;  %v10637_v39 = vld [vmem:[%s12712_s17 + $0x664] ss:$24 sps:$4 sm:$0xff]  }
 0x11d   : > { %v10640_v40 = vld [vmem:[%s12712_s17 + $0x6c] ss:$24 sps:$4 sm:$0xff]  }
 0x11e   : > { %2607 = vmatpush2.bf16.msra.mxu0 %v10567_v41  ;;  %v10635_v41 = vld [vmem:[%s12712_s17 + $0x660] ss:$24 sps:$4 sm:$0xff]  }
 0x11f   : > { %2648 = vmatpush2.bf16.msra.mxu1 %v10568_v44  ;;  %2608 = vmatprep.subr.bf16.mxu0 %v10569_v45  ;;  %v10643_v44 = vld [vmem:[%s12712_s17 + $0x634] ss:$24 sps:$4 sm:$0xff]  }
 0x120   : > { %2649 = vmatprep.subr.bf16.mxu1 %v10571_v46  ;;  %v10646_v45 = vld [vmem:[%s12712_s17 + $0x3c] ss:$24 sps:$4 sm:$0xff]   ;;  %v10641_v46 = vld [vmem:[%s12712_s17 + $0x630] ss:$24 sps:$4 sm:$0xff]  }
 0x122   : > { %2609 = vmatpush2.bf16.msra.mxu0 %v10573_v47  ;;  %v10644_v47 = vld [vmem:[%s12712_s17 + $0x38] ss:$24 sps:$4 sm:$0xff]  }
 0x123   : > { %2650 = vmatpush2.bf16.msra.mxu1 %v10574_v48  ;;  %2610 = vmatprep.subr.bf16.mxu0 %v10575_v50  ;;  %v10649_v48 = vld [vmem:[%s12712_s17 + $0x604] ss:$24 sps:$4 sm:$0xff]   ;;  %v10647_v50 = vld [vmem:[%s12712_s17 + $0x600] ss:$24 sps:$4 sm:$0xff]  }
 0x124   : > { %2651 = vmatprep.subr.bf16.mxu1 %v10577_v51  ;;  %v10650_v51 = vld [vmem:[%s12712_s17 + $0x8] ss:$24 sps:$4 sm:$0xff]  }
 0x126   : > { %2611 = vmatpush2.bf16.msra.mxu0 %v10579_v53  ;;  %v10658_v53 = vld [vmem:[%s12712_s17 + $0x2dc] ss:$24 sps:$4 sm:$0xff]  }
 0x127   : > { %2652 = vmatpush2.bf16.msra.mxu1 %v10580_v56  ;;  %2612 = vmatprep.subr.bf16.mxu0 %v10581_v57  ;;  %v10661_v56 = vld [vmem:[%s12712_s17 + $0x8a4] ss:$24 sps:$4 sm:$0xff]  }
 0x128   : > { %2653 = vmatprep.subr.bf16.mxu1 %v10583_v58  ;;  %v10664_v57 = vld [vmem:[%s12712_s17 + $0x2ac] ss:$24 sps:$4 sm:$0xff]   ;;  %v10659_v58 = vld [vmem:[%s12712_s17 + $0x8a0] ss:$24 sps:$4 sm:$0xff]  }
 0x12a   : > { %2613 = vmatpush2.bf16.msra.mxu0 %v10585_v61  ;;  %v10670_v61 = vld [vmem:[%s12712_s17 + $0x27c] ss:$24 sps:$4 sm:$0xff]  }
 0x12b   : > { %2654 = vmatpush2.bf16.msra.mxu1 %v10586_v0  ;;  %2614 = vmatprep.subr.bf16.mxu0 %v10587_v1  ;;  %v10665_v0 = vld [vmem:[%s12712_s17 + $0x870] ss:$24 sps:$4 sm:$0xff]  }
 0x12c   : > { %2655 = vmatprep.subr.bf16.mxu1 %v10589_v2  ;;  %v10668_v1 = vld [vmem:[%s12712_s17 + $0x278] ss:$24 sps:$4 sm:$0xff]   ;;  %v10673_v2 = vld [vmem:[%s12712_s17 + $0x844] ss:$24 sps:$4 sm:$0xff]  }
 0x12e   : > { %2615 = vmatpush2.bf16.msra.mxu0 %v10591_v4  ;;  %v10676_v4 = vld [vmem:[%s12712_s17 + $0x24c] ss:$24 sps:$4 sm:$0xff]  }
 0x12f   : > { %2656 = vmatpush2.bf16.msra.mxu1 %v10592_v5  ;;  %2616 = vmatprep.subr.bf16.mxu0 %v10593_v6  ;;  %v10671_v5 = vld [vmem:[%s12712_s17 + $0x840] ss:$24 sps:$4 sm:$0xff]  }
 0x130   : > { %2657 = vmatprep.subr.bf16.mxu1 %v10595_v7  ;;  %v10674_v6 = vld [vmem:[%s12712_s17 + $0x248] ss:$24 sps:$4 sm:$0xff]   ;;  %v10679_v7 = vld [vmem:[%s12712_s17 + $0x814] ss:$24 sps:$4 sm:$0xff]  }
 0x132   : > { %2617 = vmatpush2.bf16.msra.mxu0 %v10597_v8  ;;  %v10682_v8 = vld [vmem:[%s12712_s17 + $0x21c] ss:$24 sps:$4 sm:$0xff]  }
 0x133   : > { %2658 = vmatpush2.bf16.msra.mxu1 %v10598_v9  ;;  %2618 = vmatprep.subr.bf16.mxu0 %v10599_v10  ;;  %v10677_v9 = vld [vmem:[%s12712_s17 + $0x810] ss:$24 sps:$4 sm:$0xff]  }
 0x134   : > { %2659 = vmatprep.subr.bf16.mxu1 %v10601_v11  ;;  %v10680_v10 = vld [vmem:[%s12712_s17 + $0x218] ss:$24 sps:$4 sm:$0xff]   ;;  %v10685_v11 = vld [vmem:[%s12712_s17 + $0x7e4] ss:$24 sps:$4 sm:$0xff]  }
 0x136   : > { %2619 = vmatpush2.bf16.msra.mxu0 %v10603_v12  ;;  %v10688_v12 = vld [vmem:[%s12712_s17 + $0x1ec] ss:$24 sps:$4 sm:$0xff]  }
 0x137   : > { %2660 = vmatpush2.bf16.msra.mxu1 %v10604_v14  ;;  %2670 = vmatprep.subr.bf16.mxu0 %v10607_v15  ;;  %v10683_v14 = vld [vmem:[%s12712_s17 + $0x7e0] ss:$24 sps:$4 sm:$0xff]  }
 0x138   : > { %2711 = vmatprep.subr.bf16.mxu1 %v10610_v16  ;;  %v10686_v15 = vld [vmem:[%s12712_s17 + $0x1e8] ss:$24 sps:$4 sm:$0xff]   ;;  %v10691_v16 = vld [vmem:[%s12712_s17 + $0x7b4] ss:$24 sps:$4 sm:$0xff]  }
 0x139   : > { %2621 = vmatmul.mubr.bf16.vlgmr.msra.gmra.mxu0 %v12836_v13 }
 0x13a   : > { %2662 = vmatmul.mubr.bf16.vlgmr.msra.gmra.mxu1 %v12843_v18  ;;  %2671 = vmatpush1.bf16.msra.mxu0 %v10605_v19  ;;  %v10689_v19 = vld [vmem:[%s12712_s17 + $0x7b0] ss:$24 sps:$4 sm:$0xff]  }
 0x13b   : > { %2712 = vmatpush1.bf16.msra.mxu1 %v10608_v20  ;;  %2672 = vmatprep.subr.bf16.mxu0 %v10613_v21  ;;  %v10692_v20 = vld [vmem:[%s12712_s17 + $0x1b8] ss:$24 sps:$4 sm:$0xff]   ;;  %v10697_v21 = vld [vmem:[%s12712_s17 + $0x784] ss:$24 sps:$4 sm:$0xff]  }
 0x13c   : > { %2713 = vmatprep.subr.bf16.mxu1 %v10616_v22  ;;  %2702 = vmatprep.mubr.bf16.mxu0 %v12850_v23  ;;  %v10700_v22 = vld [vmem:[%s12712_s17 + $0x18c] ss:$24 sps:$4 sm:$0xff]  }
 0x13d   : > { %2743 = vmatprep.mubr.bf16.mxu1 %v12812_v62 }
 0x13e   : > { %2673 = vmatpush1.bf16.msra.mxu0 %v10611_v24  ;;  %v10695_v24 = vld [vmem:[%s12712_s17 + $0x780] ss:$24 sps:$4 sm:$0xff]  }
 0x13f   : > { %2714 = vmatpush1.bf16.msra.mxu1 %v10614_v25  ;;  %2674 = vmatprep.subr.bf16.mxu0 %v10619_v26  ;;  %v10698_v25 = vld [vmem:[%s12712_s17 + $0x188] ss:$24 sps:$4 sm:$0xff]   ;;  %v10704_v26 = vld [vmem:[%s12712_s17 + $0x45c] ss:$24 sps:$4 sm:$0xff]  }
 0x140   : > { %2715 = vmatprep.subr.bf16.mxu1 %v10622_v27  ;;  %v10707_v27 = vld [vmem:[%s12712_s17 + $0x75c] ss:$24 sps:$4 sm:$0xff]  }
 0x142   : > { %2675 = vmatpush1.bf16.msra.mxu0 %v10617_v28  ;;  %v10702_v28 = vld [vmem:[%s12712_s17 + $0x458] ss:$24 sps:$4 sm:$0xff]  }
 0x143   : > { %2716 = vmatpush1.bf16.msra.mxu1 %v10620_v29  ;;  %2676 = vmatprep.subr.bf16.mxu0 %v10625_v30  ;;  %v10705_v29 = vld [vmem:[%s12712_s17 + $0x758] ss:$24 sps:$4 sm:$0xff]   ;;  %v10710_v30 = vld [vmem:[%s12712_s17 + $0x42c] ss:$24 sps:$4 sm:$0xff]  }
 0x144   : > { %2717 = vmatprep.subr.bf16.mxu1 %v10628_v31  ;;  %v10713_v31 = vld [vmem:[%s12712_s17 + $0x72c] ss:$24 sps:$4 sm:$0xff]  }
 0x146   : > { %2677 = vmatpush1.bf16.msra.mxu0 %v10623_v32  ;;  %v10708_v32 = vld [vmem:[%s12712_s17 + $0x428] ss:$24 sps:$4 sm:$0xff]  }
 0x147   : > { %2718 = vmatpush1.bf16.msra.mxu1 %v10626_v33  ;;  %2678 = vmatprep.subr.bf16.mxu0 %v10631_v34  ;;  %v10711_v33 = vld [vmem:[%s12712_s17 + $0x728] ss:$24 sps:$4 sm:$0xff]   ;;  %v10716_v34 = vld [vmem:[%s12712_s17 + $0x3fc] ss:$24 sps:$4 sm:$0xff]  }
 0x148   : > { %2719 = vmatprep.subr.bf16.mxu1 %v10634_v35  ;;  %v10719_v35 = vld [vmem:[%s12712_s17 + $0x6fc] ss:$24 sps:$4 sm:$0xff]  }
 0x14a   : > { %2679 = vmatpush1.bf16.msra.mxu0 %v10629_v36  ;;  %v10714_v36 = vld [vmem:[%s12712_s17 + $0x3f8] ss:$24 sps:$4 sm:$0xff]  }
 0x14b   : > { %2720 = vmatpush1.bf16.msra.mxu1 %v10632_v37  ;;  %2680 = vmatprep.subr.bf16.mxu0 %v10637_v39  ;;  %v10717_v37 = vld [vmem:[%s12712_s17 + $0x6f8] ss:$24 sps:$4 sm:$0xff]   ;;  %v10722_v39 = vld [vmem:[%s12712_s17 + $0x3cc] ss:$24 sps:$4 sm:$0xff]  }
 0x14c   : > { %2721 = vmatprep.subr.bf16.mxu1 %v10640_v40  ;;  %v10725_v40 = vld [vmem:[%s12712_s17 + $0x6cc] ss:$24 sps:$4 sm:$0xff]  }
 0x14e   : > { %2681 = vmatpush1.bf16.msra.mxu0 %v10635_v41  ;;  %v10720_v41 = vld [vmem:[%s12712_s17 + $0x3c8] ss:$24 sps:$4 sm:$0xff]  }
 0x14f   : > { %2722 = vmatpush1.bf16.msra.mxu1 %v10638_v42  ;;  %2682 = vmatprep.subr.bf16.mxu0 %v10643_v44  ;;  %v10723_v42 = vld [vmem:[%s12712_s17 + $0x6c8] ss:$24 sps:$4 sm:$0xff]   ;;  %v10728_v44 = vld [vmem:[%s12712_s17 + $0x39c] ss:$24 sps:$4 sm:$0xff]  }
 0x150   : > { %2723 = vmatprep.subr.bf16.mxu1 %v10646_v45  ;;  %v10731_v45 = vld [vmem:[%s12712_s17 + $0x69c] ss:$24 sps:$4 sm:$0xff]  }
 0x152   : > { %2683 = vmatpush1.bf16.msra.mxu0 %v10641_v46  ;;  %v10726_v46 = vld [vmem:[%s12712_s17 + $0x398] ss:$24 sps:$4 sm:$0xff]  }
 0x153   : > { %2724 = vmatpush1.bf16.msra.mxu1 %v10644_v47  ;;  %2684 = vmatprep.subr.bf16.mxu0 %v10649_v48  ;;  %v10729_v47 = vld [vmem:[%s12712_s17 + $0x698] ss:$24 sps:$4 sm:$0xff]   ;;  %v10734_v48 = vld [vmem:[%s12712_s17 + $0x36c] ss:$24 sps:$4 sm:$0xff]  }
 0x154   : > { %2725 = vmatprep.subr.bf16.mxu1 %v10652_v49  ;;  %v10737_v49 = vld [vmem:[%s12712_s17 + $0x66c] ss:$24 sps:$4 sm:$0xff]  }
 0x156   : > { %2685 = vmatpush1.bf16.msra.mxu0 %v10647_v50  ;;  %v10732_v50 = vld [vmem:[%s12712_s17 + $0x368] ss:$24 sps:$4 sm:$0xff]  }
 0x157   : > { %2726 = vmatpush1.bf16.msra.mxu1 %v10650_v51  ;;  %2686 = vmatprep.subr.bf16.mxu0 %v10655_v52  ;;  %v10735_v51 = vld [vmem:[%s12712_s17 + $0x668] ss:$24 sps:$4 sm:$0xff]   ;;  %v10740_v52 = vld [vmem:[%s12712_s17 + $0x33c] ss:$24 sps:$4 sm:$0xff]  }
 0x158   : > { %2727 = vmatprep.subr.bf16.mxu1 %v10658_v53  ;;  %v10743_v53 = vld [vmem:[%s12712_s17 + $0x63c] ss:$24 sps:$4 sm:$0xff]  }
 0x15a   : > { %2687 = vmatpush2.bf16.msra.mxu0 %v10653_v54  ;;  %v10738_v54 = vld [vmem:[%s12712_s17 + $0x338] ss:$24 sps:$4 sm:$0xff]  }
 0x15b   : > { %2728 = vmatpush2.bf16.msra.mxu1 %v10656_v55  ;;  %2688 = vmatprep.subr.bf16.mxu0 %v10661_v56  ;;  %v10741_v55 = vld [vmem:[%s12712_s17 + $0x638] ss:$24 sps:$4 sm:$0xff]   ;;  %v10746_v56 = vld [vmem:[%s12712_s17 + $0x30c] ss:$24 sps:$4 sm:$0xff]  }
 0x15c   : > { %2729 = vmatprep.subr.bf16.mxu1 %v10664_v57  ;;  %v10749_v57 = vld [vmem:[%s12712_s17 + $0x60c] ss:$24 sps:$4 sm:$0xff]  }
 0x15e   : > { %2689 = vmatpush2.bf16.msra.mxu0 %v10659_v58  ;;  %v10744_v58 = vld [vmem:[%s12712_s17 + $0x308] ss:$24 sps:$4 sm:$0xff]  }
 0x15f   : > { %2730 = vmatpush2.bf16.msra.mxu1 %v10662_v59  ;;  %2690 = vmatprep.subr.bf16.mxu0 %v10667_v60  ;;  %v10747_v59 = vld [vmem:[%s12712_s17 + $0x608] ss:$24 sps:$4 sm:$0xff]   ;;  %v10752_v60 = vld [vmem:[%s12712_s17 + $0x5dc] ss:$24 sps:$4 sm:$0xff]  }
 0x160   : > { %2731 = vmatprep.subr.bf16.mxu1 %v10670_v61  ;;  %v10755_v61 = vld [vmem:[%s12712_s17 + $0x8dc] ss:$24 sps:$4 sm:$0xff]  }
 0x162   : > { %2691 = vmatpush2.bf16.msra.mxu0 %v10665_v0  ;;  %v10750_v0 = vld [vmem:[%s12712_s17 + $0x5d8] ss:$24 sps:$4 sm:$0xff]  }
 0x163   : > { %2732 = vmatpush2.bf16.msra.mxu1 %v10668_v1  ;;  %2692 = vmatprep.subr.bf16.mxu0 %v10673_v2  ;;  %v10753_v1 = vld [vmem:[%s12712_s17 + $0x8d8] ss:$24 sps:$4 sm:$0xff]   ;;  %v10758_v2 = vld [vmem:[%s12712_s17 + $0x5ac] ss:$24 sps:$4 sm:$0xff]  }
 0x164   : > { %2733 = vmatprep.subr.bf16.mxu1 %v10676_v4  ;;  %v10761_v4 = vld [vmem:[%s12712_s17 + $0x8ac] ss:$24 sps:$4 sm:$0xff]  }
 0x166   : > { %2693 = vmatpush2.bf16.msra.mxu0 %v10671_v5  ;;  %v10756_v5 = vld [vmem:[%s12712_s17 + $0x5a8] ss:$24 sps:$4 sm:$0xff]  }
 0x167   : > { %2734 = vmatpush2.bf16.msra.mxu1 %v10674_v6  ;;  %2694 = vmatprep.subr.bf16.mxu0 %v10679_v7  ;;  %v10759_v6 = vld [vmem:[%s12712_s17 + $0x8a8] ss:$24 sps:$4 sm:$0xff]   ;;  %v10764_v7 = vld [vmem:[%s12712_s17 + $0x57c] ss:$24 sps:$4 sm:$0xff]  }
 0x168   : > { %2735 = vmatprep.subr.bf16.mxu1 %v10682_v8  ;;  %v10767_v8 = vld [vmem:[%s12712_s17 + $0x87c] ss:$24 sps:$4 sm:$0xff]  }
 0x16a   : > { %2695 = vmatpush2.bf16.msra.mxu0 %v10677_v9  ;;  %v10762_v9 = vld [vmem:[%s12712_s17 + $0x578] ss:$24 sps:$4 sm:$0xff]  }
 0x16b   : > { %2736 = vmatpush2.bf16.msra.mxu1 %v10680_v10  ;;  %2696 = vmatprep.subr.bf16.mxu0 %v10685_v11  ;;  %v10765_v10 = vld [vmem:[%s12712_s17 + $0x878] ss:$24 sps:$4 sm:$0xff]   ;;  %v10770_v11 = vld [vmem:[%s12712_s17 + $0x54c] ss:$24 sps:$4 sm:$0xff]  }
 0x16c   : > { %2737 = vmatprep.subr.bf16.mxu1 %v10688_v12  ;;  %v10773_v12 = vld [vmem:[%s12712_s17 + $0x84c] ss:$24 sps:$4 sm:$0xff]  }
 0x16e   : > { %2697 = vmatpush2.bf16.msra.mxu0 %v10683_v14  ;;  %v10768_v14 = vld [vmem:[%s12712_s17 + $0x548] ss:$24 sps:$4 sm:$0xff]  }
 0x16f   : > { %2738 = vmatpush2.bf16.msra.mxu1 %v10686_v15  ;;  %2698 = vmatprep.subr.bf16.mxu0 %v10691_v16  ;;  %v10771_v15 = vld [vmem:[%s12712_s17 + $0x848] ss:$24 sps:$4 sm:$0xff]   ;;  %v10776_v16 = vld [vmem:[%s12712_s17 + $0x51c] ss:$24 sps:$4 sm:$0xff]  }
 0x170   : > { %2739 = vmatprep.subr.bf16.mxu1 %v10694_v17  ;;  %v10779_v17 = vld [vmem:[%s12712_s17 + $0x81c] ss:$24 sps:$4 sm:$0xff]  }
 0x172   : > { %2699 = vmatpush2.bf16.msra.mxu0 %v10689_v19  ;;  %v10774_v19 = vld [vmem:[%s12712_s17 + $0x518] ss:$24 sps:$4 sm:$0xff]  }
 0x173   : > { %2740 = vmatpush2.bf16.msra.mxu1 %v10692_v20  ;;  %2700 = vmatprep.subr.bf16.mxu0 %v10697_v21  ;;  %v10777_v20 = vld [vmem:[%s12712_s17 + $0x818] ss:$24 sps:$4 sm:$0xff]   ;;  %v10782_v21 = vld [vmem:[%s12712_s17 + $0x4ec] ss:$24 sps:$4 sm:$0xff]  }
 0x174   : > { %2741 = vmatprep.subr.bf16.mxu1 %v10700_v22  ;;  %v10785_v22 = vld [vmem:[%s12712_s17 + $0x7ec] ss:$24 sps:$4 sm:$0xff]  }
 0x176   : > { %2701 = vmatpush2.bf16.msra.mxu0 %v10695_v24  ;;  %v10780_v24 = vld [vmem:[%s12712_s17 + $0x4e8] ss:$24 sps:$4 sm:$0xff]  }
 0x177   : > { %2742 = vmatpush2.bf16.msra.mxu1 %v10698_v25  ;;  %2752 = vmatprep.subr.bf16.mxu0 %v10704_v26  ;;  %v10783_v25 = vld [vmem:[%s12712_s17 + $0x7e8] ss:$24 sps:$4 sm:$0xff]   ;;  %v10788_v26 = vld [vmem:[%s12712_s17 + $0x4bc] ss:$24 sps:$4 sm:$0xff]  }
 0x178   : > { %2793 = vmatprep.subr.bf16.mxu1 %v10707_v27  ;;  %v10791_v27 = vld [vmem:[%s12712_s17 + $0x7bc] ss:$24 sps:$4 sm:$0xff]  }
 0x179   : > { %2703 = vmatmul.mubr.bf16.vlgmr.msra.gmra.mxu0 %v12815_v63 }
 0x17a   : > { %2744 = vmatmul.mubr.bf16.vlgmr.msra.gmra.mxu1 %v12836_v13  ;;  %2753 = vmatpush1.bf16.msra.mxu0 %v10702_v28  ;;  %v10786_v28 = vld [vmem:[%s12712_s17 + $0x4b8] ss:$24 sps:$4 sm:$0xff]  }
 0x17b   : > { %2794 = vmatpush1.bf16.msra.mxu1 %v10705_v29  ;;  %2754 = vmatprep.subr.bf16.mxu0 %v10710_v30  ;;  %v10789_v29 = vld [vmem:[%s12712_s17 + $0x7b8] ss:$24 sps:$4 sm:$0xff]   ;;  %v10794_v30 = vld [vmem:[%s12712_s17 + $0x48c] ss:$24 sps:$4 sm:$0xff]  }
 0x17c   : > { %2795 = vmatprep.subr.bf16.mxu1 %v10713_v31  ;;  %2784 = vmatprep.mubr.bf16.mxu0 %v12822_v3  ;;  %v10797_v31 = vld [vmem:[%s12712_s17 + $0x78c] ss:$24 sps:$4 sm:$0xff]  }
 0x17d   : > { %2825 = vmatprep.mubr.bf16.mxu1 %v12850_v23 }
 0x17e   : > { %2755 = vmatpush1.bf16.msra.mxu0 %v10708_v32  ;;  %v10792_v32 = vld [vmem:[%s12712_s17 + $0x488] ss:$24 sps:$4 sm:$0xff]  }
 0x17f   : > { %2796 = vmatpush1.bf16.msra.mxu1 %v10711_v33  ;;  %2756 = vmatprep.subr.bf16.mxu0 %v10716_v34  ;;  %v10795_v33 = vld [vmem:[%s12712_s17 + $0x788] ss:$24 sps:$4 sm:$0xff]   ;;  %v10800_v34 = vld [vmem:[%s12712_s17 + $0x164] ss:$24 sps:$4 sm:$0xff]  }
 0x180   : > { %2797 = vmatprep.subr.bf16.mxu1 %v10719_v35  ;;  %v10803_v35 = vld [vmem:[%s12712_s17 + $0x464] ss:$24 sps:$4 sm:$0xff]  }
 0x182   : > { %2757 = vmatpush1.bf16.msra.mxu0 %v10714_v36  ;;  %v10798_v36 = vld [vmem:[%s12712_s17 + $0x160] ss:$24 sps:$4 sm:$0xff]  }
 0x183   : > { %2798 = vmatpush1.bf16.msra.mxu1 %v10717_v37  ;;  %2758 = vmatprep.subr.bf16.mxu0 %v10722_v39  ;;  %v10801_v37 = vld [vmem:[%s12712_s17 + $0x460] ss:$24 sps:$4 sm:$0xff]   ;;  %v10806_v39 = vld [vmem:[%s12712_s17 + $0x134] ss:$24 sps:$4 sm:$0xff]  }
 0x184   : > { %2799 = vmatprep.subr.bf16.mxu1 %v10725_v40  ;;  %v10809_v40 = vld [vmem:[%s12712_s17 + $0x434] ss:$24 sps:$4 sm:$0xff]  }
 0x186   : > { %2759 = vmatpush1.bf16.msra.mxu0 %v10720_v41  ;;  %v10804_v41 = vld [vmem:[%s12712_s17 + $0x130] ss:$24 sps:$4 sm:$0xff]  }
 0x187   : > { %2800 = vmatpush1.bf16.msra.mxu1 %v10723_v42  ;;  %2760 = vmatprep.subr.bf16.mxu0 %v10728_v44  ;;  %v10807_v42 = vld [vmem:[%s12712_s17 + $0x430] ss:$24 sps:$4 sm:$0xff]   ;;  %v10812_v44 = vld [vmem:[%s12712_s17 + $0x104] ss:$24 sps:$4 sm:$0xff]  }
 0x188   : > { %2801 = vmatprep.subr.bf16.mxu1 %v10731_v45  ;;  %v10815_v45 = vld [vmem:[%s12712_s17 + $0x404] ss:$24 sps:$4 sm:$0xff]  }
 0x18a   : > { %2761 = vmatpush1.bf16.msra.mxu0 %v10726_v46  ;;  %v10810_v46 = vld [vmem:[%s12712_s17 + $0x100] ss:$24 sps:$4 sm:$0xff]  }
 0x18b   : > { %2802 = vmatpush1.bf16.msra.mxu1 %v10729_v47  ;;  %2762 = vmatprep.subr.bf16.mxu0 %v10734_v48  ;;  %v10813_v47 = vld [vmem:[%s12712_s17 + $0x400] ss:$24 sps:$4 sm:$0xff]   ;;  %v10818_v48 = vld [vmem:[%s12712_s17 + $0xd4] ss:$24 sps:$4 sm:$0xff]  }
 0x18c   : > { %2803 = vmatprep.subr.bf16.mxu1 %v10737_v49  ;;  %v10821_v49 = vld [vmem:[%s12712_s17 + $0x3d4] ss:$24 sps:$4 sm:$0xff]  }
 0x18e   : > { %2763 = vmatpush1.bf16.msra.mxu0 %v10732_v50  ;;  %v10816_v50 = vld [vmem:[%s12712_s17 + $0xd0] ss:$24 sps:$4 sm:$0xff]  }
 0x18f   : > { %2804 = vmatpush1.bf16.msra.mxu1 %v10735_v51  ;;  %2764 = vmatprep.subr.bf16.mxu0 %v10740_v52  ;;  %v10827_v51 = vld [vmem:[%s12712_s17 + $0x3a4] ss:$24 sps:$4 sm:$0xff]   ;;  %v10822_v52 = vld [vmem:[%s12712_s17 + $0xa0] ss:$24 sps:$4 sm:$0xff]  }
 0x190   : > { %2805 = vmatprep.subr.bf16.mxu1 %v10743_v53  ;;  %v10825_v53 = vld [vmem:[%s12712_s17 + $0x3a0] ss:$24 sps:$4 sm:$0xff]  }
 0x192   : > { %2765 = vmatpush1.bf16.msra.mxu0 %v10738_v54  ;;  %v10830_v54 = vld [vmem:[%s12712_s17 + $0x74] ss:$24 sps:$4 sm:$0xff]  }
 0x193   : > { %2806 = vmatpush1.bf16.msra.mxu1 %v10741_v55  ;;  %2766 = vmatprep.subr.bf16.mxu0 %v10746_v56  ;;  %v10833_v55 = vld [vmem:[%s12712_s17 + $0x374] ss:$24 sps:$4 sm:$0xff]   ;;  %v10828_v56 = vld [vmem:[%s12712_s17 + $0x70] ss:$24 sps:$4 sm:$0xff]  }
 0x194   : > { %2807 = vmatprep.subr.bf16.mxu1 %v10749_v57  ;;  %v10831_v57 = vld [vmem:[%s12712_s17 + $0x370] ss:$24 sps:$4 sm:$0xff]  }
 0x196   : > { %2767 = vmatpush1.bf16.msra.mxu0 %v10744_v58  ;;  %v10836_v58 = vld [vmem:[%s12712_s17 + $0x44] ss:$24 sps:$4 sm:$0xff]  }
 0x197   : > { %2808 = vmatpush1.bf16.msra.mxu1 %v10747_v59  ;;  %2768 = vmatprep.subr.bf16.mxu0 %v10752_v60  ;;  %v10839_v59 = vld [vmem:[%s12712_s17 + $0x344] ss:$24 sps:$4 sm:$0xff]   ;;  %v10834_v60 = vld [vmem:[%s12712_s17 + $0x40] ss:$24 sps:$4 sm:$0xff]  }
 0x198   : > { %2809 = vmatprep.subr.bf16.mxu1 %v10755_v61  ;;  %v10837_v61 = vld [vmem:[%s12712_s17 + $0x340] ss:$24 sps:$4 sm:$0xff]  }
 0x19a   : > { %2769 = vmatpush2.bf16.msra.mxu0 %v10750_v0  ;;  %v10842_v0 = vld [vmem:[%s12712_s17 + $0x14] ss:$24 sps:$4 sm:$0xff]  }
 0x19b   : > { %2810 = vmatpush2.bf16.msra.mxu1 %v10753_v1  ;;  %2770 = vmatprep.subr.bf16.mxu0 %v10758_v2  ;;  %v10845_v1 = vld [vmem:[%s12712_s17 + $0x314] ss:$24 sps:$4 sm:$0xff]   ;;  %v10840_v2 = vld [vmem:[%s12712_s17 + $0x10] ss:$24 sps:$4 sm:$0xff]  }
 0x19c   : > { %2811 = vmatprep.subr.bf16.mxu1 %v10761_v4  ;;  %v10843_v4 = vld [vmem:[%s12712_s17 + $0x310] ss:$24 sps:$4 sm:$0xff]  }
 0x19e   : > { %2771 = vmatpush2.bf16.msra.mxu0 %v10756_v5  ;;  %v10848_v5 = vld [vmem:[%s12712_s17 + $0x2e4] ss:$24 sps:$4 sm:$0xff]  }
 0x19f   : > { %2812 = vmatpush2.bf16.msra.mxu1 %v10759_v6  ;;  %2772 = vmatprep.subr.bf16.mxu0 %v10764_v7  ;;  %v10851_v6 = vld [vmem:[%s12712_s17 + $0x5e4] ss:$24 sps:$4 sm:$0xff]   ;;  %v10846_v7 = vld [vmem:[%s12712_s17 + $0x2e0] ss:$24 sps:$4 sm:$0xff]  }
 0x1a0   : > { %2813 = vmatprep.subr.bf16.mxu1 %v10767_v8  ;;  %v10849_v8 = vld [vmem:[%s12712_s17 + $0x5e0] ss:$24 sps:$4 sm:$0xff]  }
 0x1a2   : > { %2773 = vmatpush2.bf16.msra.mxu0 %v10762_v9  ;;  %v10854_v9 = vld [vmem:[%s12712_s17 + $0x2b4] ss:$24 sps:$4 sm:$0xff]  }
 0x1a3   : > { %2814 = vmatpush2.bf16.msra.mxu1 %v10765_v10  ;;  %2774 = vmatprep.subr.bf16.mxu0 %v10770_v11  ;;  %v10857_v10 = vld [vmem:[%s12712_s17 + $0x5b4] ss:$24 sps:$4 sm:$0xff]   ;;  %v10852_v11 = vld [vmem:[%s12712_s17 + $0x2b0] ss:$24 sps:$4 sm:$0xff]  }
 0x1a4   : > { %2815 = vmatprep.subr.bf16.mxu1 %v10773_v12  ;;  %v10855_v12 = vld [vmem:[%s12712_s17 + $0x5b0] ss:$24 sps:$4 sm:$0xff]  }
 0x1a6   : > { %2775 = vmatpush2.bf16.msra.mxu0 %v10768_v14  ;;  %v10860_v14 = vld [vmem:[%s12712_s17 + $0x284] ss:$24 sps:$4 sm:$0xff]  }
 0x1a7   : > { %2816 = vmatpush2.bf16.msra.mxu1 %v10771_v15  ;;  %2776 = vmatprep.subr.bf16.mxu0 %v10776_v16  ;;  %v10863_v15 = vld [vmem:[%s12712_s17 + $0x584] ss:$24 sps:$4 sm:$0xff]   ;;  %v10858_v16 = vld [vmem:[%s12712_s17 + $0x280] ss:$24 sps:$4 sm:$0xff]  }
 0x1a8   : > { %2817 = vmatprep.subr.bf16.mxu1 %v10779_v17  ;;  %v10861_v17 = vld [vmem:[%s12712_s17 + $0x580] ss:$24 sps:$4 sm:$0xff]  }
 0x1aa   : > { %2777 = vmatpush2.bf16.msra.mxu0 %v10774_v19  ;;  %v10866_v19 = vld [vmem:[%s12712_s17 + $0x254] ss:$24 sps:$4 sm:$0xff]  }
 0x1ab   : > { %2818 = vmatpush2.bf16.msra.mxu1 %v10777_v20  ;;  %2778 = vmatprep.subr.bf16.mxu0 %v10782_v21  ;;  %v10869_v20 = vld [vmem:[%s12712_s17 + $0x554] ss:$24 sps:$4 sm:$0xff]   ;;  %v10864_v21 = vld [vmem:[%s12712_s17 + $0x250] ss:$24 sps:$4 sm:$0xff]  }
 0x1ac   : > { %2819 = vmatprep.subr.bf16.mxu1 %v10785_v22  ;;  %v10867_v22 = vld [vmem:[%s12712_s17 + $0x550] ss:$24 sps:$4 sm:$0xff]  }
 0x1ae   : > { %2779 = vmatpush2.bf16.msra.mxu0 %v10780_v24  ;;  %v10872_v24 = vld [vmem:[%s12712_s17 + $0x224] ss:$24 sps:$4 sm:$0xff]  }
 0x1af   : > { %2820 = vmatpush2.bf16.msra.mxu1 %v10783_v25  ;;  %2780 = vmatprep.subr.bf16.mxu0 %v10788_v26  ;;  %v10875_v25 = vld [vmem:[%s12712_s17 + $0x524] ss:$24 sps:$4 sm:$0xff]   ;;  %v10870_v26 = vld [vmem:[%s12712_s17 + $0x220] ss:$24 sps:$4 sm:$0xff]  }
 0x1b0   : > { %2821 = vmatprep.subr.bf16.mxu1 %v10791_v27  ;;  %v10873_v27 = vld [vmem:[%s12712_s17 + $0x520] ss:$24 sps:$4 sm:$0xff]  }
 0x1b2   : > { %2781 = vmatpush2.bf16.msra.mxu0 %v10786_v28  ;;  %v10878_v28 = vld [vmem:[%s12712_s17 + $0x1f4] ss:$24 sps:$4 sm:$0xff]  }
 0x1b3   : > { %2822 = vmatpush2.bf16.msra.mxu1 %v10789_v29  ;;  %2782 = vmatprep.subr.bf16.mxu0 %v10794_v30  ;;  %v10881_v29 = vld [vmem:[%s12712_s17 + $0x4f4] ss:$24 sps:$4 sm:$0xff]   ;;  %v10876_v30 = vld [vmem:[%s12712_s17 + $0x1f0] ss:$24 sps:$4 sm:$0xff]  }
 0x1b4   : > { %2823 = vmatprep.subr.bf16.mxu1 %v10797_v31  ;;  %v10879_v31 = vld [vmem:[%s12712_s17 + $0x4f0] ss:$24 sps:$4 sm:$0xff]  }
 0x1b6   : > { %2783 = vmatpush2.bf16.msra.mxu0 %v10792_v32  ;;  %v10884_v32 = vld [vmem:[%s12712_s17 + $0x1c4] ss:$24 sps:$4 sm:$0xff]  }
 0x1b7   : > { %2824 = vmatpush2.bf16.msra.mxu1 %v10795_v33  ;;  %2834 = vmatprep.subr.bf16.mxu0 %v10800_v34  ;;  %v10887_v33 = vld [vmem:[%s12712_s17 + $0x4c4] ss:$24 sps:$4 sm:$0xff]   ;;  %v10882_v34 = vld [vmem:[%s12712_s17 + $0x1c0] ss:$24 sps:$4 sm:$0xff]  }
 0x1b8   : > { %2875 = vmatprep.subr.bf16.mxu1 %v10803_v35  ;;  %v10885_v35 = vld [vmem:[%s12712_s17 + $0x4c0] ss:$24 sps:$4 sm:$0xff]  }
 0x1b9   : > { %2785 = vmatmul.mubr.bf16.vlgmr.msra.gmra.mxu0 %v12843_v18 }
 0x1ba   : > { %2826 = vmatmul.mubr.bf16.vlgmr.msra.gmra.mxu1 %v12815_v63  ;;  %2835 = vmatpush1.bf16.msra.mxu0 %v10798_v36  ;;  %v10890_v36 = vld [vmem:[%s12712_s17 + $0x194] ss:$24 sps:$4 sm:$0xff]  }
 0x1bb   : > { %2876 = vmatpush1.bf16.msra.mxu1 %v10801_v37  ;;  %2836 = vmatprep.subr.bf16.mxu0 %v10806_v39  ;;  %v10893_v37 = vld [vmem:[%s12712_s17 + $0x494] ss:$24 sps:$4 sm:$0xff]   ;;  %v10888_v39 = vld [vmem:[%s12712_s17 + $0x190] ss:$24 sps:$4 sm:$0xff]  }
 0x1bc   : > { %2877 = vmatprep.subr.bf16.mxu1 %v10809_v40  ;;  %2866 = vmatprep.mubr.bf16.mxu0 %v12812_v62  ;;  %v10819_v62 = vld [vmem:[%s12712_s17 + $0x3d0] ss:$24 sps:$4 sm:$0xff]  }
 0x1bd   : > { %2907 = vmatprep.mubr.bf16.mxu1 %v12822_v3  ;;  %v10824_v3 = vld [vmem:[%s12712_s17 + $0xa4] ss:$24 sps:$4 sm:$0xff]   ;;  %v10891_v40 = vld [vmem:[%s12712_s17 + $0x490] ss:$24 sps:$4 sm:$0xff]  }
 0x1be   : > { %2837 = vmatpush1.bf16.msra.mxu0 %v10804_v41  ;;  %v1062_v41 = vld [vmem:[%s12714_s4] sm:$0x3f] }
 0x1bf   : > { %2878 = vmatpush1.bf16.msra.mxu1 %v10807_v42  ;;  %2838 = vmatprep.subr.bf16.mxu0 %v10812_v44  ;;  %v13052_v42 = vsub.s32 0, %v12789_v43  ;;  %v10896_v44 = vld [vmem:[%s12712_s17 + $0x764] ss:$24 sps:$4 sm:$0xff]  }
 0x1c0   : > { %2879 = vmatprep.subr.bf16.mxu1 %v10815_v45  ;;  %v10899_v45 = vld [vmem:[%s12722_s2 + $0x2a4] ss:$48 sps:$4 sm:$0xff]  }
 0x1c2   : > { %2839 = vmatpush1.bf16.msra.mxu0 %v10810_v46  ;;  %v13057_v46 = vsub.s32 1, %v12789_v43 }
 0x1c3   : > { %2880 = vmatpush1.bf16.msra.mxu1 %v10813_v47  ;;  %2840 = vmatprep.subr.bf16.mxu0 %v10818_v48  ;;  %v2561_v47 = vrot.slane %v1062_v41, %v13052_v42  ;;  %v10894_v48 = vld [vmem:[%s12712_s17 + $0x760] ss:$24 sps:$4 sm:$0xff]  }
 0x1c4   : > { %2881 = vmatprep.subr.bf16.mxu1 %v10821_v49  ;;  %v10897_v49 = vld [vmem:[%s12722_s2 + $0x2a0] ss:$48 sps:$4 sm:$0xff]  }
 0x1c6   : > { %2841 = vmatpush1.bf16.msra.mxu0 %v10816_v50  ;;  %v10902_v50 = vld [vmem:[%s12712_s17 + $0x734] ss:$24 sps:$4 sm:$0xff]  }
 0x1c7   : > { %2882 = vmatpush1.bf16.msra.mxu1 %v10819_v62  ;;  %2842 = vmatprep.subr.bf16.mxu0 %v10824_v3  ;;  %v10905_v62 = vld [vmem:[%s12722_s2 + $0x244] ss:$48 sps:$4 sm:$0xff]   ;;  %v2565_v3 = vrot.slane %v1062_v41, %v13057_v46  ;;  %v10957_v41 = vld [vmem:[%s12722_s2 + $0x4e0] ss:$48 sps:$4 sm:$0xff]  }
 0x1c8   : > { %2883 = vmatprep.subr.bf16.mxu1 %v10827_v51  ;;  %v10990_v51 = vld [vmem:[%s12695_s1 + $0x4] ss:$24 sps:$4 sm:$0xff]  }
 0x1ca   : > { %2843 = vmatpush1.bf16.msra.mxu0 %v10822_v52 }
 0x1cb   : > { %2884 = vmatpush1.bf16.msra.mxu1 %v10825_v53  ;;  %2844 = vmatprep.subr.bf16.mxu0 %v10830_v54 }
 0x1cc   : > { %2885 = vmatprep.subr.bf16.mxu1 %v10833_v55  ;;  %v10900_v55 = vld [vmem:[%s12712_s17 + $0x730] ss:$24 sps:$4 sm:$0xff]  }
 0x1ce   : > { %2845 = vmatpush1.bf16.msra.mxu0 %v10828_v56  ;;  %v10903_v56 = vld [vmem:[%s12722_s2 + $0x240] ss:$48 sps:$4 sm:$0xff]  }
 0x1cf   : > { %2886 = vmatpush1.bf16.msra.mxu1 %v10831_v57  ;;  %2846 = vmatprep.subr.bf16.mxu0 %v10836_v58 }
 0x1d0   : > { %2887 = vmatprep.subr.bf16.mxu1 %v10839_v59  ;;  %v10908_v59 = vld [vmem:[%s12712_s17 + $0x704] ss:$24 sps:$4 sm:$0xff]  }
 0x1d2   : > { %2847 = vmatpush1.bf16.msra.mxu0 %v10834_v60  ;;  %v10911_v60 = vld [vmem:[%s12722_s2 + $0x1e4] ss:$48 sps:$4 sm:$0xff]  }
 0x1d3   : > { %2888 = vmatpush1.bf16.msra.mxu1 %v10837_v61  ;;  %2848 = vmatprep.subr.bf16.mxu0 %v10842_v0 }
 0x1d4   : > { %2889 = vmatprep.subr.bf16.mxu1 %v10845_v1 }
 0x1d6   : > { %2849 = vmatpush1.bf16.msra.mxu0 %v10840_v2  ;;  %v10906_v2 = vld [vmem:[%s12712_s17 + $0x700] ss:$24 sps:$4 sm:$0xff]  }
 0x1d7   : > { %2890 = vmatpush1.bf16.msra.mxu1 %v10843_v4  ;;  %2850 = vmatprep.subr.bf16.mxu0 %v10848_v5  ;;  %v10909_v4 = vld [vmem:[%s12722_s2 + $0x1e0] ss:$48 sps:$4 sm:$0xff]  }
 0x1d8   : > { %2891 = vmatprep.subr.bf16.mxu1 %v10851_v6  ;;  %v10914_v6 = vld [vmem:[%s12712_s17 + $0x6d4] ss:$24 sps:$4 sm:$0xff]  }
 0x1da   : > { %2851 = vmatpush2.bf16.msra.mxu0 %v10846_v7 }
 0x1db   : > { %2892 = vmatpush2.bf16.msra.mxu1 %v10849_v8  ;;  %2852 = vmatprep.subr.bf16.mxu0 %v10854_v9  ;;  %v10912_v8 = vld [vmem:[%s12712_s17 + $0x6d0] ss:$24 sps:$4 sm:$0xff]   ;;  %v10915_v9 = vld [vmem:[%s12722_s2 + $0x180] ss:$48 sps:$4 sm:$0xff]  }
 0x1dc   : > { %2893 = vmatprep.subr.bf16.mxu1 %v10857_v10  ;;  %v10920_v10 = vld [vmem:[%s12712_s17 + $0x6a4] ss:$24 sps:$4 sm:$0xff]  }
 0x1de   : > { %2853 = vmatpush2.bf16.msra.mxu0 %v10852_v11  ;;  %v10923_v11 = vld [vmem:[%s12722_s2 + $0x124] ss:$48 sps:$4 sm:$0xff]  }
 0x1df   : > { %2894 = vmatpush2.bf16.msra.mxu1 %v10855_v12  ;;  %2854 = vmatprep.subr.bf16.mxu0 %v10860_v14  ;;  %v10918_v12 = vld [vmem:[%s12712_s17 + $0x6a0] ss:$24 sps:$4 sm:$0xff]   ;;  %v10921_v14 = vld [vmem:[%s12722_s2 + $0x120] ss:$48 sps:$4 sm:$0xff]  }
 0x1e0   : > { %2895 = vmatprep.subr.bf16.mxu1 %v10863_v15  ;;  %v10926_v15 = vld [vmem:[%s12712_s17 + $0x674] ss:$24 sps:$4 sm:$0xff]  }
 0x1e2   : > { %2855 = vmatpush2.bf16.msra.mxu0 %v10858_v16  ;;  %v10929_v16 = vld [vmem:[%s12722_s2 + $0xc4] ss:$48 sps:$4 sm:$0xff]  }
 0x1e3   : > { %2896 = vmatpush2.bf16.msra.mxu1 %v10861_v17  ;;  %2856 = vmatprep.subr.bf16.mxu0 %v10866_v19  ;;  %v10924_v17 = vld [vmem:[%s12712_s17 + $0x670] ss:$24 sps:$4 sm:$0xff]   ;;  %v10927_v19 = vld [vmem:[%s12722_s2 + $0xc0] ss:$48 sps:$4 sm:$0xff]  }
 0x1e4   : > { %2897 = vmatprep.subr.bf16.mxu1 %v10869_v20  ;;  %v10932_v20 = vld [vmem:[%s12712_s17 + $0x644] ss:$24 sps:$4 sm:$0xff]  }
 0x1e6   : > { %2857 = vmatpush2.bf16.msra.mxu0 %v10864_v21  ;;  %v10935_v21 = vld [vmem:[%s12722_s2 + $0x64] ss:$48 sps:$4 sm:$0xff]  }
 0x1e7   : > { %2898 = vmatpush2.bf16.msra.mxu1 %v10867_v22  ;;  %2858 = vmatprep.subr.bf16.mxu0 %v10872_v24  ;;  %v10930_v22 = vld [vmem:[%s12712_s17 + $0x640] ss:$24 sps:$4 sm:$0xff]   ;;  %v10933_v24 = vld [vmem:[%s12722_s2 + $0x60] ss:$48 sps:$4 sm:$0xff]  }
 0x1e8   : > { %2899 = vmatprep.subr.bf16.mxu1 %v10875_v25  ;;  %v10938_v25 = vld [vmem:[%s12712_s17 + $0x614] ss:$24 sps:$4 sm:$0xff]  }
 0x1ea   : > { %2859 = vmatpush2.bf16.msra.mxu0 %v10870_v26  ;;  %v10941_v26 = vld [vmem:[%s12722_s2 + $0x4] ss:$48 sps:$4 sm:$0xff]  }
 0x1eb   : > { %2900 = vmatpush2.bf16.msra.mxu1 %v10873_v27  ;;  %2860 = vmatprep.subr.bf16.mxu0 %v10878_v28  ;;  %v10936_v27 = vld [vmem:[%s12712_s17 + $0x610] ss:$24 sps:$4 sm:$0xff]   ;;  %v10939_v28 = vld [vmem:[%s12722_s2] ss:$48 sps:$4 sm:$0xff]  }
 0x1ec   : > { %2901 = vmatprep.subr.bf16.mxu1 %v10881_v29  ;;  %v10944_v29 = vld [vmem:[%s12712_s17 + $0x8e4] ss:$24 sps:$4 sm:$0xff]  }
 0x1ee   : > { %2861 = vmatpush2.bf16.msra.mxu0 %v10876_v30  ;;  %v10947_v30 = vld [vmem:[%s12722_s2 + $0x5a4] ss:$48 sps:$4 sm:$0xff]  }
 0x1ef   : > { %2902 = vmatpush2.bf16.msra.mxu1 %v10879_v31  ;;  %2862 = vmatprep.subr.bf16.mxu0 %v10884_v32  ;;  %v10942_v31 = vld [vmem:[%s12712_s17 + $0x8e0] ss:$24 sps:$4 sm:$0xff]   ;;  %v10945_v32 = vld [vmem:[%s12722_s2 + $0x5a0] ss:$48 sps:$4 sm:$0xff]  }
 0x1f0   : > { %2903 = vmatprep.subr.bf16.mxu1 %v10887_v33  ;;  %v10950_v33 = vld [vmem:[%s12712_s17 + $0x8b4] ss:$24 sps:$4 sm:$0xff]  }
 0x1f2   : > { %2863 = vmatpush2.bf16.msra.mxu0 %v10882_v34  ;;  %v10953_v34 = vld [vmem:[%s12722_s2 + $0x544] ss:$48 sps:$4 sm:$0xff]  }
 0x1f3   : > { %2904 = vmatpush2.bf16.msra.mxu1 %v10885_v35  ;;  %2864 = vmatprep.subr.bf16.mxu0 %v10890_v36  ;;  %v10948_v35 = vld [vmem:[%s12712_s17 + $0x8b0] ss:$24 sps:$4 sm:$0xff]   ;;  %v10951_v36 = vld [vmem:[%s12722_s2 + $0x540] ss:$48 sps:$4 sm:$0xff]  }
 0x1f4   : > { %2905 = vmatprep.subr.bf16.mxu1 %v10893_v37  ;;  %v10956_v37 = vld [vmem:[%s12712_s17 + $0x884] ss:$24 sps:$4 sm:$0xff]  }
 0x1f6   : > { %2865 = vmatpush2.bf16.msra.mxu0 %v10888_v39  ;;  %v10959_v39 = vld [vmem:[%s12722_s2 + $0x4e4] ss:$48 sps:$4 sm:$0xff]  }
 0x1f7   : > { %2906 = vmatpush2.bf16.msra.mxu1 %v10891_v40  ;;  %2916 = vmatprep.subr.bf16.mxu0 %v10896_v44  ;;  %v10954_v40 = vld [vmem:[%s12712_s17 + $0x880] ss:$24 sps:$4 sm:$0xff]   ;;  %v10962_v44 = vld [vmem:[%s12712_s17 + $0x854] ss:$24 sps:$4 sm:$0xff]  }
 0x1f8   : > { %6507 = vmatprep.subr.bf16.mxu1 %v10899_v45  ;;  %v10965_v45 = vld [vmem:[%s12722_s2 + $0x484] ss:$48 sps:$4 sm:$0xff]  }
 0x1f9   : > { %v2622_v52 = vpop.f32.mrf.mxu0  ;;  %2867 = vmatmul.mubr.bf16.vlgmr.msra.gmra.mxu0 %v12836_v13 }
 0x1fa   : > { %v2663_v53 = vpop.f32.mrf.mxu1  ;;  %2908 = vmatmul.mubr.bf16.vlgmr.msra.gmra.mxu1 %v12843_v18  ;;  %v2623_v54 = vadd.f32 %v2622_v52, %v2561_v47  ;;  %2917 = vmatpush1.bf16.msra.mxu0 %v10894_v48  ;;  %v10960_v47 = vld [vmem:[%s12712_s17 + $0x850] ss:$24 sps:$4 sm:$0xff]   ;;  %v10963_v48 = vld [vmem:[%s12722_s2 + $0x480] ss:$48 sps:$4 sm:$0xff]  }
 0x1fb   : > { %6508 = vmatpush1.bf16.msra.mxu1 %v10897_v49  ;;  %v2624_v57 = vpop.f32.mrf.mxu0  ;;  %2918 = vmatprep.subr.bf16.mxu0 %v10902_v50  ;;  %v10968_v49 = vld [vmem:[%s12712_s17 + $0x824] ss:$24 sps:$4 sm:$0xff]   ;;  %v10971_v50 = vld [vmem:[%s12722_s2 + $0x424] ss:$48 sps:$4 sm:$0xff]  }
 0x1fc   : > { %v2665_v58 = vpop.f32.mrf.mxu1  ;;  %6509 = vmatprep.subr.bf16.mxu1 %v10905_v62  ;;  %v13072_v61 = vadd.f32 %v2663_v53, %v2623_v54  ;;  %v2625_v13 = vadd.f32 %v2624_v57, %v2565_v3  ;;  %2948 = vmatprep.mubr.bf16.mxu0 %v12850_v23  ;;  %v10917_v23 = vld [vmem:[%s12722_s2 + $0x184] ss:$48 sps:$4 sm:$0xff]   ;;  %v10969_v3 = vld [vmem:[%s12722_s2 + $0x420] ss:$48 sps:$4 sm:$0xff]  }
 0x1fd   : > { %6539 = vmatprep.mubr.bf16.mxu1 %v10990_v51  ;;  %v2626_v0 = vpop.f32.mrf.mxu0  ;;  %v10966_v62 = vld [vmem:[%s12712_s17 + $0x820] ss:$24 sps:$4 sm:$0xff]   ;;  %v10974_v51 = vld [vmem:[%s12712_s17 + $0x7f4] ss:$24 sps:$4 sm:$0xff]   ;;  %v10972_v53 = vld [vmem:[%s12712_s17 + $0x7f0] ss:$24 sps:$4 sm:$0xff]  }
 0x1fe   : > { %v2667_v18 = vpop.f32.mrf.mxu1  ;;  %v13075_v1 = vadd.f32 %v2665_v58, %v2625_v13  ;;  %2919 = vmatpush1.bf16.msra.mxu0 %v10900_v55  ;;  %v10977_v52 = vld [vmem:[%s12722_s2 + $0x3c4] ss:$48 sps:$4 sm:$0xff]   ;;  %v10975_v54 = vld [vmem:[%s12722_s2 + $0x3c0] ss:$48 sps:$4 sm:$0xff]  }
 0x1ff   : > { %6510 = vmatpush1.bf16.msra.mxu1 %v10903_v56  ;;  %2920 = vmatprep.subr.bf16.mxu0 %v10908_v59  ;;  %v2627_v7 = vpop.f32.mrf.mxu0  ;;  %v10980_v55 = vld [vmem:[%s12712_s17 + $0x7c4] ss:$24 sps:$4 sm:$0xff]   ;;  %v10983_v56 = vld [vmem:[%s12722_s2 + $0x364] ss:$48 sps:$4 sm:$0xff]   ;;  %v10986_v59 = vld [vmem:[%s12712_s17 + $0x794] ss:$24 sps:$4 sm:$0xff]  }
 0x200   : > { %v2668_v5 = vpop.f32.mrf.mxu1  ;;  %6511 = vmatprep.subr.bf16.mxu1 %v10911_v60  ;;  %v10978_v57 = vld [vmem:[%s12712_s17 + $0x7c0] ss:$24 sps:$4 sm:$0xff]   ;;  %v10981_v58 = vld [vmem:[%s12722_s2 + $0x360] ss:$48 sps:$4 sm:$0xff]   ;;  %v10984_v13 = vld [vmem:[%s12712_s17 + $0x790] ss:$24 sps:$4 sm:$0xff]  }
 0x201   : > { %v10989_v60 = vld [vmem:[%s12722_s2 + $0x304] ss:$48 sps:$4 sm:$0xff]   ;;  %v10987_v18 = vld [vmem:[%s12722_s2 + $0x300] ss:$48 sps:$4 sm:$0xff]  }
 0x202   : > { %2921 = vmatpush1.bf16.msra.mxu0 %v10906_v2  ;;  %v10992_v0 = vld [vmem:[%s12695_s1] ss:$24 sps:$4 sm:$0xff]  }
 0x203   : > { %6512 = vmatpush1.bf16.msra.mxu1 %v10909_v4  ;;  %2922 = vmatprep.subr.bf16.mxu0 %v10914_v6  ;;  %v10995_v2 = vld [vmem:[%s12722_s2 + $0x8a4] ss:$48 sps:$4 sm:$0xff]   ;;  %v10993_v5 = vld [vmem:[%s12722_s2 + $0x8a0] ss:$48 sps:$4 sm:$0xff]  }
 0x204   : > { %6513 = vmatprep.subr.bf16.mxu1 %v10917_v23  ;;  %v10998_v4 = vld [vmem:[%s12722_s2 + $0xea4] ss:$48 sps:$4 sm:$0xff]   ;;  %v10996_v6 = vld [vmem:[%s12722_s2 + $0xea0] ss:$48 sps:$4 sm:$0xff]  }
 0x205   : > { %v11001_v23 = vld [vmem:[%s12722_s2 + $0x844] ss:$48 sps:$4 sm:$0xff]  }
 0x206   : > { %2923 = vmatpush1.bf16.msra.mxu0 %v10912_v8  ;;  %v11004_v7 = vld [vmem:[%s12722_s2 + $0xe44] ss:$48 sps:$4 sm:$0xff]   ;;  %v10999_v8 = vld [vmem:[%s12722_s2 + $0x840] ss:$48 sps:$4 sm:$0xff]  }
 0x207   : > { %6514 = vmatpush1.bf16.msra.mxu1 %v10915_v9  ;;  %2924 = vmatprep.subr.bf16.mxu0 %v10920_v10  ;;  %v11002_v9 = vld [vmem:[%s12722_s2 + $0xe40] ss:$48 sps:$4 sm:$0xff]  }
 0x208   : > { %6515 = vmatprep.subr.bf16.mxu1 %v10923_v11  ;;  %v13141_v10 = vld [vmem:[%s12695_s1 + $0xc] ss:$24 sps:$4 sm:$0xff]  }
 0x209   : > { %v11091_v11 = vld [vmem:[%s12695_s1 + $0x14] ss:$24 sps:$4 sm:$0xff]  }
 0x20a   : > { %2925 = vmatpush1.bf16.msra.mxu0 %v10918_v12 }
 0x20b   : > { %6516 = vmatpush1.bf16.msra.mxu1 %v10921_v14  ;;  %2926 = vmatprep.subr.bf16.mxu0 %v10926_v15 }
 0x20c   : > { %6517 = vmatprep.subr.bf16.mxu1 %v10929_v16 }
 0x20e   : > { %2927 = vmatpush1.bf16.msra.mxu0 %v10924_v17 }
 0x20f   : > { %6518 = vmatpush1.bf16.msra.mxu1 %v10927_v19  ;;  %2928 = vmatprep.subr.bf16.mxu0 %v10932_v20  ;;  %v11007_v19 = vld [vmem:[%s12722_s2 + $0x7e4] ss:$48 sps:$4 sm:$0xff]  }
 0x210   : > { %6519 = vmatprep.subr.bf16.mxu1 %v10935_v21  ;;  %v11010_v20 = vld [vmem:[%s12722_s2 + $0xde4] ss:$48 sps:$4 sm:$0xff]  }
 0x212   : > { %2929 = vmatpush1.bf16.msra.mxu0 %v10930_v22  ;;  %v11005_v22 = vld [vmem:[%s12722_s2 + $0x7e0] ss:$48 sps:$4 sm:$0xff]  }
 0x213   : > { %6520 = vmatpush1.bf16.msra.mxu1 %v10933_v24  ;;  %2930 = vmatprep.subr.bf16.mxu0 %v10938_v25 }
 0x214   : > { %6521 = vmatprep.subr.bf16.mxu1 %v10941_v26  ;;  %v11016_v26 = vld [vmem:[%s12722_s2 + $0xd84] ss:$48 sps:$4 sm:$0xff]  }
 0x216   : > { %2931 = vmatpush1.bf16.msra.mxu0 %v10936_v27 }
 0x217   : > { %6522 = vmatpush1.bf16.msra.mxu1 %v10939_v28  ;;  %2932 = vmatprep.subr.bf16.mxu0 %v10944_v29  ;;  %v11011_v28 = vld [vmem:[%s12722_s2 + $0x780] ss:$48 sps:$4 sm:$0xff]  }
 0x218   : > { %6523 = vmatprep.subr.bf16.mxu1 %v10947_v30  ;;  %v11014_v29 = vld [vmem:[%s12722_s2 + $0xd80] ss:$48 sps:$4 sm:$0xff]   ;;  %v11019_v30 = vld [vmem:[%s12722_s2 + $0x724] ss:$48 sps:$4 sm:$0xff]  }
 0x21a   : > { %2933 = vmatpush2.bf16.msra.mxu0 %v10942_v31  ;;  %v11022_v31 = vld [vmem:[%s12722_s2 + $0xd24] ss:$48 sps:$4 sm:$0xff]  }
 0x21b   : > { %6524 = vmatpush2.bf16.msra.mxu1 %v10945_v32  ;;  %2934 = vmatprep.subr.bf16.mxu0 %v10950_v33  ;;  %v11017_v32 = vld [vmem:[%s12722_s2 + $0x720] ss:$48 sps:$4 sm:$0xff]  }
 0x21c   : > { %6525 = vmatprep.subr.bf16.mxu1 %v10953_v34  ;;  %v11020_v33 = vld [vmem:[%s12722_s2 + $0xd20] ss:$48 sps:$4 sm:$0xff]   ;;  %v11025_v34 = vld [vmem:[%s12722_s2 + $0x6c4] ss:$48 sps:$4 sm:$0xff]  }
 0x21e   : > { %2935 = vmatpush2.bf16.msra.mxu0 %v10948_v35  ;;  %v11028_v35 = vld [vmem:[%s12722_s2 + $0xcc4] ss:$48 sps:$4 sm:$0xff]  }
 0x21f   : > { %6526 = vmatpush2.bf16.msra.mxu1 %v10951_v36  ;;  %2936 = vmatprep.subr.bf16.mxu0 %v10956_v37  ;;  %v11023_v36 = vld [vmem:[%s12722_s2 + $0x6c0] ss:$48 sps:$4 sm:$0xff]  }
 0x220   : > { %6527 = vmatprep.subr.bf16.mxu1 %v10959_v39  ;;  %v11026_v37 = vld [vmem:[%s12722_s2 + $0xcc0] ss:$48 sps:$4 sm:$0xff]   ;;  %v11031_v39 = vld [vmem:[%s12722_s2 + $0x664] ss:$48 sps:$4 sm:$0xff]  }
 0x222   : > { %2937 = vmatpush2.bf16.msra.mxu0 %v10954_v40  ;;  %v11034_v40 = vld [vmem:[%s12722_s2 + $0xc64] ss:$48 sps:$4 sm:$0xff]  }
 0x223   : > { %6528 = vmatpush2.bf16.msra.mxu1 %v10957_v41  ;;  %2938 = vmatprep.subr.bf16.mxu0 %v10962_v44  ;;  %v11029_v41 = vld [vmem:[%s12722_s2 + $0x660] ss:$48 sps:$4 sm:$0xff]  }
 0x224   : > { %6529 = vmatprep.subr.bf16.mxu1 %v10965_v45  ;;  %v11032_v44 = vld [vmem:[%s12722_s2 + $0xc60] ss:$48 sps:$4 sm:$0xff]   ;;  %v11037_v45 = vld [vmem:[%s12722_s2 + $0x604] ss:$48 sps:$4 sm:$0xff]  }
 0x226   : > { %2939 = vmatpush2.bf16.msra.mxu0 %v10960_v47  ;;  %v11040_v47 = vld [vmem:[%s12722_s2 + $0xc04] ss:$48 sps:$4 sm:$0xff]  }
 0x227   : > { %6530 = vmatpush2.bf16.msra.mxu1 %v10963_v48  ;;  %2940 = vmatprep.subr.bf16.mxu0 %v10968_v49  ;;  %v11035_v48 = vld [vmem:[%s12722_s2 + $0x600] ss:$48 sps:$4 sm:$0xff]  }
 0x228   : > { %6531 = vmatprep.subr.bf16.mxu1 %v10971_v50  ;;  %v11038_v49 = vld [vmem:[%s12722_s2 + $0xc00] ss:$48 sps:$4 sm:$0xff]   ;;  %v11043_v50 = vld [vmem:[%s12722_s2 + $0xba4] ss:$48 sps:$4 sm:$0xff]  }
 0x22a   : > { %2941 = vmatpush2.bf16.msra.mxu0 %v10966_v62  ;;  %v11046_v62 = vld [vmem:[%s12722_s2 + $0x11a4] ss:$48 sps:$4 sm:$0xff]  }
 0x22b   : > { %6532 = vmatpush2.bf16.msra.mxu1 %v10969_v3  ;;  %2942 = vmatprep.subr.bf16.mxu0 %v10974_v51  ;;  %v11041_v3 = vld [vmem:[%s12722_s2 + $0xba0] ss:$48 sps:$4 sm:$0xff]  }
 0x22c   : > { %6533 = vmatprep.subr.bf16.mxu1 %v10977_v52  ;;  %v11044_v51 = vld [vmem:[%s12722_s2 + $0x11a0] ss:$48 sps:$4 sm:$0xff]   ;;  %v11049_v52 = vld [vmem:[%s12722_s2 + $0xb44] ss:$48 sps:$4 sm:$0xff]  }
 0x22e   : > { %2943 = vmatpush2.bf16.msra.mxu0 %v10972_v53  ;;  %v11052_v53 = vld [vmem:[%s12722_s2 + $0x1144] ss:$48 sps:$4 sm:$0xff]  }
 0x22f   : > { %6534 = vmatpush2.bf16.msra.mxu1 %v10975_v54  ;;  %2944 = vmatprep.subr.bf16.mxu0 %v10980_v55  ;;  %v11047_v54 = vld [vmem:[%s12722_s2 + $0xb40] ss:$48 sps:$4 sm:$0xff]  }
 0x230   : > { %6535 = vmatprep.subr.bf16.mxu1 %v10983_v56  ;;  %v11050_v55 = vld [vmem:[%s12722_s2 + $0x1140] ss:$48 sps:$4 sm:$0xff]   ;;  %v11055_v56 = vld [vmem:[%s12722_s2 + $0xae4] ss:$48 sps:$4 sm:$0xff]  }
 0x232   : > { %2945 = vmatpush2.bf16.msra.mxu0 %v10978_v57  ;;  %v11058_v57 = vld [vmem:[%s12722_s2 + $0x10e4] ss:$48 sps:$4 sm:$0xff]  }
 0x233   : > { %6536 = vmatpush2.bf16.msra.mxu1 %v10981_v58  ;;  %2946 = vmatprep.subr.bf16.mxu0 %v10986_v59  ;;  %v11053_v58 = vld [vmem:[%s12722_s2 + $0xae0] ss:$48 sps:$4 sm:$0xff]  }
 0x234   : > { %6537 = vmatprep.subr.bf16.mxu1 %v10989_v60  ;;  %v11056_v59 = vld [vmem:[%s12722_s2 + $0x10e0] ss:$48 sps:$4 sm:$0xff]   ;;  %v11061_v60 = vld [vmem:[%s12722_s2 + $0xa84] ss:$48 sps:$4 sm:$0xff]  }
 0x236   : > { %2947 = vmatpush2.bf16.msra.mxu0 %v10984_v13  ;;  %v11064_v13 = vld [vmem:[%s12722_s2 + $0x1084] ss:$48 sps:$4 sm:$0xff]  }
 0x237   : > { %6538 = vmatpush2.bf16.msra.mxu1 %v10987_v18  ;;  %6550 = vmatprep.subr.bf16.mxu0 %v10995_v2  ;;  %v11059_v18 = vld [vmem:[%s12722_s2 + $0xa80] ss:$48 sps:$4 sm:$0xff]   ;;  %v11067_v2 = vld [vmem:[%s12722_s2 + $0xa24] ss:$48 sps:$4 sm:$0xff]  }
 0x238   : > { %6593 = vmatprep.subr.bf16.mxu1 %v10998_v4  ;;  %v11070_v4 = vld [vmem:[%s12722_s2 + $0x1024] ss:$48 sps:$4 sm:$0xff]  }
 0x239   : > { %v2704_v12 = vpop.f32.mrf.mxu0  ;;  %2949 = vmatmul.mubr.bf16.vlgmr.msra.gmra.mxu0 %v12815_v63  ;;  %v11008_v63 = vld [vmem:[%s12722_s2 + $0xde0] ss:$48 sps:$4 sm:$0xff]  }
 0x23a   : > { %v13144_v14 = vpop.f32.mrf.mxu1  ;;  %6540 = vmatmul.mubr.bf16.vlgmr.msra.gmra.mxu1 %v10992_v0  ;;  %v13148_v15 = vadd.f32 %v2704_v12, %v13072_v61  ;;  %6551 = vmatpush1.bf16.msra.mxu0 %v10993_v5  ;;  %v11062_v0 = vld [vmem:[%s12722_s2 + $0x1080] ss:$48 sps:$4 sm:$0xff]   ;;  %v11082_v12 = vld [vmem:[%s12722_s2 + $0xf64] ss:$48 sps:$4 sm:$0xff]  }
 0x23b   : > { %6594 = vmatpush1.bf16.msra.mxu1 %v10996_v6  ;;  %v2706_v16 = vpop.f32.mrf.mxu0  ;;  %6552 = vmatprep.subr.bf16.mxu0 %v11001_v23  ;;  %v11065_v5 = vld [vmem:[%s12722_s2 + $0xa20] ss:$48 sps:$4 sm:$0xff]   ;;  %v11073_v23 = vld [vmem:[%s12722_s2 + $0x9c4] ss:$48 sps:$4 sm:$0xff]  }
 0x23c   : > { %v13150_v17 = vpop.f32.mrf.mxu1  ;;  %6595 = vmatprep.subr.bf16.mxu1 %v11004_v7  ;;  %v13155_v21 = vadd.f32 %v2706_v16, %v13075_v1  ;;  %6582 = vmatprep.mubr.bf16.mxu0 %v13141_v10  ;;  %v11013_v1 = vld [vmem:[%s12722_s2 + $0x784] ss:$48 sps:$4 sm:$0xff]   ;;  %v11068_v6 = vld [vmem:[%s12722_s2 + $0x1020] ss:$48 sps:$4 sm:$0xff]  }
 0x23d   : > { %6625 = vmatprep.mubr.bf16.mxu1 %v11091_v11  ;;  %v2708_v24 = vpop.f32.mrf.mxu0  ;;  %v11076_v7 = vld [vmem:[%s12722_s2 + $0xfc4] ss:$48 sps:$4 sm:$0xff]   ;;  %v11077_v16 = vld [vmem:[%s12722_s2 + $0x960] ss:$48 sps:$4 sm:$0xff]  }
 0x23e   : > { %v2749_v61 = vpop.f32.mrf.mxu1  ;;  %6553 = vmatpush1.bf16.msra.mxu0 %v10999_v8  ;;  %v11071_v8 = vld [vmem:[%s12722_s2 + $0x9c0] ss:$48 sps:$4 sm:$0xff]   ;;  %v11079_v11 = vld [vmem:[%s12722_s2 + $0x964] ss:$48 sps:$4 sm:$0xff]  }
 0x23f   : > { %6596 = vmatpush1.bf16.msra.mxu1 %v11002_v9  ;;  %6554 = vmatprep.subr.bf16.mxu0 %v11007_v19  ;;  %v2709_v27 = vpop.f32.mrf.mxu0  ;;  %v11074_v9 = vld [vmem:[%s12722_s2 + $0xfc0] ss:$48 sps:$4 sm:$0xff]   ;;  %v13214_v61 = vsub.s32 3, %v12789_v43 }
 0x240   : > { %v2750_v25 = vpop.f32.mrf.mxu1  ;;  %6597 = vmatprep.subr.bf16.mxu1 %v11010_v20  ;;  %v11080_v19 = vld [vmem:[%s12722_s2 + $0xf60] ss:$48 sps:$4 sm:$0xff]   ;;  %v11085_v20 = vld [vmem:[%s12722_s2 + $0x904] ss:$48 sps:$4 sm:$0xff]   ;;  %v11097_v27 = vld [vmem:[%s12722_s2 + $0x2ac] ss:$48 sps:$4 sm:$0xff]  }
 0x241   : > { %v11083_v24 = vld [vmem:[%s12722_s2 + $0x900] ss:$48 sps:$4 sm:$0xff]  }
 0x242   : > { %6555 = vmatpush1.bf16.msra.mxu0 %v11005_v22  ;;  %v11088_v22 = vld [vmem:[%s12722_s2 + $0xf04] ss:$48 sps:$4 sm:$0xff]   ;;  %v11086_v25 = vld [vmem:[%s12722_s2 + $0xf00] ss:$48 sps:$4 sm:$0xff]  }
 0x243   : > { %6598 = vmatpush1.bf16.msra.mxu1 %v11008_v63  ;;  %6556 = vmatprep.subr.bf16.mxu0 %v11013_v1  ;;  %v13211_v63 = vsub.s32 2, %v12789_v43  ;;  %v13219_v1 = vld [vmem:[%s12695_s1 + $0x8] ss:$24 sps:$4 sm:$0xff]  }
 0x244   : > { %6599 = vmatprep.subr.bf16.mxu1 %v11016_v26  ;;  %v11094_v26 = vld [vmem:[%s12695_s1 + $0x10] ss:$24 sps:$4 sm:$0xff]  }
 0x246   : > { %6557 = vmatpush1.bf16.msra.mxu0 %v11011_v28  ;;  %v11100_v28 = vld [vmem:[%s12722_s2 + $0x8ac] ss:$48 sps:$4 sm:$0xff]  }
 0x247   : > { %6600 = vmatpush1.bf16.msra.mxu1 %v11014_v29  ;;  %6558 = vmatprep.subr.bf16.mxu0 %v11019_v30  ;;  %v13225_v29 = vld [vmem:[%s12714_s4] sm:$0x3f]  ;;  %s760_s4 = scalar_lea.vmem [#allocation20], %s12691_s0 }
 0x248   : > { %6601 = vmatprep.subr.bf16.mxu1 %v11022_v31  ;;  %v2569_v30 = vrot.slane %v13225_v29, %v13211_v63  ;;  %v11095_v31 = vld [vmem:[%s12722_s2 + $0x2a8] ss:$48 sps:$4 sm:$0xff]   ;;  %s8883_s23 = sshll.u32 %s760_s4, 4  ;;  %s14111_s23 = int_to_ptr.vmem [resolvable:$true] %s8883_s23 }
 0x249   : > { %s12189_s12 = scalar_lea.vmem %s14111_s23, 16 }
 0x24a   : > { %6559 = vmatpush1.bf16.msra.mxu0 %v11017_v32  ;;  %v11098_v32 = vld [vmem:[%s12722_s2 + $0x8a8] ss:$48 sps:$4 sm:$0xff]   ;;  %p12190_p4 = scmp.ne.s32.totalorder %s14111_s23, %s12189_s12 }
 0x24b   : > { %6602 = vmatpush1.bf16.msra.mxu1 %v11020_v33  ;;  %6560 = vmatprep.subr.bf16.mxu0 %v11025_v34  ;;  %v2573_v33 = vrot.slane %v13225_v29, %v13214_v61  ;;  %v11103_v34 = vld [vmem:[%s12722_s2 + $0x24c] ss:$48 sps:$4 sm:$0xff]  }
 0x24c   : > { %6603 = vmatprep.subr.bf16.mxu1 %v11028_v35  ;;  %v11106_v35 = vld [vmem:[%s12722_s2 + $0x84c] ss:$48 sps:$4 sm:$0xff]   ;;  %p12191_p6 = pnand %p12190_p4, %p12605_p12 }
 0x24e   : > { %6561 = vmatpush1.bf16.msra.mxu0 %v11023_v36  ;;  %v2746_v36 = vadd.f32 %v13144_v14, %v2569_v30  ;;  %v11109_v14 = vld [vmem:[%s12722_s2 + $0x1ec] ss:$48 sps:$4 sm:$0xff]   ;;  %v11152_v30 = vld [vmem:[%s12722_s2 + $0xb48] ss:$48 sps:$4 sm:$0xff]   ;;  %p12192_p13 = pneg %p12191_p6 }
 0x24f   : > { %6604 = vmatpush1.bf16.msra.mxu1 %v11026_v37  ;;  %6562 = vmatprep.subr.bf16.mxu0 %v11031_v39  ;;  %v11101_v37 = vld [vmem:[%s12722_s2 + $0x248] ss:$48 sps:$4 sm:$0xff]  }
 0x250   : > { %6605 = vmatprep.subr.bf16.mxu1 %v11034_v40  ;;  %v11104_v39 = vld [vmem:[%s12722_s2 + $0x848] ss:$48 sps:$4 sm:$0xff]  }
 0x252   : > { %6563 = vmatpush1.bf16.msra.mxu0 %v11029_v41 }
 0x253   : > { %6606 = vmatpush1.bf16.msra.mxu1 %v11032_v44  ;;  %6564 = vmatprep.subr.bf16.mxu0 %v11037_v45  ;;  %v2748_v44 = vadd.f32 %v13150_v17, %v2573_v33  ;;  %v11155_v33 = vld [vmem:[%s12722_s2 + $0x4e8] ss:$48 sps:$4 sm:$0xff]  }
 0x254   : > { %6607 = vmatprep.subr.bf16.mxu1 %v11040_v47 }
 0x256   : > { %6565 = vmatpush1.bf16.msra.mxu0 %v11035_v48 }
 0x257   : > { %6608 = vmatpush1.bf16.msra.mxu1 %v11038_v49  ;;  %6566 = vmatprep.subr.bf16.mxu0 %v11043_v50  ;;  %v11112_v49 = vld [vmem:[%s12722_s2 + $0x7ec] ss:$48 sps:$4 sm:$0xff]  }
 0x258   : > { %6609 = vmatprep.subr.bf16.mxu1 %v11046_v62 }
 0x25a   : > { %6567 = vmatpush2.bf16.msra.mxu0 %v11041_v3  ;;  %v11107_v3 = vld [vmem:[%s12722_s2 + $0x1e8] ss:$48 sps:$4 sm:$0xff]  }
 0x25b   : > { %6610 = vmatpush2.bf16.msra.mxu1 %v11044_v51  ;;  %6568 = vmatprep.subr.bf16.mxu0 %v11049_v52  ;;  %v11110_v51 = vld [vmem:[%s12722_s2 + $0x7e8] ss:$48 sps:$4 sm:$0xff]  }
 0x25c   : > { %6611 = vmatprep.subr.bf16.mxu1 %v11052_v53  ;;  %v13247_v52 = vld [vmem:[%s12695_s1 + $0x4] ss:$24 sps:$4 sm:$0xff]  }
 0x25e   : > { %6569 = vmatpush2.bf16.msra.mxu0 %v11047_v54 }
 0x25f   : > { %6612 = vmatpush2.bf16.msra.mxu1 %v11050_v55  ;;  %6570 = vmatprep.subr.bf16.mxu0 %v11055_v56  ;;  %v11115_v56 = vld [vmem:[%s12722_s2 + $0x18c] ss:$48 sps:$4 sm:$0xff]  }
 0x260   : > { %6613 = vmatprep.subr.bf16.mxu1 %v11058_v57  ;;  %v11118_v57 = vld [vmem:[%s12722_s2 + $0x78c] ss:$48 sps:$4 sm:$0xff]  }
 0x262   : > { %6571 = vmatpush2.bf16.msra.mxu0 %v11053_v58 }
 0x263   : > { %6614 = vmatpush2.bf16.msra.mxu1 %v11056_v59  ;;  %6572 = vmatprep.subr.bf16.mxu0 %v11061_v60  ;;  %v11116_v59 = vld [vmem:[%s12722_s2 + $0x788] ss:$48 sps:$4 sm:$0xff]   ;;  %v11121_v60 = vld [vmem:[%s12722_s2 + $0x12c] ss:$48 sps:$4 sm:$0xff]  }
 0x264   : > { %6615 = vmatprep.subr.bf16.mxu1 %v11064_v13  ;;  %v11124_v13 = vld [vmem:[%s12722_s2 + $0x72c] ss:$48 sps:$4 sm:$0xff]  }
 0x266   : > { %6573 = vmatpush2.bf16.msra.mxu0 %v11059_v18  ;;  %v11119_v18 = vld [vmem:[%s12722_s2 + $0x128] ss:$48 sps:$4 sm:$0xff]  }
 0x267   : > { %6616 = vmatpush2.bf16.msra.mxu1 %v11062_v0  ;;  %6574 = vmatprep.subr.bf16.mxu0 %v11067_v2  ;;  %v11122_v0 = vld [vmem:[%s12722_s2 + $0x728] ss:$48 sps:$4 sm:$0xff]   ;;  %v11127_v2 = vld [vmem:[%s12722_s2 + $0xcc] ss:$48 sps:$4 sm:$0xff]  }
 0x268   : > { %6617 = vmatprep.subr.bf16.mxu1 %v11070_v4  ;;  %v11130_v4 = vld [vmem:[%s12722_s2 + $0x6cc] ss:$48 sps:$4 sm:$0xff]  }
 0x26a   : > { %6575 = vmatpush2.bf16.msra.mxu0 %v11065_v5  ;;  %v11125_v5 = vld [vmem:[%s12722_s2 + $0xc8] ss:$48 sps:$4 sm:$0xff]  }
 0x26b   : > { %6618 = vmatpush2.bf16.msra.mxu1 %v11068_v6  ;;  %6576 = vmatprep.subr.bf16.mxu0 %v11073_v23  ;;  %v11128_v6 = vld [vmem:[%s12722_s2 + $0x6c8] ss:$48 sps:$4 sm:$0xff]   ;;  %v11133_v23 = vld [vmem:[%s12722_s2 + $0x6c] ss:$48 sps:$4 sm:$0xff]  }
 0x26c   : > { %6619 = vmatprep.subr.bf16.mxu1 %v11076_v7  ;;  %v11136_v7 = vld [vmem:[%s12722_s2 + $0x66c] ss:$48 sps:$4 sm:$0xff]  }
 0x26e   : > { %6577 = vmatpush2.bf16.msra.mxu0 %v11071_v8  ;;  %v11131_v8 = vld [vmem:[%s12722_s2 + $0x68] ss:$48 sps:$4 sm:$0xff]  }
 0x26f   : > { %6620 = vmatpush2.bf16.msra.mxu1 %v11074_v9  ;;  %6578 = vmatprep.subr.bf16.mxu0 %v11079_v11  ;;  %v11134_v9 = vld [vmem:[%s12722_s2 + $0x668] ss:$48 sps:$4 sm:$0xff]   ;;  %v11139_v11 = vld [vmem:[%s12722_s2 + $0xc] ss:$48 sps:$4 sm:$0xff]  }
 0x270   : > { %6621 = vmatprep.subr.bf16.mxu1 %v11082_v12  ;;  %v11142_v12 = vld [vmem:[%s12722_s2 + $0x60c] ss:$48 sps:$4 sm:$0xff]  }
 0x272   : > { %6579 = vmatpush2.bf16.msra.mxu0 %v11077_v16  ;;  %v11137_v16 = vld [vmem:[%s12722_s2 + $0x8] ss:$48 sps:$4 sm:$0xff]  }
 0x273   : > { %6622 = vmatpush2.bf16.msra.mxu1 %v11080_v19  ;;  %6580 = vmatprep.subr.bf16.mxu0 %v11085_v20  ;;  %v11140_v19 = vld [vmem:[%s12722_s2 + $0x608] ss:$48 sps:$4 sm:$0xff]   ;;  %v11145_v20 = vld [vmem:[%s12722_s2 + $0x5ac] ss:$48 sps:$4 sm:$0xff]  }
 0x274   : > { %6623 = vmatprep.subr.bf16.mxu1 %v11088_v22  ;;  %v11148_v22 = vld [vmem:[%s12722_s2 + $0xbac] ss:$48 sps:$4 sm:$0xff]  }
 0x276   : > { %6581 = vmatpush2.bf16.msra.mxu0 %v11083_v24  ;;  %v11143_v24 = vld [vmem:[%s12722_s2 + $0x5a8] ss:$48 sps:$4 sm:$0xff]  }
 0x277   : > { %6624 = vmatpush2.bf16.msra.mxu1 %v11086_v25  ;;  %6636 = vmatprep.subr.bf16.mxu0 %v11097_v27  ;;  %v11146_v25 = vld [vmem:[%s12722_s2 + $0xba8] ss:$48 sps:$4 sm:$0xff]   ;;  %v11154_v27 = vld [vmem:[%s12722_s2 + $0xb4c] ss:$48 sps:$4 sm:$0xff]  }
 0x278   : > { %6679 = vmatprep.subr.bf16.mxu1 %v11100_v28  ;;  %v11149_v28 = vld [vmem:[%s12722_s2 + $0x548] ss:$48 sps:$4 sm:$0xff]  }
 0x279   : > { %v2786_v40 = vpop.f32.mrf.mxu0  ;;  %6583 = vmatmul.mubr.bf16.vlgmr.msra.gmra.mxu0 %v13219_v1 }
 0x27a   : > { %v2827_v41 = vpop.f32.mrf.mxu1  ;;  %6626 = vmatmul.mubr.bf16.vlgmr.msra.gmra.mxu1 %v11094_v26  ;;  %v2787_v45 = vadd.f32 %v2786_v40, %v2746_v36  ;;  %6637 = vmatpush1.bf16.msra.mxu0 %v11095_v31  ;;  %v11151_v26 = vld [vmem:[%s12722_s2 + $0x54c] ss:$48 sps:$4 sm:$0xff]  }
 0x27b   : > { %6680 = vmatpush1.bf16.msra.mxu1 %v11098_v32  ;;  %v2788_v47 = vpop.f32.mrf.mxu0  ;;  %6638 = vmatprep.subr.bf16.mxu0 %v11103_v34  ;;  %v11157_v31 = vld [vmem:[%s12722_s2 + $0x4ec] ss:$48 sps:$4 sm:$0xff]   ;;  %v11158_v34 = vld [vmem:[%s12722_s2 + $0xae8] ss:$48 sps:$4 sm:$0xff]  }
 0x27c   : > { %v2829_v48 = vpop.f32.mrf.mxu1  ;;  %6681 = vmatprep.subr.bf16.mxu1 %v11106_v35  ;;  %v13242_v50 = vadd.f32 %v2827_v41, %v2787_v45  ;;  %v2789_v62 = vadd.f32 %v2788_v47, %v2748_v44  ;;  %6668 = vmatprep.mubr.bf16.mxu0 %v13247_v52  ;;  %v11160_v32 = vld [vmem:[%s12722_s2 + $0xaec] ss:$48 sps:$4 sm:$0xff]   ;;  %v11167_v44 = vld [vmem:[%s12722_s2 + $0x428] ss:$48 sps:$4 sm:$0xff]  }
 0x27d   : > { %6711 = vmatprep.mubr.bf16.mxu1 %v13141_v10  ;;  %v2790_v53 = vpop.f32.mrf.mxu0  ;;  %v11113_v10 = vld [vmem:[%s12722_s2 + $0x188] ss:$48 sps:$4 sm:$0xff]   ;;  %v11163_v35 = vld [vmem:[%s12722_s2 + $0x48c] ss:$48 sps:$4 sm:$0xff]  }
 0x27e   : > { %v2831_v17 = vpop.f32.mrf.mxu1  ;;  %v13251_v54 = vadd.f32 %v2829_v48, %v2789_v62  ;;  %6639 = vmatpush1.bf16.msra.mxu0 %v11101_v37  ;;  %v11166_v36 = vld [vmem:[%s12722_s2 + $0xa8c] ss:$48 sps:$4 sm:$0xff]   ;;  %v11161_v37 = vld [vmem:[%s12722_s2 + $0x488] ss:$48 sps:$4 sm:$0xff]  }
 0x27f   : > { %6682 = vmatpush1.bf16.msra.mxu1 %v11104_v39  ;;  %6640 = vmatprep.subr.bf16.mxu0 %v11109_v14  ;;  %v2791_v58 = vpop.f32.mrf.mxu0  ;;  %v11164_v39 = vld [vmem:[%s12722_s2 + $0xa88] ss:$48 sps:$4 sm:$0xff]   ;;  %v11169_v40 = vld [vmem:[%s12722_s2 + $0x42c] ss:$48 sps:$4 sm:$0xff]  }
 0x280   : > { %v2832_v55 = vpop.f32.mrf.mxu1  ;;  %6683 = vmatprep.subr.bf16.mxu1 %v11112_v49  ;;  %v11172_v41 = vld [vmem:[%s12722_s2 + $0xa2c] ss:$48 sps:$4 sm:$0xff]   ;;  %v11170_v45 = vld [vmem:[%s12722_s2 + $0xa28] ss:$48 sps:$4 sm:$0xff]   ;;  %v13306_v58 = vsub.s32 4, %v12789_v43 }
 0x281   : > { %v11175_v47 = vld [vmem:[%s12722_s2 + $0x3cc] ss:$48 sps:$4 sm:$0xff]   ;;  %v11173_v14 = vld [vmem:[%s12722_s2 + $0x3c8] ss:$48 sps:$4 sm:$0xff]  }
 0x282   : > { %6641 = vmatpush1.bf16.msra.mxu0 %v11107_v3  ;;  %v11178_v48 = vld [vmem:[%s12722_s2 + $0x9cc] ss:$48 sps:$4 sm:$0xff]   ;;  %v11176_v49 = vld [vmem:[%s12722_s2 + $0x9c8] ss:$48 sps:$4 sm:$0xff]  }
 0x283   : > { %6684 = vmatpush1.bf16.msra.mxu1 %v11110_v51  ;;  %6642 = vmatprep.subr.bf16.mxu0 %v11115_v56  ;;  %v11181_v62 = vld [vmem:[%s12722_s2 + $0x36c] ss:$48 sps:$4 sm:$0xff]   ;;  %v11179_v51 = vld [vmem:[%s12722_s2 + $0x368] ss:$48 sps:$4 sm:$0xff]  }
 0x284   : > { %6685 = vmatprep.subr.bf16.mxu1 %v11118_v57  ;;  %v11184_v3 = vld [vmem:[%s12722_s2 + $0x96c] ss:$48 sps:$4 sm:$0xff]   ;;  %v11182_v17 = vld [vmem:[%s12722_s2 + $0x968] ss:$48 sps:$4 sm:$0xff]  }
 0x285   : > { %v11187_v53 = vld [vmem:[%s12722_s2 + $0x30c] ss:$48 sps:$4 sm:$0xff]   ;;  %v11185_v56 = vld [vmem:[%s12722_s2 + $0x308] ss:$48 sps:$4 sm:$0xff]  }
 0x286   : > { %6643 = vmatpush1.bf16.msra.mxu0 %v11113_v10  ;;  %v11190_v55 = vld [vmem:[%s12722_s2 + $0x90c] ss:$48 sps:$4 sm:$0xff]   ;;  %v11188_v57 = vld [vmem:[%s12722_s2 + $0x908] ss:$48 sps:$4 sm:$0xff]  }
 0x287   : > { %6686 = vmatpush1.bf16.msra.mxu1 %v11116_v59  ;;  %6644 = vmatprep.subr.bf16.mxu0 %v11121_v60  ;;  %v11193_v10 = vld [vmem:[%s12722_s2 + $0xeac] ss:$48 sps:$4 sm:$0xff]   ;;  %v11196_v59 = vld [vmem:[%s12722_s2 + $0x2b4] ss:$48 sps:$4 sm:$0xff]   ;;  %v11191_v60 = vld [vmem:[%s12722_s2 + $0xea8] ss:$48 sps:$4 sm:$0xff]  }
 0x288   : > { %6687 = vmatprep.subr.bf16.mxu1 %v11124_v13  ;;  %v11194_v13 = vld [vmem:[%s12722_s2 + $0x2b0] ss:$48 sps:$4 sm:$0xff]  }
 0x28a   : > { %6645 = vmatpush1.bf16.msra.mxu0 %v11119_v18  ;;  %v13313_v18 = vsub.s32 5, %v12789_v43 }
 0x28b   : > { %6688 = vmatpush1.bf16.msra.mxu1 %v11122_v0  ;;  %6646 = vmatprep.subr.bf16.mxu0 %v11127_v2  ;;  %v2577_v0 = vrot.slane %v13225_v29, %v13306_v58  ;;  %v11199_v2 = vld [vmem:[%s12722_s2 + $0xe4c] ss:$48 sps:$4 sm:$0xff]  }
 0x28c   : > { %6689 = vmatprep.subr.bf16.mxu1 %v11130_v4  ;;  %v11202_v4 = vld [vmem:[%s12722_s2 + $0x254] ss:$48 sps:$4 sm:$0xff]  }
 0x28e   : > { %6647 = vmatpush1.bf16.msra.mxu0 %v11125_v5  ;;  %v2581_v5 = vrot.slane %v13225_v29, %v13313_v18  ;;  %v11205_v29 = vld [vmem:[%s12722_s2 + $0xdec] ss:$48 sps:$4 sm:$0xff]  }
 0x28f   : > { %6690 = vmatpush1.bf16.msra.mxu1 %v11128_v6  ;;  %6648 = vmatprep.subr.bf16.mxu0 %v11133_v23  ;;  %v11197_v6 = vld [vmem:[%s12722_s2 + $0xe48] ss:$48 sps:$4 sm:$0xff]   ;;  %v11200_v23 = vld [vmem:[%s12722_s2 + $0x250] ss:$48 sps:$4 sm:$0xff]  }
 0x290   : > { %6691 = vmatprep.subr.bf16.mxu1 %v11136_v7 }
 0x292   : > { %6649 = vmatpush1.bf16.msra.mxu0 %v11131_v8 }
 0x293   : > { %6692 = vmatpush1.bf16.msra.mxu1 %v11134_v9  ;;  %6650 = vmatprep.subr.bf16.mxu0 %v11139_v11  ;;  %v13324_v9 = vld [vmem:[%s12695_s1] ss:$24 sps:$4 sm:$0xff]  }
 0x294   : > { %6693 = vmatprep.subr.bf16.mxu1 %v11142_v12 }
 0x296   : > { %6651 = vmatpush1.bf16.msra.mxu0 %v11137_v16 }
 0x297   : > { %6694 = vmatpush1.bf16.msra.mxu1 %v11140_v19  ;;  %6652 = vmatprep.subr.bf16.mxu0 %v11145_v20  ;;  %v11208_v19 = vld [vmem:[%s12722_s2 + $0x1f4] ss:$48 sps:$4 sm:$0xff]  }
 0x298   : > { %6695 = vmatprep.subr.bf16.mxu1 %v11148_v22 }
 0x29a   : > { %6653 = vmatpush2.bf16.msra.mxu0 %v11143_v24  ;;  %v11203_v24 = vld [vmem:[%s12722_s2 + $0xde8] ss:$48 sps:$4 sm:$0xff]  }
 0x29b   : > { %6696 = vmatpush2.bf16.msra.mxu1 %v11146_v25  ;;  %6654 = vmatprep.subr.bf16.mxu0 %v11151_v26  ;;  %v11206_v25 = vld [vmem:[%s12722_s2 + $0x1f0] ss:$48 sps:$4 sm:$0xff]  }
 0x29c   : > { %6697 = vmatprep.subr.bf16.mxu1 %v11154_v27  ;;  %v13335_v26 = vld [vmem:[%s12695_s1 + $0x14] ss:$24 sps:$4 sm:$0xff]  }
 0x29e   : > { %6655 = vmatpush2.bf16.msra.mxu0 %v11149_v28 }
 0x29f   : > { %6698 = vmatpush2.bf16.msra.mxu1 %v11152_v30  ;;  %6656 = vmatprep.subr.bf16.mxu0 %v11157_v31  ;;  %v11211_v31 = vld [vmem:[%s12722_s2 + $0xd8c] ss:$48 sps:$4 sm:$0xff]  }
 0x2a0   : > { %6699 = vmatprep.subr.bf16.mxu1 %v11160_v32  ;;  %v11214_v32 = vld [vmem:[%s12722_s2 + $0x194] ss:$48 sps:$4 sm:$0xff]  }
 0x2a2   : > { %6657 = vmatpush2.bf16.msra.mxu0 %v11155_v33 }
 0x2a3   : > { %6700 = vmatpush2.bf16.msra.mxu1 %v11158_v34  ;;  %6658 = vmatprep.subr.bf16.mxu0 %v11163_v35  ;;  %v11212_v34 = vld [vmem:[%s12722_s2 + $0x190] ss:$48 sps:$4 sm:$0xff]   ;;  %v11217_v35 = vld [vmem:[%s12722_s2 + $0xd2c] ss:$48 sps:$4 sm:$0xff]  }
 0x2a4   : > { %6701 = vmatprep.subr.bf16.mxu1 %v11166_v36  ;;  %v11220_v36 = vld [vmem:[%s12722_s2 + $0x134] ss:$48 sps:$4 sm:$0xff]  }
 0x2a6   : > { %6659 = vmatpush2.bf16.msra.mxu0 %v11161_v37  ;;  %v11215_v37 = vld [vmem:[%s12722_s2 + $0xd28] ss:$48 sps:$4 sm:$0xff]  }
 0x2a7   : > { %6702 = vmatpush2.bf16.msra.mxu1 %v11164_v39  ;;  %6660 = vmatprep.subr.bf16.mxu0 %v11169_v40  ;;  %v11218_v39 = vld [vmem:[%s12722_s2 + $0x130] ss:$48 sps:$4 sm:$0xff]   ;;  %v11223_v40 = vld [vmem:[%s12722_s2 + $0xccc] ss:$48 sps:$4 sm:$0xff]  }
 0x2a8   : > { %6703 = vmatprep.subr.bf16.mxu1 %v11172_v41  ;;  %v11226_v41 = vld [vmem:[%s12722_s2 + $0xd4] ss:$48 sps:$4 sm:$0xff]  }
 0x2aa   : > { %6661 = vmatpush2.bf16.msra.mxu0 %v11167_v44  ;;  %v11221_v44 = vld [vmem:[%s12722_s2 + $0xcc8] ss:$48 sps:$4 sm:$0xff]  }
 0x2ab   : > { %6704 = vmatpush2.bf16.msra.mxu1 %v11170_v45  ;;  %6662 = vmatprep.subr.bf16.mxu0 %v11175_v47  ;;  %v11224_v45 = vld [vmem:[%s12722_s2 + $0xd0] ss:$48 sps:$4 sm:$0xff]   ;;  %v11229_v47 = vld [vmem:[%s12722_s2 + $0xc6c] ss:$48 sps:$4 sm:$0xff]  }
 0x2ac   : > { %6705 = vmatprep.subr.bf16.mxu1 %v11178_v48  ;;  %v11232_v48 = vld [vmem:[%s12722_s2 + $0x74] ss:$48 sps:$4 sm:$0xff]  }
 0x2ae   : > { %6663 = vmatpush2.bf16.msra.mxu0 %v11173_v14  ;;  %v11227_v14 = vld [vmem:[%s12722_s2 + $0xc68] ss:$48 sps:$4 sm:$0xff]  }
 0x2af   : > { %6706 = vmatpush2.bf16.msra.mxu1 %v11176_v49  ;;  %6664 = vmatprep.subr.bf16.mxu0 %v11181_v62  ;;  %v11230_v49 = vld [vmem:[%s12722_s2 + $0x70] ss:$48 sps:$4 sm:$0xff]   ;;  %v11235_v62 = vld [vmem:[%s12722_s2 + $0xc0c] ss:$48 sps:$4 sm:$0xff]  }
 0x2b0   : > { %6707 = vmatprep.subr.bf16.mxu1 %v11184_v3  ;;  %v11238_v3 = vld [vmem:[%s12722_s2 + $0x14] ss:$48 sps:$4 sm:$0xff]  }
 0x2b2   : > { %6665 = vmatpush2.bf16.msra.mxu0 %v11179_v51  ;;  %v11233_v51 = vld [vmem:[%s12722_s2 + $0xc08] ss:$48 sps:$4 sm:$0xff]  }
 0x2b3   : > { %6708 = vmatpush2.bf16.msra.mxu1 %v11182_v17  ;;  %6666 = vmatprep.subr.bf16.mxu0 %v11187_v53  ;;  %v11236_v17 = vld [vmem:[%s12722_s2 + $0x10] ss:$48 sps:$4 sm:$0xff]   ;;  %v11241_v53 = vld [vmem:[%s12722_s2 + $0x11ac] ss:$48 sps:$4 sm:$0xff]  }
 0x2b4   : > { %6709 = vmatprep.subr.bf16.mxu1 %v11190_v55  ;;  %v11244_v55 = vld [vmem:[%s12722_s2 + $0x5b4] ss:$48 sps:$4 sm:$0xff]  }
 0x2b6   : > { %6667 = vmatpush2.bf16.msra.mxu0 %v11185_v56  ;;  %v11239_v56 = vld [vmem:[%s12722_s2 + $0x11a8] ss:$48 sps:$4 sm:$0xff]  }
 0x2b7   : > { %6710 = vmatpush2.bf16.msra.mxu1 %v11188_v57  ;;  %6722 = vmatprep.subr.bf16.mxu0 %v11193_v10  ;;  %v11242_v57 = vld [vmem:[%s12722_s2 + $0x5b0] ss:$48 sps:$4 sm:$0xff]   ;;  %v11247_v10 = vld [vmem:[%s12722_s2 + $0x114c] ss:$48 sps:$4 sm:$0xff]  }
 0x2b8   : > { %6765 = vmatprep.subr.bf16.mxu1 %v11196_v59  ;;  %v11250_v59 = vld [vmem:[%s12722_s2 + $0x554] ss:$48 sps:$4 sm:$0xff]  }
 0x2b9   : > { %v2868_v7 = vpop.f32.mrf.mxu0  ;;  %6669 = vmatmul.mubr.bf16.vlgmr.msra.gmra.mxu0 %v13324_v9 }
 0x2ba   : > { %v2909_v8 = vpop.f32.mrf.mxu1  ;;  %6712 = vmatmul.mubr.bf16.vlgmr.msra.gmra.mxu1 %v13219_v1  ;;  %v2869_v11 = vadd.f32 %v2868_v7, %v2577_v0  ;;  %6723 = vmatpush1.bf16.msra.mxu0 %v11191_v60  ;;  %v11245_v60 = vld [vmem:[%s12722_s2 + $0x1148] ss:$48 sps:$4 sm:$0xff]   ;;  %v11253_v0 = vld [vmem:[%s12722_s2 + $0x10ec] ss:$48 sps:$4 sm:$0xff]  }
 0x2bb   : > { %6766 = vmatpush1.bf16.msra.mxu1 %v11194_v13  ;;  %v2870_v12 = vpop.f32.mrf.mxu0  ;;  %6724 = vmatprep.subr.bf16.mxu0 %v11199_v2  ;;  %v11248_v13 = vld [vmem:[%s12722_s2 + $0x550] ss:$48 sps:$4 sm:$0xff]   ;;  %v11256_v2 = vld [vmem:[%s12722_s2 + $0x4f4] ss:$48 sps:$4 sm:$0xff]   ;;  %v11257_v7 = vld [vmem:[%s12722_s2 + $0x1088] ss:$48 sps:$4 sm:$0xff]  }
 0x2bc   : > { %v2911_v16 = vpop.f32.mrf.mxu1  ;;  %6767 = vmatprep.subr.bf16.mxu1 %v11202_v4  ;;  %v13330_v20 = vadd.f32 %v2909_v8, %v2869_v11  ;;  %v2871_v22 = vadd.f32 %v2870_v12, %v2581_v5  ;;  %6754 = vmatprep.mubr.bf16.mxu0 %v13335_v26  ;;  %v11251_v4 = vld [vmem:[%s12722_s2 + $0x10e8] ss:$48 sps:$4 sm:$0xff]   ;;  %v11254_v5 = vld [vmem:[%s12722_s2 + $0x4f0] ss:$48 sps:$4 sm:$0xff]   ;;  %v11265_v11 = vld [vmem:[%s12722_s2 + $0x102c] ss:$48 sps:$4 sm:$0xff]  }
 0x2bd   : > { %6797 = vmatprep.mubr.bf16.mxu1 %v13247_v52  ;;  %v2872_v27 = vpop.f32.mrf.mxu0  ;;  %v11209_v52 = vld [vmem:[%s12722_s2 + $0xd88] ss:$48 sps:$4 sm:$0xff]   ;;  %v11260_v8 = vld [vmem:[%s12722_s2 + $0x490] ss:$48 sps:$4 sm:$0xff]   ;;  %v11268_v12 = vld [vmem:[%s12722_s2 + $0x434] ss:$48 sps:$4 sm:$0xff]  }
 0x2be   : > { %v2913_v1 = vpop.f32.mrf.mxu1  ;;  %v13339_v28 = vadd.f32 %v2911_v16, %v2871_v22  ;;  %6725 = vmatpush1.bf16.msra.mxu0 %v11197_v6  ;;  %v11259_v6 = vld [vmem:[%s12722_s2 + $0x108c] ss:$48 sps:$4 sm:$0xff]   ;;  %v11263_v16 = vld [vmem:[%s12722_s2 + $0x1028] ss:$48 sps:$4 sm:$0xff]   ;;  %v11274_v22 = vld [vmem:[%s12722_s2 + $0x3d4] ss:$48 sps:$4 sm:$0xff]  }
 0x2bf   : > { %6768 = vmatpush1.bf16.msra.mxu1 %v11200_v23  ;;  %6726 = vmatprep.subr.bf16.mxu0 %v11205_v29  ;;  %v2873_v33 = vpop.f32.mrf.mxu0  ;;  %v11262_v23 = vld [vmem:[%s12722_s2 + $0x494] ss:$48 sps:$4 sm:$0xff]   ;;  %v11266_v29 = vld [vmem:[%s12722_s2 + $0x430] ss:$48 sps:$4 sm:$0xff]   ;;  %v11277_v1 = vld [vmem:[%s12722_s2 + $0xf6c] ss:$48 sps:$4 sm:$0xff]  }
 0x2c0   : > { %v2914_v30 = vpop.f32.mrf.mxu1  ;;  %6769 = vmatprep.subr.bf16.mxu1 %v11208_v19  ;;  %v11271_v19 = vld [vmem:[%s12722_s2 + $0xfcc] ss:$48 sps:$4 sm:$0xff]   ;;  %v11280_v27 = vld [vmem:[%s12722_s2 + $0x374] ss:$48 sps:$4 sm:$0xff]  }
 0x2c1   : > { %v11275_v30 = vld [vmem:[%s12722_s2 + $0xf68] ss:$48 sps:$4 sm:$0xff]   ;;  %v11286_v33 = vld [vmem:[%s12722_s2 + $0x314] ss:$48 sps:$4 sm:$0xff]  }
 0x2c2   : > { %6727 = vmatpush1.bf16.msra.mxu0 %v11203_v24  ;;  %v11269_v24 = vld [vmem:[%s12722_s2 + $0xfc8] ss:$48 sps:$4 sm:$0xff]  }
 0x2c3   : > { %6770 = vmatpush1.bf16.msra.mxu1 %v11206_v25  ;;  %6728 = vmatprep.subr.bf16.mxu0 %v11211_v31  ;;  %v11272_v25 = vld [vmem:[%s12722_s2 + $0x3d0] ss:$48 sps:$4 sm:$0xff]  }
 0x2c4   : > { %6771 = vmatprep.subr.bf16.mxu1 %v11214_v32  ;;  %v11278_v31 = vld [vmem:[%s12722_s2 + $0x370] ss:$48 sps:$4 sm:$0xff]   ;;  %v11283_v32 = vld [vmem:[%s12722_s2 + $0xf0c] ss:$48 sps:$4 sm:$0xff]  }
 0x2c6   : > { %6729 = vmatpush1.bf16.msra.mxu0 %v11209_v52  ;;  %v11281_v52 = vld [vmem:[%s12722_s2 + $0xf08] ss:$48 sps:$4 sm:$0xff]  }
 0x2c7   : > { %6772 = vmatpush1.bf16.msra.mxu1 %v11212_v34  ;;  %6730 = vmatprep.subr.bf16.mxu0 %v11217_v35  ;;  %v11284_v34 = vld [vmem:[%s12722_s2 + $0x310] ss:$48 sps:$4 sm:$0xff]   ;;  %v11289_v35 = vld [vmem:[%s12722_s2 + $0x8b4] ss:$48 sps:$4 sm:$0xff]  }
 0x2c8   : > { %6773 = vmatprep.subr.bf16.mxu1 %v11220_v36  ;;  %v11292_v36 = vld [vmem:[%s12722_s2 + $0xeb4] ss:$48 sps:$4 sm:$0xff]  }
 0x2ca   : > { %6731 = vmatpush1.bf16.msra.mxu0 %v11215_v37  ;;  %v11287_v37 = vld [vmem:[%s12722_s2 + $0x8b0] ss:$48 sps:$4 sm:$0xff]  }
 0x2cb   : > { %6774 = vmatpush1.bf16.msra.mxu1 %v11218_v39  ;;  %6732 = vmatprep.subr.bf16.mxu0 %v11223_v40  ;;  %v11290_v39 = vld [vmem:[%s12722_s2 + $0xeb0] ss:$48 sps:$4 sm:$0xff]   ;;  %v11295_v40 = vld [vmem:[%s12722_s2 + $0x854] ss:$48 sps:$4 sm:$0xff]  }
 0x2cc   : > { %6775 = vmatprep.subr.bf16.mxu1 %v11226_v41  ;;  %v11298_v41 = vld [vmem:[%s12722_s2 + $0xe54] ss:$48 sps:$4 sm:$0xff]  }
 0x2ce   : > { %6733 = vmatpush1.bf16.msra.mxu0 %v11221_v44  ;;  %v11293_v44 = vld [vmem:[%s12722_s2 + $0x850] ss:$48 sps:$4 sm:$0xff]  }
 0x2cf   : > { %6776 = vmatpush1.bf16.msra.mxu1 %v11224_v45  ;;  %6734 = vmatprep.subr.bf16.mxu0 %v11229_v47  ;;  %v11296_v45 = vld [vmem:[%s12722_s2 + $0xe50] ss:$48 sps:$4 sm:$0xff]  }
 0x2d0   : > { %6777 = vmatprep.subr.bf16.mxu1 %v11232_v48  ;;  %v13402_v48 = vld [vmem:[%s12695_s1 + $0x10] ss:$24 sps:$4 sm:$0xff]  }
 0x2d2   : > { %6735 = vmatpush1.bf16.msra.mxu0 %v11227_v14 }
 0x2d3   : > { %6778 = vmatpush1.bf16.msra.mxu1 %v11230_v49  ;;  %6736 = vmatprep.subr.bf16.mxu0 %v11235_v62  ;;  %v11301_v62 = vld [vmem:[%s12722_s2 + $0x7f4] ss:$48 sps:$4 sm:$0xff]  }
 0x2d4   : > { %6779 = vmatprep.subr.bf16.mxu1 %v11238_v3  ;;  %v11304_v3 = vld [vmem:[%s12722_s2 + $0xdf4] ss:$48 sps:$4 sm:$0xff]  }
 0x2d6   : > { %6737 = vmatpush1.bf16.msra.mxu0 %v11233_v51 }
 0x2d7   : > { %6780 = vmatpush1.bf16.msra.mxu1 %v11236_v17  ;;  %6738 = vmatprep.subr.bf16.mxu0 %v11241_v53  ;;  %v11299_v17 = vld [vmem:[%s12722_s2 + $0x7f0] ss:$48 sps:$4 sm:$0xff]  }
 0x2d8   : > { %6781 = vmatprep.subr.bf16.mxu1 %v11244_v55  ;;  %v11302_v53 = vld [vmem:[%s12722_s2 + $0xdf0] ss:$48 sps:$4 sm:$0xff]   ;;  %v11310_v55 = vld [vmem:[%s12722_s2 + $0xd94] ss:$48 sps:$4 sm:$0xff]  }
 0x2da   : > { %6739 = vmatpush2.bf16.msra.mxu0 %v11239_v56 }
 0x2db   : > { %6782 = vmatpush2.bf16.msra.mxu1 %v11242_v57  ;;  %6740 = vmatprep.subr.bf16.mxu0 %v11247_v10  ;;  %v11305_v57 = vld [vmem:[%s12722_s2 + $0x790] ss:$48 sps:$4 sm:$0xff]  }
 0x2dc   : > { %6783 = vmatprep.subr.bf16.mxu1 %v11250_v59  ;;  %v11308_v10 = vld [vmem:[%s12722_s2 + $0xd90] ss:$48 sps:$4 sm:$0xff]   ;;  %v11316_v59 = vld [vmem:[%s12722_s2 + $0xd34] ss:$48 sps:$4 sm:$0xff]  }
 0x2de   : > { %6741 = vmatpush2.bf16.msra.mxu0 %v11245_v60  ;;  %v11311_v60 = vld [vmem:[%s12722_s2 + $0x730] ss:$48 sps:$4 sm:$0xff]  }
 0x2df   : > { %6784 = vmatpush2.bf16.msra.mxu1 %v11248_v13  ;;  %6742 = vmatprep.subr.bf16.mxu0 %v11253_v0  ;;  %v11314_v13 = vld [vmem:[%s12722_s2 + $0xd30] ss:$48 sps:$4 sm:$0xff]   ;;  %v11319_v0 = vld [vmem:[%s12722_s2 + $0x6d4] ss:$48 sps:$4 sm:$0xff]  }
 0x2e0   : > { %6785 = vmatprep.subr.bf16.mxu1 %v11256_v2  ;;  %v11322_v2 = vld [vmem:[%s12722_s2 + $0xcd4] ss:$48 sps:$4 sm:$0xff]  }
 0x2e2   : > { %6743 = vmatpush2.bf16.msra.mxu0 %v11251_v4  ;;  %v11317_v4 = vld [vmem:[%s12722_s2 + $0x6d0] ss:$48 sps:$4 sm:$0xff]  }
 0x2e3   : > { %6786 = vmatpush2.bf16.msra.mxu1 %v11254_v5  ;;  %6744 = vmatprep.subr.bf16.mxu0 %v11259_v6  ;;  %v11320_v5 = vld [vmem:[%s12722_s2 + $0xcd0] ss:$48 sps:$4 sm:$0xff]   ;;  %v11325_v6 = vld [vmem:[%s12722_s2 + $0x674] ss:$48 sps:$4 sm:$0xff]  }
 0x2e4   : > { %6787 = vmatprep.subr.bf16.mxu1 %v11262_v23  ;;  %v11328_v23 = vld [vmem:[%s12722_s2 + $0xc74] ss:$48 sps:$4 sm:$0xff]  }
 0x2e6   : > { %6745 = vmatpush2.bf16.msra.mxu0 %v11257_v7  ;;  %v11323_v7 = vld [vmem:[%s12722_s2 + $0x670] ss:$48 sps:$4 sm:$0xff]  }
 0x2e7   : > { %6788 = vmatpush2.bf16.msra.mxu1 %v11260_v8  ;;  %6746 = vmatprep.subr.bf16.mxu0 %v11265_v11  ;;  %v11326_v8 = vld [vmem:[%s12722_s2 + $0xc70] ss:$48 sps:$4 sm:$0xff]   ;;  %v11331_v11 = vld [vmem:[%s12722_s2 + $0x614] ss:$48 sps:$4 sm:$0xff]  }
 0x2e8   : > { %6789 = vmatprep.subr.bf16.mxu1 %v11268_v12  ;;  %v11334_v12 = vld [vmem:[%s12722_s2 + $0xc14] ss:$48 sps:$4 sm:$0xff]  }
 0x2ea   : > { %6747 = vmatpush2.bf16.msra.mxu0 %v11263_v16  ;;  %v11329_v16 = vld [vmem:[%s12722_s2 + $0x610] ss:$48 sps:$4 sm:$0xff]  }
 0x2eb   : > { %6790 = vmatpush2.bf16.msra.mxu1 %v11266_v29  ;;  %6748 = vmatprep.subr.bf16.mxu0 %v11271_v19  ;;  %v11332_v29 = vld [vmem:[%s12722_s2 + $0xc10] ss:$48 sps:$4 sm:$0xff]   ;;  %v11337_v19 = vld [vmem:[%s12722_s2 + $0xbb4] ss:$48 sps:$4 sm:$0xff]  }
 0x2ec   : > { %6791 = vmatprep.subr.bf16.mxu1 %v11274_v22  ;;  %v11340_v22 = vld [vmem:[%s12722_s2 + $0x11b4] ss:$48 sps:$4 sm:$0xff]  }
 0x2ee   : > { %6749 = vmatpush2.bf16.msra.mxu0 %v11269_v24  ;;  %v11335_v24 = vld [vmem:[%s12722_s2 + $0xbb0] ss:$48 sps:$4 sm:$0xff]  }
 0x2ef   : > { %6792 = vmatpush2.bf16.msra.mxu1 %v11272_v25  ;;  %6750 = vmatprep.subr.bf16.mxu0 %v11277_v1  ;;  %v11338_v25 = vld [vmem:[%s12722_s2 + $0x11b0] ss:$48 sps:$4 sm:$0xff]   ;;  %v11343_v1 = vld [vmem:[%s12722_s2 + $0xb54] ss:$48 sps:$4 sm:$0xff]  }
 0x2f0   : > { %6793 = vmatprep.subr.bf16.mxu1 %v11280_v27  ;;  %v11346_v27 = vld [vmem:[%s12722_s2 + $0x1154] ss:$48 sps:$4 sm:$0xff]  }
 0x2f2   : > { %6751 = vmatpush2.bf16.msra.mxu0 %v11275_v30  ;;  %v11341_v30 = vld [vmem:[%s12722_s2 + $0xb50] ss:$48 sps:$4 sm:$0xff]  }
 0x2f3   : > { %6794 = vmatpush2.bf16.msra.mxu1 %v11278_v31  ;;  %6752 = vmatprep.subr.bf16.mxu0 %v11283_v32  ;;  %v11344_v31 = vld [vmem:[%s12722_s2 + $0x1150] ss:$48 sps:$4 sm:$0xff]   ;;  %v11349_v32 = vld [vmem:[%s12722_s2 + $0xaf4] ss:$48 sps:$4 sm:$0xff]  }
 0x2f4   : > { %6795 = vmatprep.subr.bf16.mxu1 %v11286_v33  ;;  %v11352_v33 = vld [vmem:[%s12722_s2 + $0x10f4] ss:$48 sps:$4 sm:$0xff]  }
 0x2f6   : > { %6753 = vmatpush2.bf16.msra.mxu0 %v11281_v52  ;;  %v11347_v52 = vld [vmem:[%s12722_s2 + $0xaf0] ss:$48 sps:$4 sm:$0xff]  }
 0x2f7   : > { %6796 = vmatpush2.bf16.msra.mxu1 %v11284_v34  ;;  %6808 = vmatprep.subr.bf16.mxu0 %v11289_v35  ;;  %v11350_v34 = vld [vmem:[%s12722_s2 + $0x10f0] ss:$48 sps:$4 sm:$0xff]   ;;  %v11355_v35 = vld [vmem:[%s12722_s2 + $0xa94] ss:$48 sps:$4 sm:$0xff]  }
 0x2f8   : > { %6851 = vmatprep.subr.bf16.mxu1 %v11292_v36  ;;  %v11358_v36 = vld [vmem:[%s12722_s2 + $0x1094] ss:$48 sps:$4 sm:$0xff]  }
 0x2f9   : > { %v2950_v47 = vpop.f32.mrf.mxu0  ;;  %6755 = vmatmul.mubr.bf16.vlgmr.msra.gmra.mxu0 %v13402_v48 }
 0x2fa   : > { %6798 = vmatmul.mubr.bf16.vlgmr.msra.gmra.mxu1 %v13324_v9  ;;  %v13407_v14 = vadd.f32 %v2950_v47, %v13330_v20  ;;  %6809 = vmatpush1.bf16.msra.mxu0 %v11287_v37  ;;  %v13417_v9 = vld [vmem:[%s12695_s1 + $0xc] ss:$24 sps:$4 sm:$0xff]  }
 0x2fb   : > { %6852 = vmatpush1.bf16.msra.mxu1 %v11290_v39  ;;  %v2952_v49 = vpop.f32.mrf.mxu0  ;;  %6810 = vmatprep.subr.bf16.mxu0 %v11295_v40  ;;  %v11353_v37 = vld [vmem:[%s12722_s2 + $0xa90] ss:$48 sps:$4 sm:$0xff]   ;;  %v11361_v40 = vld [vmem:[%s12722_s2 + $0xa34] ss:$48 sps:$4 sm:$0xff]  }
 0x2fc   : > { %6853 = vmatprep.subr.bf16.mxu1 %v11298_v41  ;;  %v13412_v51 = vadd.f32 %v2952_v49, %v13339_v28  ;;  %6840 = vmatprep.mubr.bf16.mxu0 %v13417_v9  ;;  %v11307_v28 = vld [vmem:[%s12722_s2 + $0x794] ss:$48 sps:$4 sm:$0xff]   ;;  %v11356_v39 = vld [vmem:[%s12722_s2 + $0x1090] ss:$48 sps:$4 sm:$0xff]  }
 0x2fd   : > { %6883 = vmatprep.mubr.bf16.mxu1 %v13335_v26  ;;  %v2954_v20 = vpop.f32.mrf.mxu0  ;;  %v11313_v26 = vld [vmem:[%s12722_s2 + $0x734] ss:$48 sps:$4 sm:$0xff]  }
 0x2fe   : > { %6811 = vmatpush1.bf16.msra.mxu0 %v11293_v44  ;;  %v11364_v41 = vld [vmem:[%s12722_s2 + $0x1034] ss:$48 sps:$4 sm:$0xff]   ;;  %v11359_v44 = vld [vmem:[%s12722_s2 + $0xa30] ss:$48 sps:$4 sm:$0xff]  }
 0x2ff   : > { %6854 = vmatpush1.bf16.msra.mxu1 %v11296_v45  ;;  %6812 = vmatprep.subr.bf16.mxu0 %v11301_v62  ;;  %v2955_v56 = vpop.f32.mrf.mxu0  ;;  %v11362_v45 = vld [vmem:[%s12722_s2 + $0x1030] ss:$48 sps:$4 sm:$0xff]   ;;  %v11367_v47 = vld [vmem:[%s12722_s2 + $0x9d4] ss:$48 sps:$4 sm:$0xff]  }
 0x300   : > { %6855 = vmatprep.subr.bf16.mxu1 %v11304_v3  ;;  %v11370_v49 = vld [vmem:[%s12722_s2 + $0xfd4] ss:$48 sps:$4 sm:$0xff]   ;;  %v11365_v62 = vld [vmem:[%s12722_s2 + $0x9d0] ss:$48 sps:$4 sm:$0xff]  }
 0x301   : > { %v11368_v3 = vld [vmem:[%s12722_s2 + $0xfd0] ss:$48 sps:$4 sm:$0xff]   ;;  %v11376_v20 = vld [vmem:[%s12722_s2 + $0xf74] ss:$48 sps:$4 sm:$0xff]  }
 0x302   : > { %6813 = vmatpush1.bf16.msra.mxu0 %v11299_v17  ;;  %v13465_v17 = vpop.f32.mrf.mxu1 }
 0x303   : > { %6856 = vmatpush1.bf16.msra.mxu1 %v11302_v53  ;;  %6814 = vmatprep.subr.bf16.mxu0 %v11307_v28  ;;  %v11373_v53 = vld [vmem:[%s12722_s2 + $0x974] ss:$48 sps:$4 sm:$0xff]   ;;  %v11371_v28 = vld [vmem:[%s12722_s2 + $0x970] ss:$48 sps:$4 sm:$0xff]  }
 0x304   : > { %6857 = vmatprep.subr.bf16.mxu1 %v11310_v55  ;;  %v11374_v55 = vld [vmem:[%s12722_s2 + $0xf70] ss:$48 sps:$4 sm:$0xff]   ;;  %v6543_v56 = vpop.f32.mrf.mxu1 }
 0x306   : > { %6815 = vmatpush1.bf16.msra.mxu0 %v11305_v57  ;;  %v11379_v57 = vld [vmem:[%s12722_s2 + $0x914] ss:$48 sps:$4 sm:$0xff]  }
 0x307   : > { %6858 = vmatpush1.bf16.msra.mxu1 %v11308_v10  ;;  %6816 = vmatprep.subr.bf16.mxu0 %v11313_v26  ;;  %v11382_v10 = vld [vmem:[%s12722_s2 + $0xf14] ss:$48 sps:$4 sm:$0xff]   ;;  %v11377_v26 = vld [vmem:[%s12722_s2 + $0x910] ss:$48 sps:$4 sm:$0xff]  }
 0x308   : > { %6859 = vmatprep.subr.bf16.mxu1 %v11316_v59  ;;  %v11380_v59 = vld [vmem:[%s12722_s2 + $0xf10] ss:$48 sps:$4 sm:$0xff]  }
 0x30a   : > { %6817 = vmatpush1.bf16.msra.mxu0 %v11311_v60  ;;  %v13476_v60 = vld [vmem:[%s12724_s20] sm:$0xff] }
 0x30b   : > { %6860 = vmatpush1.bf16.msra.mxu1 %v11314_v13  ;;  %6818 = vmatprep.subr.bf16.mxu0 %v11319_v0  ;;  %v13478_v13 = vpop.f32.mrf.mxu1  ;;  %v11385_v0 = vld [vmem:[%s12722_s2 + $0x2bc] ss:$48 sps:$4 sm:$0xff]  }
 0x30c   : > { %6861 = vmatprep.subr.bf16.mxu1 %v11322_v2  ;;  %v11388_v2 = vld [vmem:[%s12722_s2 + $0x8bc] ss:$48 sps:$4 sm:$0xff]  }
 0x30e   : > { %6819 = vmatpush1.bf16.msra.mxu0 %v11317_v4  ;;  %v3544_v4 = vrot.slane %v13476_v60, %v13057_v46 }
 0x30f   : > { %6862 = vmatpush1.bf16.msra.mxu1 %v11320_v5  ;;  %6820 = vmatprep.subr.bf16.mxu0 %v11325_v6  ;;  %v11383_v5 = vld [vmem:[%s12722_s2 + $0x2b8] ss:$48 sps:$4 sm:$0xff]  }
 0x310   : > { %6863 = vmatprep.subr.bf16.mxu1 %v11328_v23  ;;  %v11386_v6 = vld [vmem:[%s12722_s2 + $0x8b8] ss:$48 sps:$4 sm:$0xff]   ;;  %v6547_v23 = vpop.f32.mrf.mxu1 }
 0x312   : > { %6821 = vmatpush1.bf16.msra.mxu0 %v11323_v7  ;;  %v11391_v7 = vld [vmem:[%s12722_s2 + $0x25c] ss:$48 sps:$4 sm:$0xff]  }
 0x313   : > { %6864 = vmatpush1.bf16.msra.mxu1 %v11326_v8  ;;  %6822 = vmatprep.subr.bf16.mxu0 %v11331_v11  ;;  %v11394_v8 = vld [vmem:[%s12722_s2 + $0x85c] ss:$48 sps:$4 sm:$0xff]  }
 0x314   : > { %6865 = vmatprep.subr.bf16.mxu1 %v11334_v12 }
 0x316   : > { %6823 = vmatpush1.bf16.msra.mxu0 %v11329_v16  ;;  %v13493_v16 = vld [vmem:[%s12695_s1 + $0x8] ss:$24 sps:$4 sm:$0xff]  }
 0x317   : > { %6866 = vmatpush1.bf16.msra.mxu1 %v11332_v29  ;;  %6824 = vmatprep.subr.bf16.mxu0 %v11337_v19  ;;  %v6544_v29 = vadd.f32 %v6543_v56, %v3544_v4  ;;  %v11389_v19 = vld [vmem:[%s12722_s2 + $0x258] ss:$48 sps:$4 sm:$0xff]   ;;  %v11421_v56 = vld [vmem:[%s12722_s2 + $0x7c] ss:$48 sps:$4 sm:$0xff]  }
 0x318   : > { %6867 = vmatprep.subr.bf16.mxu1 %v11340_v22  ;;  %v11392_v22 = vld [vmem:[%s12722_s2 + $0x858] ss:$48 sps:$4 sm:$0xff]  }
 0x31a   : > { %6825 = vmatpush2.bf16.msra.mxu0 %v11335_v24 }
 0x31b   : > { %6868 = vmatpush2.bf16.msra.mxu1 %v11338_v25  ;;  %6826 = vmatprep.subr.bf16.mxu0 %v11343_v1  ;;  %v11397_v1 = vld [vmem:[%s12722_s2 + $0x1fc] ss:$48 sps:$4 sm:$0xff]  }
 0x31c   : > { %6869 = vmatprep.subr.bf16.mxu1 %v11346_v27  ;;  %v11400_v27 = vld [vmem:[%s12722_s2 + $0x7fc] ss:$48 sps:$4 sm:$0xff]  }
 0x31e   : > { %6827 = vmatpush2.bf16.msra.mxu0 %v11341_v30 }
 0x31f   : > { %6870 = vmatpush2.bf16.msra.mxu1 %v11344_v31  ;;  %6828 = vmatprep.subr.bf16.mxu0 %v11349_v32  ;;  %v13502_v31 = vld [vmem:[%s12695_s1 + $0x4] ss:$24 sps:$4 sm:$0xff]  }
 0x320   : > { %6871 = vmatprep.subr.bf16.mxu1 %v11352_v33  ;;  %v6548_v33 = vadd.f32 %v6547_v23, %v3544_v4  ;;  %v11428_v4 = vld [vmem:[%s12722_s2 + $0x618] ss:$48 sps:$4 sm:$0xff]  }
 0x321   : > { %v11431_v23 = vld [vmem:[%s12722_s2 + $0x5b8] ss:$48 sps:$4 sm:$0xff]  }
 0x322   : > { %6829 = vmatpush2.bf16.msra.mxu0 %v11347_v52 }
 0x323   : > { %6872 = vmatpush2.bf16.msra.mxu1 %v11350_v34  ;;  %6830 = vmatprep.subr.bf16.mxu0 %v11355_v35  ;;  %v11395_v34 = vld [vmem:[%s12722_s2 + $0x1f8] ss:$48 sps:$4 sm:$0xff]  }
 0x324   : > { %6873 = vmatprep.subr.bf16.mxu1 %v11358_v36  ;;  %v11398_v35 = vld [vmem:[%s12722_s2 + $0x7f8] ss:$48 sps:$4 sm:$0xff]  }
 0x326   : > { %6831 = vmatpush2.bf16.msra.mxu0 %v11353_v37  ;;  %v11406_v37 = vld [vmem:[%s12722_s2 + $0x79c] ss:$48 sps:$4 sm:$0xff]  }
 0x327   : > { %6874 = vmatpush2.bf16.msra.mxu1 %v11356_v39  ;;  %6832 = vmatprep.subr.bf16.mxu0 %v11361_v40 }
 0x328   : > { %6875 = vmatprep.subr.bf16.mxu1 %v11364_v41 }
 0x32a   : > { %6833 = vmatpush2.bf16.msra.mxu0 %v11359_v44  ;;  %v11401_v44 = vld [vmem:[%s12722_s2 + $0x198] ss:$48 sps:$4 sm:$0xff]  }
 0x32b   : > { %6876 = vmatpush2.bf16.msra.mxu1 %v11362_v45  ;;  %6834 = vmatprep.subr.bf16.mxu0 %v11367_v47  ;;  %v11404_v45 = vld [vmem:[%s12722_s2 + $0x798] ss:$48 sps:$4 sm:$0xff]   ;;  %v11409_v47 = vld [vmem:[%s12722_s2 + $0x13c] ss:$48 sps:$4 sm:$0xff]  }
 0x32c   : > { %6877 = vmatprep.subr.bf16.mxu1 %v11370_v49  ;;  %v11412_v49 = vld [vmem:[%s12722_s2 + $0x73c] ss:$48 sps:$4 sm:$0xff]  }
 0x32e   : > { %6835 = vmatpush2.bf16.msra.mxu0 %v11365_v62  ;;  %v11407_v62 = vld [vmem:[%s12722_s2 + $0x138] ss:$48 sps:$4 sm:$0xff]  }
 0x32f   : > { %6878 = vmatpush2.bf16.msra.mxu1 %v11368_v3  ;;  %6836 = vmatprep.subr.bf16.mxu0 %v11373_v53  ;;  %v11410_v3 = vld [vmem:[%s12722_s2 + $0x738] ss:$48 sps:$4 sm:$0xff]   ;;  %v11415_v53 = vld [vmem:[%s12722_s2 + $0xdc] ss:$48 sps:$4 sm:$0xff]  }
 0x330   : > { %6879 = vmatprep.subr.bf16.mxu1 %v11376_v20  ;;  %v11418_v20 = vld [vmem:[%s12722_s2 + $0x6dc] ss:$48 sps:$4 sm:$0xff]  }
 0x332   : > { %6837 = vmatpush2.bf16.msra.mxu0 %v11371_v28  ;;  %v11413_v28 = vld [vmem:[%s12722_s2 + $0xd8] ss:$48 sps:$4 sm:$0xff]  }
 0x333   : > { %6880 = vmatpush2.bf16.msra.mxu1 %v11374_v55  ;;  %6838 = vmatprep.subr.bf16.mxu0 %v11379_v57  ;;  %v11416_v55 = vld [vmem:[%s12722_s2 + $0x6d8] ss:$48 sps:$4 sm:$0xff]   ;;  %v11424_v57 = vld [vmem:[%s12722_s2 + $0x67c] ss:$48 sps:$4 sm:$0xff]  }
 0x334   : > { %6881 = vmatprep.subr.bf16.mxu1 %v11382_v10  ;;  %v11419_v10 = vld [vmem:[%s12722_s2 + $0x78] ss:$48 sps:$4 sm:$0xff]  }
 0x336   : > { %6839 = vmatpush2.bf16.msra.mxu0 %v11377_v26  ;;  %v11422_v26 = vld [vmem:[%s12722_s2 + $0x678] ss:$48 sps:$4 sm:$0xff]  }
 0x337   : > { %6882 = vmatpush2.bf16.msra.mxu1 %v11380_v59  ;;  %6894 = vmatprep.subr.bf16.mxu0 %v11385_v0  ;;  %v11427_v59 = vld [vmem:[%s12722_s2 + $0x1c] ss:$48 sps:$4 sm:$0xff]  }
 0x338   : > { %6937 = vmatprep.subr.bf16.mxu1 %v11388_v2  ;;  %v11430_v0 = vld [vmem:[%s12722_s2 + $0x61c] ss:$48 sps:$4 sm:$0xff]   ;;  %v11425_v2 = vld [vmem:[%s12722_s2 + $0x18] ss:$48 sps:$4 sm:$0xff]  }
 0x339   : > { %v13488_v11 = vpop.f32.mrf.mxu0  ;;  %6841 = vmatmul.mubr.bf16.vlgmr.msra.gmra.mxu0 %v13493_v16 }
 0x33a   : > { %v13490_v12 = vpop.f32.mrf.mxu1  ;;  %6884 = vmatmul.mubr.bf16.vlgmr.msra.gmra.mxu1 %v13402_v48  ;;  %6895 = vmatpush1.bf16.msra.mxu0 %v11383_v5  ;;  %v11433_v5 = vld [vmem:[%s12722_s2 + $0x5bc] ss:$48 sps:$4 sm:$0xff]  }
 0x33b   : > { %6938 = vmatpush1.bf16.msra.mxu1 %v11386_v6  ;;  %v6586_v24 = vpop.f32.mrf.mxu0  ;;  %6896 = vmatprep.subr.bf16.mxu0 %v11391_v7  ;;  %v11436_v6 = vld [vmem:[%s12722_s2 + $0xbbc] ss:$48 sps:$4 sm:$0xff]   ;;  %v11434_v7 = vld [vmem:[%s12722_s2 + $0xbb8] ss:$48 sps:$4 sm:$0xff]  }
 0x33c   : > { %v6629_v25 = vpop.f32.mrf.mxu1  ;;  %6939 = vmatprep.subr.bf16.mxu1 %v11394_v8  ;;  %v6587_v30 = vadd.f32 %v6586_v24, %v6544_v29  ;;  %6926 = vmatprep.mubr.bf16.mxu0 %v13502_v31  ;;  %v11439_v8 = vld [vmem:[%s12722_s2 + $0x55c] ss:$48 sps:$4 sm:$0xff]  }
 0x33d   : > { %6969 = vmatprep.mubr.bf16.mxu1 %v13417_v9  ;;  %v13506_v48 = vpop.f32.mrf.mxu0  ;;  %v11403_v9 = vld [vmem:[%s12722_s2 + $0x19c] ss:$48 sps:$4 sm:$0xff]  }
 0x33e   : > { %v13508_v32 = vpop.f32.mrf.mxu1  ;;  %v13510_v52 = vadd.f32 %v6629_v25, %v6587_v30  ;;  %6897 = vmatpush1.bf16.msra.mxu0 %v11389_v19  ;;  %v11442_v29 = vld [vmem:[%s12722_s2 + $0xb5c] ss:$48 sps:$4 sm:$0xff]   ;;  %v11437_v19 = vld [vmem:[%s12722_s2 + $0x558] ss:$48 sps:$4 sm:$0xff]  }
 0x33f   : > { %6940 = vmatpush1.bf16.msra.mxu1 %v11392_v22  ;;  %v6590_v36 = vpop.f32.mrf.mxu0  ;;  %6898 = vmatprep.subr.bf16.mxu0 %v11397_v1  ;;  %v11440_v22 = vld [vmem:[%s12722_s2 + $0xb58] ss:$48 sps:$4 sm:$0xff]   ;;  %v11445_v24 = vld [vmem:[%s12722_s2 + $0x4fc] ss:$48 sps:$4 sm:$0xff]  }
 0x340   : > { %6941 = vmatprep.subr.bf16.mxu1 %v11400_v27  ;;  %v6591_v39 = vadd.f32 %v6590_v36, %v6548_v33  ;;  %v6633_v40 = vpop.f32.mrf.mxu1  ;;  %v11448_v25 = vld [vmem:[%s12722_s2 + $0xafc] ss:$48 sps:$4 sm:$0xff]   ;;  %v11443_v1 = vld [vmem:[%s12722_s2 + $0x4f8] ss:$48 sps:$4 sm:$0xff]  }
 0x341   : > { %v11446_v27 = vld [vmem:[%s12722_s2 + $0xaf8] ss:$48 sps:$4 sm:$0xff]   ;;  %v11451_v30 = vld [vmem:[%s12722_s2 + $0x49c] ss:$48 sps:$4 sm:$0xff]  }
 0x342   : > { %v13516_v41 = vadd.f32 %v6633_v40, %v6591_v39  ;;  %6899 = vmatpush1.bf16.msra.mxu0 %v11395_v34  ;;  %v11454_v33 = vld [vmem:[%s12722_s2 + $0xa9c] ss:$48 sps:$4 sm:$0xff]   ;;  %v11449_v34 = vld [vmem:[%s12722_s2 + $0x498] ss:$48 sps:$4 sm:$0xff]  }
 0x343   : > { %6942 = vmatpush1.bf16.msra.mxu1 %v11398_v35  ;;  %6900 = vmatprep.subr.bf16.mxu0 %v11403_v9  ;;  %v11452_v35 = vld [vmem:[%s12722_s2 + $0xa98] ss:$48 sps:$4 sm:$0xff]   ;;  %v11457_v36 = vld [vmem:[%s12722_s2 + $0x43c] ss:$48 sps:$4 sm:$0xff]  }
 0x344   : > { %6943 = vmatprep.subr.bf16.mxu1 %v11406_v37  ;;  %v11460_v9 = vld [vmem:[%s12722_s2 + $0xa3c] ss:$48 sps:$4 sm:$0xff]   ;;  %v11455_v37 = vld [vmem:[%s12722_s2 + $0x438] ss:$48 sps:$4 sm:$0xff]  }
 0x345   : > { %v11458_v39 = vld [vmem:[%s12722_s2 + $0xa38] ss:$48 sps:$4 sm:$0xff]   ;;  %v11463_v40 = vld [vmem:[%s12722_s2 + $0x3dc] ss:$48 sps:$4 sm:$0xff]  }
 0x346   : > { %6901 = vmatpush1.bf16.msra.mxu0 %v11401_v44  ;;  %v11466_v44 = vld [vmem:[%s12722_s2 + $0x9dc] ss:$48 sps:$4 sm:$0xff]  }
 0x347   : > { %6944 = vmatpush1.bf16.msra.mxu1 %v11404_v45  ;;  %6902 = vmatprep.subr.bf16.mxu0 %v11409_v47  ;;  %v11461_v45 = vld [vmem:[%s12722_s2 + $0x3d8] ss:$48 sps:$4 sm:$0xff]  }
 0x348   : > { %6945 = vmatprep.subr.bf16.mxu1 %v11412_v49  ;;  %v11464_v47 = vld [vmem:[%s12722_s2 + $0x9d8] ss:$48 sps:$4 sm:$0xff]   ;;  %v11469_v49 = vld [vmem:[%s12722_s2 + $0x37c] ss:$48 sps:$4 sm:$0xff]  }
 0x34a   : > { %6903 = vmatpush1.bf16.msra.mxu0 %v11407_v62  ;;  %v11472_v62 = vld [vmem:[%s12722_s2 + $0x97c] ss:$48 sps:$4 sm:$0xff]  }
 0x34b   : > { %6946 = vmatpush1.bf16.msra.mxu1 %v11410_v3  ;;  %6904 = vmatprep.subr.bf16.mxu0 %v11415_v53  ;;  %v11467_v3 = vld [vmem:[%s12722_s2 + $0x378] ss:$48 sps:$4 sm:$0xff]  }
 0x34c   : > { %6947 = vmatprep.subr.bf16.mxu1 %v11418_v20  ;;  %v11470_v53 = vld [vmem:[%s12722_s2 + $0x978] ss:$48 sps:$4 sm:$0xff]   ;;  %v11475_v20 = vld [vmem:[%s12722_s2 + $0x31c] ss:$48 sps:$4 sm:$0xff]  }
 0x34e   : > { %6905 = vmatpush1.bf16.msra.mxu0 %v11413_v28  ;;  %v11478_v28 = vld [vmem:[%s12722_s2 + $0x91c] ss:$48 sps:$4 sm:$0xff]  }
 0x34f   : > { %6948 = vmatpush1.bf16.msra.mxu1 %v11416_v55  ;;  %6906 = vmatprep.subr.bf16.mxu0 %v11421_v56  ;;  %v11473_v55 = vld [vmem:[%s12722_s2 + $0x318] ss:$48 sps:$4 sm:$0xff]  }
 0x350   : > { %6949 = vmatprep.subr.bf16.mxu1 %v11424_v57  ;;  %v11476_v56 = vld [vmem:[%s12722_s2 + $0x918] ss:$48 sps:$4 sm:$0xff]   ;;  %v11481_v57 = vld [vmem:[%s12722_s2 + $0xebc] ss:$48 sps:$4 sm:$0xff]  }
 0x352   : > { %6907 = vmatpush1.bf16.msra.mxu0 %v11419_v10  ;;  %v11484_v10 = vld [vmem:[%s12722_s2 + $0x2c4] ss:$48 sps:$4 sm:$0xff]  }
 0x353   : > { %6950 = vmatpush1.bf16.msra.mxu1 %v11422_v26  ;;  %6908 = vmatprep.subr.bf16.mxu0 %v11427_v59  ;;  %v3548_v26 = vrot.slane %v13476_v60, %v13211_v63  ;;  %v11479_v59 = vld [vmem:[%s12722_s2 + $0xeb8] ss:$48 sps:$4 sm:$0xff]  }
 0x354   : > { %6951 = vmatprep.subr.bf16.mxu1 %v11430_v0  ;;  %v11482_v0 = vld [vmem:[%s12722_s2 + $0x2c0] ss:$48 sps:$4 sm:$0xff]  }
 0x356   : > { %6909 = vmatpush1.bf16.msra.mxu0 %v11425_v2  ;;  %v11487_v2 = vld [vmem:[%s12722_s2 + $0xe5c] ss:$48 sps:$4 sm:$0xff]  }
 0x357   : > { %6952 = vmatpush1.bf16.msra.mxu1 %v11428_v4  ;;  %6910 = vmatprep.subr.bf16.mxu0 %v11433_v5  ;;  %v11490_v4 = vld [vmem:[%s12722_s2 + $0x264] ss:$48 sps:$4 sm:$0xff]   ;;  %v3552_v5 = vrot.slane %v13476_v60, %v13214_v61 }
 0x358   : > { %6953 = vmatprep.subr.bf16.mxu1 %v11436_v6 }
 0x35a   : > { %6911 = vmatpush2.bf16.msra.mxu0 %v11431_v23 }
 0x35b   : > { %6954 = vmatpush2.bf16.msra.mxu1 %v11434_v7  ;;  %6912 = vmatprep.subr.bf16.mxu0 %v11439_v8  ;;  %v13579_v7 = vld [vmem:[%s12695_s1] ss:$24 sps:$4 sm:$0xff]  }
 0x35c   : > { %6955 = vmatprep.subr.bf16.mxu1 %v11442_v29  ;;  %v11485_v29 = vld [vmem:[%s12722_s2 + $0xe58] ss:$48 sps:$4 sm:$0xff]  }
 0x35e   : > { %6913 = vmatpush2.bf16.msra.mxu0 %v11437_v19  ;;  %v11488_v19 = vld [vmem:[%s12722_s2 + $0x260] ss:$48 sps:$4 sm:$0xff]  }
 0x35f   : > { %6956 = vmatpush2.bf16.msra.mxu1 %v11440_v22  ;;  %6914 = vmatprep.subr.bf16.mxu0 %v11445_v24 }
 0x360   : > { %6957 = vmatprep.subr.bf16.mxu1 %v11448_v25  ;;  %v11493_v25 = vld [vmem:[%s12722_s2 + $0xdfc] ss:$48 sps:$4 sm:$0xff]  }
 0x362   : > { %6915 = vmatpush2.bf16.msra.mxu0 %v11443_v1  ;;  %v11496_v1 = vld [vmem:[%s12722_s2 + $0x204] ss:$48 sps:$4 sm:$0xff]  }
 0x363   : > { %6958 = vmatpush2.bf16.msra.mxu1 %v11446_v27  ;;  %6916 = vmatprep.subr.bf16.mxu0 %v11451_v30 }
 0x364   : > { %6959 = vmatprep.subr.bf16.mxu1 %v11454_v33  ;;  %v13590_v33 = vld [vmem:[%s12695_s1 + $0x14] ss:$24 sps:$4 sm:$0xff]  }
 0x366   : > { %6917 = vmatpush2.bf16.msra.mxu0 %v11449_v34 }
 0x367   : > { %6960 = vmatpush2.bf16.msra.mxu1 %v11452_v35  ;;  %6918 = vmatprep.subr.bf16.mxu0 %v11457_v36 }
 0x368   : > { %6961 = vmatprep.subr.bf16.mxu1 %v11460_v9 }
 0x36a   : > { %6919 = vmatpush2.bf16.msra.mxu0 %v11455_v37  ;;  %v11491_v37 = vld [vmem:[%s12722_s2 + $0xdf8] ss:$48 sps:$4 sm:$0xff]  }
 0x36b   : > { %6962 = vmatpush2.bf16.msra.mxu1 %v11458_v39  ;;  %6920 = vmatprep.subr.bf16.mxu0 %v11463_v40  ;;  %v11494_v39 = vld [vmem:[%s12722_s2 + $0x200] ss:$48 sps:$4 sm:$0xff]  }
 0x36c   : > { %6963 = vmatprep.subr.bf16.mxu1 %v11466_v44  ;;  %v11499_v44 = vld [vmem:[%s12722_s2 + $0xd9c] ss:$48 sps:$4 sm:$0xff]  }
 0x36e   : > { %6921 = vmatpush2.bf16.msra.mxu0 %v11461_v45  ;;  %v11502_v45 = vld [vmem:[%s12722_s2 + $0x1a4] ss:$48 sps:$4 sm:$0xff]  }
 0x36f   : > { %6964 = vmatpush2.bf16.msra.mxu1 %v11464_v47  ;;  %6922 = vmatprep.subr.bf16.mxu0 %v11469_v49 }
 0x370   : > { %6965 = vmatprep.subr.bf16.mxu1 %v11472_v62 }
 0x372   : > { %6923 = vmatpush2.bf16.msra.mxu0 %v11467_v3 }
 0x373   : > { %6966 = vmatpush2.bf16.msra.mxu1 %v11470_v53  ;;  %6924 = vmatprep.subr.bf16.mxu0 %v11475_v20  ;;  %v11497_v53 = vld [vmem:[%s12722_s2 + $0xd98] ss:$48 sps:$4 sm:$0xff]   ;;  %v11500_v20 = vld [vmem:[%s12722_s2 + $0x1a0] ss:$48 sps:$4 sm:$0xff]  }
 0x374   : > { %6967 = vmatprep.subr.bf16.mxu1 %v11478_v28  ;;  %v11505_v28 = vld [vmem:[%s12722_s2 + $0xd3c] ss:$48 sps:$4 sm:$0xff]  }
 0x376   : > { %6925 = vmatpush2.bf16.msra.mxu0 %v11473_v55  ;;  %v11508_v55 = vld [vmem:[%s12722_s2 + $0x144] ss:$48 sps:$4 sm:$0xff]  }
 0x377   : > { %6968 = vmatpush2.bf16.msra.mxu1 %v11476_v56  ;;  %6980 = vmatprep.subr.bf16.mxu0 %v11481_v57  ;;  %v11503_v56 = vld [vmem:[%s12722_s2 + $0xd38] ss:$48 sps:$4 sm:$0xff]   ;;  %v11506_v57 = vld [vmem:[%s12722_s2 + $0x140] ss:$48 sps:$4 sm:$0xff]  }
 0x378   : > { %7023 = vmatprep.subr.bf16.mxu1 %v11484_v10  ;;  %v11511_v10 = vld [vmem:[%s12722_s2 + $0xcdc] ss:$48 sps:$4 sm:$0xff]  }
 0x379   : > { %v6670_v6 = vpop.f32.mrf.mxu0  ;;  %6927 = vmatmul.mubr.bf16.vlgmr.msra.gmra.mxu0 %v13579_v7 }
 0x37a   : > { %v6713_v23 = vpop.f32.mrf.mxu1  ;;  %6970 = vmatmul.mubr.bf16.vlgmr.msra.gmra.mxu1 %v13493_v16  ;;  %v6671_v8 = vadd.f32 %v6670_v6, %v3548_v26  ;;  %6981 = vmatpush1.bf16.msra.mxu0 %v11479_v59  ;;  %v11509_v59 = vld [vmem:[%s12722_s2 + $0xcd8] ss:$48 sps:$4 sm:$0xff]   ;;  %v11518_v6 = vld [vmem:[%s12722_s2 + $0x80] ss:$48 sps:$4 sm:$0xff]  }
 0x37b   : > { %7024 = vmatpush1.bf16.msra.mxu1 %v11482_v0  ;;  %v6672_v22 = vpop.f32.mrf.mxu0  ;;  %6982 = vmatprep.subr.bf16.mxu0 %v11487_v2  ;;  %v11512_v0 = vld [vmem:[%s12722_s2 + $0xe0] ss:$48 sps:$4 sm:$0xff]   ;;  %v11517_v2 = vld [vmem:[%s12722_s2 + $0xc7c] ss:$48 sps:$4 sm:$0xff]  }
 0x37c   : > { %v6715_v24 = vpop.f32.mrf.mxu1  ;;  %7025 = vmatprep.subr.bf16.mxu1 %v11490_v4  ;;  %v13587_v27 = vadd.f32 %v6713_v23, %v6671_v8  ;;  %v6673_v30 = vadd.f32 %v6672_v22, %v3552_v5  ;;  %7012 = vmatprep.mubr.bf16.mxu0 %v13590_v33  ;;  %v11520_v4 = vld [vmem:[%s12722_s2 + $0x84] ss:$48 sps:$4 sm:$0xff]   ;;  %v11523_v23 = vld [vmem:[%s12722_s2 + $0xc1c] ss:$48 sps:$4 sm:$0xff]  }
 0x37d   : > { %7055 = vmatprep.mubr.bf16.mxu1 %v13502_v31  ;;  %v6674_v34 = vpop.f32.mrf.mxu0  ;;  %v11526_v8 = vld [vmem:[%s12722_s2 + $0x24] ss:$48 sps:$4 sm:$0xff]   ;;  %v11529_v22 = vld [vmem:[%s12722_s2 + $0x11bc] ss:$48 sps:$4 sm:$0xff]  }
 0x37e   : > { %v6717_v35 = vpop.f32.mrf.mxu1  ;;  %v13594_v36 = vadd.f32 %v6715_v24, %v6673_v30  ;;  %v6675_v9 = vadd.f32 %v6674_v34, %v3548_v26  ;;  %6983 = vmatpush1.bf16.msra.mxu0 %v11485_v29  ;;  %v11514_v26 = vld [vmem:[%s12722_s2 + $0xe4] ss:$48 sps:$4 sm:$0xff]   ;;  %v11521_v29 = vld [vmem:[%s12722_s2 + $0xc18] ss:$48 sps:$4 sm:$0xff]   ;;  %v11535_v30 = vld [vmem:[%s12722_s2 + $0x115c] ss:$48 sps:$4 sm:$0xff]  }
 0x37f   : > { %7026 = vmatpush1.bf16.msra.mxu1 %v11488_v19  ;;  %v6676_v40 = vpop.f32.mrf.mxu0  ;;  %6984 = vmatprep.subr.bf16.mxu0 %v11493_v25  ;;  %v11524_v19 = vld [vmem:[%s12722_s2 + $0x20] ss:$48 sps:$4 sm:$0xff]   ;;  %v11532_v24 = vld [vmem:[%s12722_s2 + $0x5c4] ss:$48 sps:$4 sm:$0xff]   ;;  %v11527_v25 = vld [vmem:[%s12722_s2 + $0x11b8] ss:$48 sps:$4 sm:$0xff]  }
 0x380   : > { %7027 = vmatprep.subr.bf16.mxu1 %v11496_v1  ;;  %v13600_v47 = vadd.f32 %v6717_v35, %v6675_v9  ;;  %v6677_v49 = vadd.f32 %v6676_v40, %v3552_v5  ;;  %v6719_v62 = vpop.f32.mrf.mxu1  ;;  %v11515_v5 = vld [vmem:[%s12722_s2 + $0xc78] ss:$48 sps:$4 sm:$0xff]   ;;  %v11530_v1 = vld [vmem:[%s12722_s2 + $0x5c0] ss:$48 sps:$4 sm:$0xff]   ;;  %v11538_v34 = vld [vmem:[%s12722_s2 + $0x564] ss:$48 sps:$4 sm:$0xff]  }
 0x381   : > { %v11533_v35 = vld [vmem:[%s12722_s2 + $0x1158] ss:$48 sps:$4 sm:$0xff]   ;;  %v11536_v9 = vld [vmem:[%s12722_s2 + $0x560] ss:$48 sps:$4 sm:$0xff]  }
 0x382   : > { %v13602_v3 = vadd.f32 %v6719_v62, %v6677_v49  ;;  %6985 = vmatpush1.bf16.msra.mxu0 %v11491_v37  ;;  %v11541_v37 = vld [vmem:[%s12722_s2 + $0x10fc] ss:$48 sps:$4 sm:$0xff]   ;;  %v11539_v40 = vld [vmem:[%s12722_s2 + $0x10f8] ss:$48 sps:$4 sm:$0xff]   ;;  %v11550_v49 = vld [vmem:[%s12722_s2 + $0x4a4] ss:$48 sps:$4 sm:$0xff]  }
 0x383   : > { %7028 = vmatpush1.bf16.msra.mxu1 %v11494_v39  ;;  %6986 = vmatprep.subr.bf16.mxu0 %v11499_v44  ;;  %v11544_v39 = vld [vmem:[%s12722_s2 + $0x504] ss:$48 sps:$4 sm:$0xff]   ;;  %v11542_v44 = vld [vmem:[%s12722_s2 + $0x500] ss:$48 sps:$4 sm:$0xff]   ;;  %v11545_v62 = vld [vmem:[%s12722_s2 + $0x1098] ss:$48 sps:$4 sm:$0xff]  }
 0x384   : > { %7029 = vmatprep.subr.bf16.mxu1 %v11502_v45  ;;  %v11547_v45 = vld [vmem:[%s12722_s2 + $0x109c] ss:$48 sps:$4 sm:$0xff]  }
 0x386   : > { %6987 = vmatpush1.bf16.msra.mxu0 %v11497_v53  ;;  %v11548_v53 = vld [vmem:[%s12722_s2 + $0x4a0] ss:$48 sps:$4 sm:$0xff]  }
 0x387   : > { %7030 = vmatpush1.bf16.msra.mxu1 %v11500_v20  ;;  %6988 = vmatprep.subr.bf16.mxu0 %v11505_v28  ;;  %v11553_v20 = vld [vmem:[%s12722_s2 + $0x103c] ss:$48 sps:$4 sm:$0xff]   ;;  %v11556_v28 = vld [vmem:[%s12722_s2 + $0x444] ss:$48 sps:$4 sm:$0xff]  }
 0x388   : > { %7031 = vmatprep.subr.bf16.mxu1 %v11508_v55  ;;  %v11551_v55 = vld [vmem:[%s12722_s2 + $0x1038] ss:$48 sps:$4 sm:$0xff]  }
 0x38a   : > { %6989 = vmatpush1.bf16.msra.mxu0 %v11503_v56  ;;  %v11554_v56 = vld [vmem:[%s12722_s2 + $0x440] ss:$48 sps:$4 sm:$0xff]  }
 0x38b   : > { %7032 = vmatpush1.bf16.msra.mxu1 %v11506_v57  ;;  %6990 = vmatprep.subr.bf16.mxu0 %v11511_v10  ;;  %v11559_v57 = vld [vmem:[%s12722_s2 + $0xfdc] ss:$48 sps:$4 sm:$0xff]   ;;  %v11562_v10 = vld [vmem:[%s12722_s2 + $0x3e4] ss:$48 sps:$4 sm:$0xff]  }
 0x38c   : > { %7033 = vmatprep.subr.bf16.mxu1 %v11514_v26  ;;  %v11557_v26 = vld [vmem:[%s12722_s2 + $0xfd8] ss:$48 sps:$4 sm:$0xff]  }
 0x38e   : > { %6991 = vmatpush1.bf16.msra.mxu0 %v11509_v59  ;;  %v11560_v59 = vld [vmem:[%s12722_s2 + $0x3e0] ss:$48 sps:$4 sm:$0xff]  }
 0x38f   : > { %7034 = vmatpush1.bf16.msra.mxu1 %v11512_v0  ;;  %6992 = vmatprep.subr.bf16.mxu0 %v11517_v2  ;;  %v11565_v0 = vld [vmem:[%s12722_s2 + $0xf7c] ss:$48 sps:$4 sm:$0xff]   ;;  %v11568_v2 = vld [vmem:[%s12722_s2 + $0x384] ss:$48 sps:$4 sm:$0xff]  }
 0x390   : > { %7035 = vmatprep.subr.bf16.mxu1 %v11520_v4  ;;  %v11563_v4 = vld [vmem:[%s12722_s2 + $0xf78] ss:$48 sps:$4 sm:$0xff]  }
 0x392   : > { %6993 = vmatpush1.bf16.msra.mxu0 %v11515_v5  ;;  %v11566_v5 = vld [vmem:[%s12722_s2 + $0x380] ss:$48 sps:$4 sm:$0xff]  }
 0x393   : > { %7036 = vmatpush1.bf16.msra.mxu1 %v11518_v6  ;;  %6994 = vmatprep.subr.bf16.mxu0 %v11523_v23  ;;  %v11571_v6 = vld [vmem:[%s12722_s2 + $0xf1c] ss:$48 sps:$4 sm:$0xff]   ;;  %v11574_v23 = vld [vmem:[%s12722_s2 + $0x324] ss:$48 sps:$4 sm:$0xff]  }
 0x394   : > { %7037 = vmatprep.subr.bf16.mxu1 %v11526_v8  ;;  %v11569_v8 = vld [vmem:[%s12722_s2 + $0xf18] ss:$48 sps:$4 sm:$0xff]  }
 0x396   : > { %6995 = vmatpush1.bf16.msra.mxu0 %v11521_v29  ;;  %v11572_v29 = vld [vmem:[%s12722_s2 + $0x320] ss:$48 sps:$4 sm:$0xff]  }
 0x397   : > { %7038 = vmatpush1.bf16.msra.mxu1 %v11524_v19  ;;  %6996 = vmatprep.subr.bf16.mxu0 %v11529_v22  ;;  %v11577_v19 = vld [vmem:[%s12722_s2 + $0x8c4] ss:$48 sps:$4 sm:$0xff]  }
 0x398   : > { %7039 = vmatprep.subr.bf16.mxu1 %v11532_v24  ;;  %v11580_v22 = vld [vmem:[%s12722_s2 + $0xec4] ss:$48 sps:$4 sm:$0xff]   ;;  %v11575_v24 = vld [vmem:[%s12722_s2 + $0x8c0] ss:$48 sps:$4 sm:$0xff]  }
 0x39a   : > { %6997 = vmatpush2.bf16.msra.mxu0 %v11527_v25  ;;  %v11578_v25 = vld [vmem:[%s12722_s2 + $0xec0] ss:$48 sps:$4 sm:$0xff]  }
 0x39b   : > { %7040 = vmatpush2.bf16.msra.mxu1 %v11530_v1  ;;  %6998 = vmatprep.subr.bf16.mxu0 %v11535_v30  ;;  %v11583_v1 = vld [vmem:[%s12722_s2 + $0x864] ss:$48 sps:$4 sm:$0xff]  }
 0x39c   : > { %7041 = vmatprep.subr.bf16.mxu1 %v11538_v34  ;;  %v11586_v30 = vld [vmem:[%s12722_s2 + $0xe64] ss:$48 sps:$4 sm:$0xff]  }
 0x39e   : > { %6999 = vmatpush2.bf16.msra.mxu0 %v11533_v35  ;;  %v13661_v35 = vld [vmem:[%s12695_s1 + $0x10] ss:$24 sps:$4 sm:$0xff]  }
 0x39f   : > { %7042 = vmatpush2.bf16.msra.mxu1 %v11536_v9  ;;  %7000 = vmatprep.subr.bf16.mxu0 %v11541_v37  ;;  %v11581_v37 = vld [vmem:[%s12722_s2 + $0x860] ss:$48 sps:$4 sm:$0xff]  }
 0x3a0   : > { %7043 = vmatprep.subr.bf16.mxu1 %v11544_v39  ;;  %v11584_v39 = vld [vmem:[%s12722_s2 + $0xe60] ss:$48 sps:$4 sm:$0xff]  }
 0x3a2   : > { %7001 = vmatpush2.bf16.msra.mxu0 %v11539_v40 }
 0x3a3   : > { %7044 = vmatpush2.bf16.msra.mxu1 %v11542_v44  ;;  %7002 = vmatprep.subr.bf16.mxu0 %v11547_v45  ;;  %v11589_v44 = vld [vmem:[%s12722_s2 + $0x804] ss:$48 sps:$4 sm:$0xff]  }
 0x3a4   : > { %7045 = vmatprep.subr.bf16.mxu1 %v11550_v49  ;;  %v11592_v45 = vld [vmem:[%s12722_s2 + $0xe04] ss:$48 sps:$4 sm:$0xff]  }
 0x3a6   : > { %7003 = vmatpush2.bf16.msra.mxu0 %v11545_v62  ;;  %v13676_v62 = vld [vmem:[%s12695_s1 + $0xc] ss:$24 sps:$4 sm:$0xff]  }
 0x3a7   : > { %7046 = vmatpush2.bf16.msra.mxu1 %v11548_v53  ;;  %7004 = vmatprep.subr.bf16.mxu0 %v11553_v20  ;;  %v11587_v20 = vld [vmem:[%s12722_s2 + $0x800] ss:$48 sps:$4 sm:$0xff]  }
 0x3a8   : > { %7047 = vmatprep.subr.bf16.mxu1 %v11556_v28  ;;  %v11590_v28 = vld [vmem:[%s12722_s2 + $0xe00] ss:$48 sps:$4 sm:$0xff]  }
 0x3aa   : > { %7005 = vmatpush2.bf16.msra.mxu0 %v11551_v55  ;;  %v11595_v55 = vld [vmem:[%s12722_s2 + $0x7a4] ss:$48 sps:$4 sm:$0xff]  }
 0x3ab   : > { %7048 = vmatpush2.bf16.msra.mxu1 %v11554_v56  ;;  %7006 = vmatprep.subr.bf16.mxu0 %v11559_v57  ;;  %v11598_v56 = vld [vmem:[%s12722_s2 + $0xda4] ss:$48 sps:$4 sm:$0xff]  }
 0x3ac   : > { %7049 = vmatprep.subr.bf16.mxu1 %v11562_v10  ;;  %v11596_v10 = vld [vmem:[%s12722_s2 + $0xda0] ss:$48 sps:$4 sm:$0xff]  }
 0x3ae   : > { %7007 = vmatpush2.bf16.msra.mxu0 %v11557_v26  ;;  %v11601_v26 = vld [vmem:[%s12722_s2 + $0x744] ss:$48 sps:$4 sm:$0xff]  }
 0x3af   : > { %7050 = vmatpush2.bf16.msra.mxu1 %v11560_v59  ;;  %7008 = vmatprep.subr.bf16.mxu0 %v11565_v0  ;;  %v11604_v59 = vld [vmem:[%s12722_s2 + $0xd44] ss:$48 sps:$4 sm:$0xff]   ;;  %v11599_v0 = vld [vmem:[%s12722_s2 + $0x740] ss:$48 sps:$4 sm:$0xff]  }
 0x3b0   : > { %7051 = vmatprep.subr.bf16.mxu1 %v11568_v2  ;;  %v11602_v2 = vld [vmem:[%s12722_s2 + $0xd40] ss:$48 sps:$4 sm:$0xff]  }
 0x3b2   : > { %7009 = vmatpush2.bf16.msra.mxu0 %v11563_v4  ;;  %v11610_v4 = vld [vmem:[%s12722_s2 + $0xce4] ss:$48 sps:$4 sm:$0xff]  }
 0x3b3   : > { %7052 = vmatpush2.bf16.msra.mxu1 %v11566_v5  ;;  %7010 = vmatprep.subr.bf16.mxu0 %v11571_v6  ;;  %v11605_v5 = vld [vmem:[%s12722_s2 + $0x6e0] ss:$48 sps:$4 sm:$0xff]  }
 0x3b4   : > { %7053 = vmatprep.subr.bf16.mxu1 %v11574_v23  ;;  %v11608_v6 = vld [vmem:[%s12722_s2 + $0xce0] ss:$48 sps:$4 sm:$0xff]   ;;  %v11613_v23 = vld [vmem:[%s12722_s2 + $0x684] ss:$48 sps:$4 sm:$0xff]  }
 0x3b6   : > { %7011 = vmatpush2.bf16.msra.mxu0 %v11569_v8  ;;  %v11616_v8 = vld [vmem:[%s12722_s2 + $0xc84] ss:$48 sps:$4 sm:$0xff]  }
 0x3b7   : > { %7054 = vmatpush2.bf16.msra.mxu1 %v11572_v29  ;;  %7066 = vmatprep.subr.bf16.mxu0 %v11577_v19  ;;  %v11611_v29 = vld [vmem:[%s12722_s2 + $0x680] ss:$48 sps:$4 sm:$0xff]  }
 0x3b8   : > { %7109 = vmatprep.subr.bf16.mxu1 %v11580_v22  ;;  %v11614_v19 = vld [vmem:[%s12722_s2 + $0xc80] ss:$48 sps:$4 sm:$0xff]   ;;  %v11619_v22 = vld [vmem:[%s12722_s2 + $0x624] ss:$48 sps:$4 sm:$0xff]  }
 0x3b9   : > { %v6756_v34 = vpop.f32.mrf.mxu0  ;;  %7013 = vmatmul.mubr.bf16.vlgmr.msra.gmra.mxu0 %v13661_v35 }
 0x3ba   : > { %7056 = vmatmul.mubr.bf16.vlgmr.msra.gmra.mxu1 %v13579_v7  ;;  %v13666_v9 = vadd.f32 %v6756_v34, %v13587_v27  ;;  %7067 = vmatpush1.bf16.msra.mxu0 %v11575_v24  ;;  %v11622_v24 = vld [vmem:[%s12722_s2 + $0xc24] ss:$48 sps:$4 sm:$0xff]  }
 0x3bb   : > { %7110 = vmatpush1.bf16.msra.mxu1 %v11578_v25  ;;  %v6758_v40 = vpop.f32.mrf.mxu0  ;;  %7068 = vmatprep.subr.bf16.mxu0 %v11583_v1  ;;  %v11617_v25 = vld [vmem:[%s12722_s2 + $0x620] ss:$48 sps:$4 sm:$0xff]   ;;  %v11628_v34 = vld [vmem:[%s12722_s2 + $0x11c4] ss:$48 sps:$4 sm:$0xff]  }
 0x3bc   : > { %7111 = vmatprep.subr.bf16.mxu1 %v11586_v30  ;;  %v13673_v49 = vadd.f32 %v6758_v40, %v13594_v36  ;;  %7098 = vmatprep.mubr.bf16.mxu0 %v13676_v62  ;;  %v11620_v1 = vld [vmem:[%s12722_s2 + $0xc20] ss:$48 sps:$4 sm:$0xff]   ;;  %v11625_v30 = vld [vmem:[%s12722_s2 + $0xbc4] ss:$48 sps:$4 sm:$0xff]  }
 0x3bd   : > { %7141 = vmatprep.mubr.bf16.mxu1 %v13590_v33  ;;  %v6760_v27 = vpop.f32.mrf.mxu0  ;;  %v11631_v40 = vld [vmem:[%s12722_s2 + $0xb64] ss:$48 sps:$4 sm:$0xff]  }
 0x3be   : > { %v13681_v53 = vadd.f32 %v6760_v27, %v13600_v47  ;;  %7069 = vmatpush1.bf16.msra.mxu0 %v11581_v37  ;;  %v11593_v47 = vld [vmem:[%s12722_s2 + $0x7a0] ss:$48 sps:$4 sm:$0xff]  }
 0x3bf   : > { %7112 = vmatpush1.bf16.msra.mxu1 %v11584_v39  ;;  %v6762_v36 = vpop.f32.mrf.mxu0  ;;  %7070 = vmatprep.subr.bf16.mxu0 %v11589_v44  ;;  %v11623_v37 = vld [vmem:[%s12722_s2 + $0xbc0] ss:$48 sps:$4 sm:$0xff]   ;;  %v11634_v44 = vld [vmem:[%s12722_s2 + $0x1164] ss:$48 sps:$4 sm:$0xff]  }
 0x3c0   : > { %7113 = vmatprep.subr.bf16.mxu1 %v11592_v45  ;;  %v13688_v57 = vadd.f32 %v6762_v36, %v13602_v3  ;;  %v11607_v3 = vld [vmem:[%s12722_s2 + $0x6e4] ss:$48 sps:$4 sm:$0xff]   ;;  %v11626_v39 = vld [vmem:[%s12722_s2 + $0x11c0] ss:$48 sps:$4 sm:$0xff]  }
 0x3c1   : > { %v11629_v45 = vld [vmem:[%s12722_s2 + $0xb60] ss:$48 sps:$4 sm:$0xff]  }
 0x3c2   : > { %7071 = vmatpush1.bf16.msra.mxu0 %v11587_v20  ;;  %v11632_v27 = vld [vmem:[%s12722_s2 + $0x1160] ss:$48 sps:$4 sm:$0xff]   ;;  %v11637_v20 = vld [vmem:[%s12722_s2 + $0xb04] ss:$48 sps:$4 sm:$0xff]  }
 0x3c3   : > { %7114 = vmatpush1.bf16.msra.mxu1 %v11590_v28  ;;  %7072 = vmatprep.subr.bf16.mxu0 %v11595_v55  ;;  %v11640_v28 = vld [vmem:[%s12722_s2 + $0x1104] ss:$48 sps:$4 sm:$0xff]   ;;  %v11635_v36 = vld [vmem:[%s12722_s2 + $0xb00] ss:$48 sps:$4 sm:$0xff]  }
 0x3c4   : > { %7115 = vmatprep.subr.bf16.mxu1 %v11598_v56  ;;  %v11638_v55 = vld [vmem:[%s12722_s2 + $0x1100] ss:$48 sps:$4 sm:$0xff]   ;;  %v11643_v56 = vld [vmem:[%s12722_s2 + $0xaa4] ss:$48 sps:$4 sm:$0xff]  }
 0x3c6   : > { %7073 = vmatpush1.bf16.msra.mxu0 %v11593_v47  ;;  %v11646_v47 = vld [vmem:[%s12722_s2 + $0x10a4] ss:$48 sps:$4 sm:$0xff]  }
 0x3c7   : > { %7116 = vmatpush1.bf16.msra.mxu1 %v11596_v10  ;;  %7074 = vmatprep.subr.bf16.mxu0 %v11601_v26  ;;  %v11641_v10 = vld [vmem:[%s12722_s2 + $0xaa0] ss:$48 sps:$4 sm:$0xff]  }
 0x3c8   : > { %7117 = vmatprep.subr.bf16.mxu1 %v11604_v59  ;;  %v11644_v26 = vld [vmem:[%s12722_s2 + $0x10a0] ss:$48 sps:$4 sm:$0xff]   ;;  %v11649_v59 = vld [vmem:[%s12722_s2 + $0xa44] ss:$48 sps:$4 sm:$0xff]  }
 0x3ca   : > { %7075 = vmatpush1.bf16.msra.mxu0 %v11599_v0  ;;  %v11652_v0 = vld [vmem:[%s12722_s2 + $0x1044] ss:$48 sps:$4 sm:$0xff]  }
 0x3cb   : > { %7118 = vmatpush1.bf16.msra.mxu1 %v11602_v2  ;;  %7076 = vmatprep.subr.bf16.mxu0 %v11607_v3  ;;  %v11647_v2 = vld [vmem:[%s12722_s2 + $0xa40] ss:$48 sps:$4 sm:$0xff]  }
 0x3cc   : > { %7119 = vmatprep.subr.bf16.mxu1 %v11610_v4  ;;  %v11650_v3 = vld [vmem:[%s12722_s2 + $0x1040] ss:$48 sps:$4 sm:$0xff]   ;;  %v11655_v4 = vld [vmem:[%s12722_s2 + $0x9e4] ss:$48 sps:$4 sm:$0xff]  }
 0x3ce   : > { %7077 = vmatpush1.bf16.msra.mxu0 %v11605_v5  ;;  %v11658_v5 = vld [vmem:[%s12722_s2 + $0xfe4] ss:$48 sps:$4 sm:$0xff]  }
 0x3cf   : > { %7120 = vmatpush1.bf16.msra.mxu1 %v11608_v6  ;;  %7078 = vmatprep.subr.bf16.mxu0 %v11613_v23  ;;  %v11653_v6 = vld [vmem:[%s12722_s2 + $0x9e0] ss:$48 sps:$4 sm:$0xff]  }
 0x3d0   : > { %7121 = vmatprep.subr.bf16.mxu1 %v11616_v8  ;;  %v11656_v23 = vld [vmem:[%s12722_s2 + $0xfe0] ss:$48 sps:$4 sm:$0xff]   ;;  %v6799_v8 = vpop.f32.mrf.mxu1 }
 0x3d2   : > { %7079 = vmatpush1.bf16.msra.mxu0 %v11611_v29  ;;  %v11661_v29 = vld [vmem:[%s12722_s2 + $0x984] ss:$48 sps:$4 sm:$0xff]  }
 0x3d3   : > { %7122 = vmatpush1.bf16.msra.mxu1 %v11614_v19  ;;  %7080 = vmatprep.subr.bf16.mxu0 %v11619_v22  ;;  %v11664_v19 = vld [vmem:[%s12722_s2 + $0xf84] ss:$48 sps:$4 sm:$0xff]   ;;  %v11659_v22 = vld [vmem:[%s12722_s2 + $0x980] ss:$48 sps:$4 sm:$0xff]  }
 0x3d4   : > { %7123 = vmatprep.subr.bf16.mxu1 %v11622_v24  ;;  %v11662_v24 = vld [vmem:[%s12722_s2 + $0xf80] ss:$48 sps:$4 sm:$0xff]  }
 0x3d6   : > { %7081 = vmatpush1.bf16.msra.mxu0 %v11617_v25  ;;  %v6801_v25 = vpop.f32.mrf.mxu1 }
 0x3d7   : > { %7124 = vmatpush1.bf16.msra.mxu1 %v11620_v1  ;;  %7082 = vmatprep.subr.bf16.mxu0 %v11625_v30  ;;  %v11667_v1 = vld [vmem:[%s12722_s2 + $0x924] ss:$48 sps:$4 sm:$0xff]  }
 0x3d8   : > { %7125 = vmatprep.subr.bf16.mxu1 %v11628_v34  ;;  %v11670_v30 = vld [vmem:[%s12722_s2 + $0xf24] ss:$48 sps:$4 sm:$0xff]   ;;  %v11665_v34 = vld [vmem:[%s12722_s2 + $0x920] ss:$48 sps:$4 sm:$0xff]  }
 0x3da   : > { %7083 = vmatpush2.bf16.msra.mxu0 %v11623_v37  ;;  %v11668_v37 = vld [vmem:[%s12722_s2 + $0xf20] ss:$48 sps:$4 sm:$0xff]  }
 0x3db   : > { %7126 = vmatpush2.bf16.msra.mxu1 %v11626_v39  ;;  %7084 = vmatprep.subr.bf16.mxu0 %v11631_v40  ;;  %v6803_v39 = vpop.f32.mrf.mxu1  ;;  %v11673_v40 = vld [vmem:[%s12722_s2 + $0x2cc] ss:$48 sps:$4 sm:$0xff]  }
 0x3dc   : > { %7127 = vmatprep.subr.bf16.mxu1 %v11634_v44  ;;  %v11676_v44 = vld [vmem:[%s12722_s2 + $0x8cc] ss:$48 sps:$4 sm:$0xff]  }
 0x3de   : > { %7085 = vmatpush2.bf16.msra.mxu0 %v11629_v45  ;;  %v3556_v45 = vrot.slane %v13476_v60, %v13306_v58 }
 0x3df   : > { %7128 = vmatpush2.bf16.msra.mxu1 %v11632_v27  ;;  %7086 = vmatprep.subr.bf16.mxu0 %v11637_v20  ;;  %v3560_v27 = vrot.slane %v13476_v60, %v13313_v18  ;;  %v11671_v20 = vld [vmem:[%s12722_s2 + $0x2c8] ss:$48 sps:$4 sm:$0xff]  }
 0x3e0   : > { %7129 = vmatprep.subr.bf16.mxu1 %v11640_v28  ;;  %v11674_v28 = vld [vmem:[%s12722_s2 + $0x8c8] ss:$48 sps:$4 sm:$0xff]  }
 0x3e1   : > { %v6802_v60 = vadd.f32 %v6801_v25, %v3560_v27 }
 0x3e2   : > { %7087 = vmatpush2.bf16.msra.mxu0 %v11635_v36  ;;  %v6805_v36 = vpop.f32.mrf.mxu1 }
 0x3e3   : > { %7130 = vmatpush2.bf16.msra.mxu1 %v11638_v55  ;;  %7088 = vmatprep.subr.bf16.mxu0 %v11643_v56  ;;  %v11679_v55 = vld [vmem:[%s12722_s2 + $0x26c] ss:$48 sps:$4 sm:$0xff]  }
 0x3e4   : > { %7131 = vmatprep.subr.bf16.mxu1 %v11646_v47  ;;  %v11682_v56 = vld [vmem:[%s12722_s2 + $0x86c] ss:$48 sps:$4 sm:$0xff]   ;;  %v6800_v47 = vadd.f32 %v6799_v8, %v3556_v45 }
 0x3e6   : > { %7089 = vmatpush2.bf16.msra.mxu0 %v11641_v10 }
 0x3e7   : > { %7132 = vmatpush2.bf16.msra.mxu1 %v11644_v26  ;;  %7090 = vmatprep.subr.bf16.mxu0 %v11649_v59 }
 0x3e8   : > { %7133 = vmatprep.subr.bf16.mxu1 %v11652_v0  ;;  %v11677_v0 = vld [vmem:[%s12722_s2 + $0x268] ss:$48 sps:$4 sm:$0xff]  }
 0x3ea   : > { %7091 = vmatpush2.bf16.msra.mxu0 %v11647_v2  ;;  %v11680_v2 = vld [vmem:[%s12722_s2 + $0x868] ss:$48 sps:$4 sm:$0xff]  }
 0x3eb   : > { %7134 = vmatpush2.bf16.msra.mxu1 %v11650_v3  ;;  %7092 = vmatprep.subr.bf16.mxu0 %v11655_v4 }
 0x3ec   : > { %7135 = vmatprep.subr.bf16.mxu1 %v11658_v5  ;;  %v11685_v5 = vld [vmem:[%s12722_s2 + $0x20c] ss:$48 sps:$4 sm:$0xff]  }
 0x3ee   : > { %7093 = vmatpush2.bf16.msra.mxu0 %v11653_v6  ;;  %v11688_v6 = vld [vmem:[%s12722_s2 + $0x80c] ss:$48 sps:$4 sm:$0xff]  }
 0x3ef   : > { %7136 = vmatpush2.bf16.msra.mxu1 %v11656_v23  ;;  %7094 = vmatprep.subr.bf16.mxu0 %v11661_v29  ;;  %v6804_v23 = vadd.f32 %v6803_v39, %v3556_v45  ;;  %v11689_v45 = vld [vmem:[%s12722_s2 + $0x1a8] ss:$48 sps:$4 sm:$0xff]  }
 0x3f0   : > { %7137 = vmatprep.subr.bf16.mxu1 %v11664_v19 }
 0x3f2   : > { %7095 = vmatpush2.bf16.msra.mxu0 %v11659_v22  ;;  %v6806_v22 = vadd.f32 %v6805_v36, %v3560_v27  ;;  %v11692_v27 = vld [vmem:[%s12722_s2 + $0x7a8] ss:$48 sps:$4 sm:$0xff]  }
 0x3f3   : > { %7138 = vmatpush2.bf16.msra.mxu1 %v11662_v24  ;;  %7096 = vmatprep.subr.bf16.mxu0 %v11667_v1  ;;  %v11683_v1 = vld [vmem:[%s12722_s2 + $0x208] ss:$48 sps:$4 sm:$0xff]  }
 0x3f4   : > { %7139 = vmatprep.subr.bf16.mxu1 %v11670_v30  ;;  %v11686_v30 = vld [vmem:[%s12722_s2 + $0x808] ss:$48 sps:$4 sm:$0xff]  }
 0x3f5   : > { %v11695_v36 = vld [vmem:[%s12722_s2 + $0x148] ss:$48 sps:$4 sm:$0xff]  }
 0x3f6   : > { %7097 = vmatpush2.bf16.msra.mxu0 %v11665_v34 }
 0x3f7   : > { %7140 = vmatpush2.bf16.msra.mxu1 %v11668_v37  ;;  %7152 = vmatprep.subr.bf16.mxu0 %v11673_v40 }
 0x3f8   : > { %7195 = vmatprep.subr.bf16.mxu1 %v11676_v44 }
 0x3f9   : > { %v6842_v10 = vpop.f32.mrf.mxu0  ;;  %7099 = vmatmul.mubr.bf16.vlgmr.msra.gmra.mxu0 %v13493_v16 }
 0x3fa   : > { %v6885_v26 = vpop.f32.mrf.mxu1  ;;  %7142 = vmatmul.mubr.bf16.vlgmr.msra.gmra.mxu1 %v13661_v35  ;;  %v6843_v59 = vadd.f32 %v6842_v10, %v6800_v47  ;;  %7153 = vmatpush1.bf16.msra.mxu0 %v11671_v20  ;;  %v11697_v20 = vld [vmem:[%s12722_s2 + $0x14c] ss:$48 sps:$4 sm:$0xff]   ;;  %v11701_v10 = vld [vmem:[%s12722_s2 + $0xe8] ss:$48 sps:$4 sm:$0xff]  }
 0x3fb   : > { %7196 = vmatpush1.bf16.msra.mxu1 %v11674_v28  ;;  %v6844_v3 = vpop.f32.mrf.mxu0  ;;  %7154 = vmatprep.subr.bf16.mxu0 %v11679_v55  ;;  %v11700_v28 = vld [vmem:[%s12722_s2 + $0x74c] ss:$48 sps:$4 sm:$0xff]   ;;  %v11698_v55 = vld [vmem:[%s12722_s2 + $0x748] ss:$48 sps:$4 sm:$0xff]  }
 0x3fc   : > { %v6887_v4 = vpop.f32.mrf.mxu1  ;;  %7197 = vmatprep.subr.bf16.mxu1 %v11682_v56  ;;  %v13756_v8 = vadd.f32 %v6885_v26, %v6843_v59  ;;  %v6845_v16 = vadd.f32 %v6844_v3, %v6802_v60  ;;  %7184 = vmatprep.mubr.bf16.mxu0 %v13502_v31  ;;  %v11691_v31 = vld [vmem:[%s12722_s2 + $0x1ac] ss:$48 sps:$4 sm:$0xff]   ;;  %v11704_v26 = vld [vmem:[%s12722_s2 + $0x6e8] ss:$48 sps:$4 sm:$0xff]  }
 0x3fd   : > { %7227 = vmatprep.mubr.bf16.mxu1 %v13676_v62  ;;  %v6846_v29 = vpop.f32.mrf.mxu0  ;;  %v11694_v62 = vld [vmem:[%s12722_s2 + $0x7ac] ss:$48 sps:$4 sm:$0xff]  }
 0x3fe   : > { %v6889_v19 = vpop.f32.mrf.mxu1  ;;  %v13760_v24 = vadd.f32 %v6887_v4, %v6845_v16  ;;  %v6847_v25 = vadd.f32 %v6846_v29, %v6804_v23  ;;  %7155 = vmatpush1.bf16.msra.mxu0 %v11677_v0  ;;  %v11703_v56 = vld [vmem:[%s12722_s2 + $0xec] ss:$48 sps:$4 sm:$0xff]   ;;  %v11707_v0 = vld [vmem:[%s12722_s2 + $0x88] ss:$48 sps:$4 sm:$0xff]  }
 0x3ff   : > { %7198 = vmatpush1.bf16.msra.mxu1 %v11680_v2  ;;  %v6848_v34 = vpop.f32.mrf.mxu0  ;;  %7156 = vmatprep.subr.bf16.mxu0 %v11685_v5  ;;  %v11706_v47 = vld [vmem:[%s12722_s2 + $0x6ec] ss:$48 sps:$4 sm:$0xff]   ;;  %v11710_v2 = vld [vmem:[%s12722_s2 + $0x688] ss:$48 sps:$4 sm:$0xff]  }
 0x400   : > { %7199 = vmatprep.subr.bf16.mxu1 %v11688_v6  ;;  %v13766_v37 = vadd.f32 %v6889_v19, %v6847_v25  ;;  %v6849_v39 = vadd.f32 %v6848_v34, %v6806_v22  ;;  %v6891_v40 = vpop.f32.mrf.mxu1  ;;  %v11709_v60 = vld [vmem:[%s12722_s2 + $0x8c] ss:$48 sps:$4 sm:$0xff]   ;;  %v11713_v5 = vld [vmem:[%s12722_s2 + $0x28] ss:$48 sps:$4 sm:$0xff]  }
 0x401   : > { %v11712_v59 = vld [vmem:[%s12722_s2 + $0x68c] ss:$48 sps:$4 sm:$0xff]   ;;  %v11716_v6 = vld [vmem:[%s12722_s2 + $0x628] ss:$48 sps:$4 sm:$0xff]  }
 0x402   : > { %v13768_v44 = vadd.f32 %v6891_v40, %v6849_v39  ;;  %7157 = vmatpush1.bf16.msra.mxu0 %v11683_v1  ;;  %v11715_v3 = vld [vmem:[%s12722_s2 + $0x2c] ss:$48 sps:$4 sm:$0xff]   ;;  %v11719_v29 = vld [vmem:[%s12722_s2 + $0x5c8] ss:$48 sps:$4 sm:$0xff]  }
 0x403   : > { %7200 = vmatpush1.bf16.msra.mxu1 %v11686_v30  ;;  %7158 = vmatprep.subr.bf16.mxu0 %v11691_v31  ;;  %v11718_v4 = vld [vmem:[%s12722_s2 + $0x62c] ss:$48 sps:$4 sm:$0xff]   ;;  %v11722_v19 = vld [vmem:[%s12722_s2 + $0xbc8] ss:$48 sps:$4 sm:$0xff]  }
 0x404   : > { %7201 = vmatprep.subr.bf16.mxu1 %v11694_v62  ;;  %v11721_v23 = vld [vmem:[%s12722_s2 + $0x5cc] ss:$48 sps:$4 sm:$0xff]   ;;  %v11725_v1 = vld [vmem:[%s12722_s2 + $0x568] ss:$48 sps:$4 sm:$0xff]  }
 0x405   : > { %v11724_v16 = vld [vmem:[%s12722_s2 + $0xbcc] ss:$48 sps:$4 sm:$0xff]   ;;  %v11728_v30 = vld [vmem:[%s12722_s2 + $0xb68] ss:$48 sps:$4 sm:$0xff]  }
 0x406   : > { %7159 = vmatpush1.bf16.msra.mxu0 %v11689_v45  ;;  %v11727_v22 = vld [vmem:[%s12722_s2 + $0x56c] ss:$48 sps:$4 sm:$0xff]   ;;  %v11731_v62 = vld [vmem:[%s12722_s2 + $0x508] ss:$48 sps:$4 sm:$0xff]  }
 0x407   : > { %7202 = vmatpush1.bf16.msra.mxu1 %v11692_v27  ;;  %7160 = vmatprep.subr.bf16.mxu0 %v11697_v20  ;;  %v11730_v25 = vld [vmem:[%s12722_s2 + $0xb6c] ss:$48 sps:$4 sm:$0xff]   ;;  %v11734_v39 = vld [vmem:[%s12722_s2 + $0xb08] ss:$48 sps:$4 sm:$0xff]  }
 0x408   : > { %7203 = vmatprep.subr.bf16.mxu1 %v11700_v28  ;;  %v11733_v34 = vld [vmem:[%s12722_s2 + $0x50c] ss:$48 sps:$4 sm:$0xff]   ;;  %v11737_v27 = vld [vmem:[%s12722_s2 + $0x4a8] ss:$48 sps:$4 sm:$0xff]  }
 0x409   : > { %v11736_v31 = vld [vmem:[%s12722_s2 + $0xb0c] ss:$48 sps:$4 sm:$0xff]   ;;  %v11740_v20 = vld [vmem:[%s12722_s2 + $0xaa8] ss:$48 sps:$4 sm:$0xff]  }
 0x40a   : > { %7161 = vmatpush1.bf16.msra.mxu0 %v11695_v36  ;;  %v11739_v40 = vld [vmem:[%s12722_s2 + $0x4ac] ss:$48 sps:$4 sm:$0xff]  }
 0x40b   : > { %7204 = vmatpush1.bf16.msra.mxu1 %v11698_v55  ;;  %7162 = vmatprep.subr.bf16.mxu0 %v11703_v56  ;;  %v11742_v45 = vld [vmem:[%s12722_s2 + $0xaac] ss:$48 sps:$4 sm:$0xff]   ;;  %v11743_v55 = vld [vmem:[%s12722_s2 + $0x448] ss:$48 sps:$4 sm:$0xff]  }
 0x40c   : > { %7205 = vmatprep.subr.bf16.mxu1 %v11706_v47  ;;  %v11745_v28 = vld [vmem:[%s12722_s2 + $0x44c] ss:$48 sps:$4 sm:$0xff]   ;;  %v11746_v56 = vld [vmem:[%s12722_s2 + $0xa48] ss:$48 sps:$4 sm:$0xff]  }
 0x40d   : > { %v11748_v36 = vld [vmem:[%s12722_s2 + $0xa4c] ss:$48 sps:$4 sm:$0xff]  }
 0x40e   : > { %7163 = vmatpush1.bf16.msra.mxu0 %v11701_v10  ;;  %v11751_v47 = vld [vmem:[%s12722_s2 + $0x3ec] ss:$48 sps:$4 sm:$0xff]  }
 0x40f   : > { %7206 = vmatpush1.bf16.msra.mxu1 %v11704_v26  ;;  %7164 = vmatprep.subr.bf16.mxu0 %v11709_v60  ;;  %v11754_v10 = vld [vmem:[%s12722_s2 + $0x9ec] ss:$48 sps:$4 sm:$0xff]   ;;  %v11749_v26 = vld [vmem:[%s12722_s2 + $0x3e8] ss:$48 sps:$4 sm:$0xff]  }
 0x410   : > { %7207 = vmatprep.subr.bf16.mxu1 %v11712_v59  ;;  %v11752_v60 = vld [vmem:[%s12722_s2 + $0x9e8] ss:$48 sps:$4 sm:$0xff]   ;;  %v11757_v59 = vld [vmem:[%s12722_s2 + $0x38c] ss:$48 sps:$4 sm:$0xff]  }
 0x412   : > { %7165 = vmatpush1.bf16.msra.mxu0 %v11707_v0  ;;  %v11760_v0 = vld [vmem:[%s12722_s2 + $0x98c] ss:$48 sps:$4 sm:$0xff]  }
 0x413   : > { %7208 = vmatpush1.bf16.msra.mxu1 %v11710_v2  ;;  %7166 = vmatprep.subr.bf16.mxu0 %v11715_v3  ;;  %v11755_v2 = vld [vmem:[%s12722_s2 + $0x388] ss:$48 sps:$4 sm:$0xff]  }
 0x414   : > { %7209 = vmatprep.subr.bf16.mxu1 %v11718_v4  ;;  %v11758_v3 = vld [vmem:[%s12722_s2 + $0x988] ss:$48 sps:$4 sm:$0xff]   ;;  %v11763_v4 = vld [vmem:[%s12722_s2 + $0x32c] ss:$48 sps:$4 sm:$0xff]  }
 0x416   : > { %7167 = vmatpush1.bf16.msra.mxu0 %v11713_v5  ;;  %v11766_v5 = vld [vmem:[%s12722_s2 + $0x92c] ss:$48 sps:$4 sm:$0xff]  }
 0x417   : > { %7210 = vmatpush1.bf16.msra.mxu1 %v11716_v6  ;;  %7168 = vmatprep.subr.bf16.mxu0 %v11721_v23  ;;  %v13819_v6 = vld [vmem:[%s12724_s20] sm:$0xff] }
 0x418   : > { %7211 = vmatprep.subr.bf16.mxu1 %v11724_v16  ;;  %v3540_v23 = vrot.slane %v13819_v6, %v13052_v42 }
 0x41a   : > { %7169 = vmatpush2.bf16.msra.mxu0 %v11719_v29  ;;  %v6546_v16 = vadd.f32 %v13478_v13, %v3540_v23  ;;  %v11761_v29 = vld [vmem:[%s12722_s2 + $0x328] ss:$48 sps:$4 sm:$0xff]   ;;  %v12348_v13 = vmov 0.0  }
 0x41b   : > { %7212 = vmatpush2.bf16.msra.mxu1 %v11722_v19  ;;  %7170 = vmatprep.subr.bf16.mxu0 %v11727_v22  ;;  %v11764_v19 = vld [vmem:[%s12722_s2 + $0x928] ss:$48 sps:$4 sm:$0xff]   ;;  %v11769_v22 = vld [vmem:[%s12722_s2 + $0xecc] ss:$48 sps:$4 sm:$0xff]  }
 0x41c   : > { %7213 = vmatprep.subr.bf16.mxu1 %v11730_v25  ;;  %v6589_v25 = vadd.f32 %v13506_v48, %v6546_v16  ;;  %v11788_v16 = vld [vmem:[%s12722_s2 + $0xc28] ss:$48 sps:$4 sm:$0xff]  }
 0x41e   : > { %7171 = vmatpush2.bf16.msra.mxu0 %v11725_v1  ;;  %v3567_v1 = vsub.s32 7, %v12789_v43 }
 0x41f   : > { %7214 = vmatpush2.bf16.msra.mxu1 %v11728_v30  ;;  %7172 = vmatprep.subr.bf16.mxu0 %v11733_v34  ;;  %v6542_v30 = vadd.f32 %v13465_v17, %v3540_v23  ;;  %v11767_v34 = vld [vmem:[%s12722_s2 + $0xec8] ss:$48 sps:$4 sm:$0xff]   ;;  %v11790_v23 = vld [vmem:[%s12722_s2 + $0xc2c] ss:$48 sps:$4 sm:$0xff]  }
 0x420   : > { %7215 = vmatprep.subr.bf16.mxu1 %v11736_v31  ;;  %v11772_v31 = vld [vmem:[%s12722_s2 + $0xe6c] ss:$48 sps:$4 sm:$0xff]   ;;  %v3568_v48 = vrot.slane %v13819_v6, %v3567_v1 }
 0x421   : > { %v11908_v17 = vld [vmem:[%s12695_s1 + $0x8] ss:$24 sps:$4 sm:$0xff]   ;;  %s14259_s1 = sld [smem:[#allocation32_spill]] }
 0x422   : > { %7173 = vmatpush2.bf16.msra.mxu0 %v11731_v62  ;;  %v6585_v62 = vadd.f32 %v13488_v11, %v6542_v30  ;;  %v11775_v11 = vld [vmem:[%s12722_s2 + $0xe0c] ss:$48 sps:$4 sm:$0xff]   ;;  %v11797_v30 = vld [vmem:[%s12722_s2 + $0x1108] ss:$48 sps:$4 sm:$0xff]  }
 0x423   : > { %7216 = vmatpush2.bf16.msra.mxu1 %v11734_v39  ;;  %7174 = vmatprep.subr.bf16.mxu0 %v11739_v40  ;;  %v6632_v39 = vadd.f32 %v13508_v32, %v6589_v25  ;;  %v11794_v25 = vld [vmem:[%s12722_s2 + $0x1168] ss:$48 sps:$4 sm:$0xff]   ;;  %v11799_v1 = vld [vmem:[%s12722_s2 + $0x110c] ss:$48 sps:$4 sm:$0xff]  }
 0x424   : > { %7217 = vmatprep.subr.bf16.mxu1 %v11742_v45  ;;  %v6628_v32 = vadd.f32 %v13490_v12, %v6585_v62  ;;  %v11805_v62 = vld [vmem:[%s12722_s2 + $0x104c] ss:$48 sps:$4 sm:$0xff]  }
 0x426   : > { %7175 = vmatpush2.bf16.msra.mxu0 %v11737_v27  ;;  %v11770_v27 = vld [vmem:[%s12722_s2 + $0xe68] ss:$48 sps:$4 sm:$0xff]  }
 0x427   : > { %7218 = vmatpush2.bf16.msra.mxu1 %v11740_v20  ;;  %7176 = vmatprep.subr.bf16.mxu0 %v11745_v28 }
 0x428   : > { %7219 = vmatprep.subr.bf16.mxu1 %v11748_v36 }
 0x42a   : > { %7177 = vmatpush2.bf16.msra.mxu0 %v11743_v55 }
 0x42b   : > { %7220 = vmatpush2.bf16.msra.mxu1 %v11746_v56  ;;  %7178 = vmatprep.subr.bf16.mxu0 %v11751_v47  ;;  %v11773_v47 = vld [vmem:[%s12722_s2 + $0xe08] ss:$48 sps:$4 sm:$0xff]  }
 0x42c   : > { %7221 = vmatprep.subr.bf16.mxu1 %v11754_v10  ;;  %v11778_v10 = vld [vmem:[%s12722_s2 + $0xdac] ss:$48 sps:$4 sm:$0xff]  }
 0x42e   : > { %7179 = vmatpush2.bf16.msra.mxu0 %v11749_v26 }
 0x42f   : > { %7222 = vmatpush2.bf16.msra.mxu1 %v11752_v60  ;;  %7180 = vmatprep.subr.bf16.mxu0 %v11757_v59  ;;  %v11776_v59 = vld [vmem:[%s12722_s2 + $0xda8] ss:$48 sps:$4 sm:$0xff]  }
 0x430   : > { %7223 = vmatprep.subr.bf16.mxu1 %v11760_v0  ;;  %v11781_v0 = vld [vmem:[%s12722_s2 + $0xd4c] ss:$48 sps:$4 sm:$0xff]  }
 0x432   : > { %7181 = vmatpush2.bf16.msra.mxu0 %v11755_v2  ;;  %v11779_v2 = vld [vmem:[%s12722_s2 + $0xd48] ss:$48 sps:$4 sm:$0xff]  }
 0x433   : > { %7224 = vmatpush2.bf16.msra.mxu1 %v11758_v3  ;;  %7182 = vmatprep.subr.bf16.mxu0 %v11763_v4  ;;  %v11784_v3 = vld [vmem:[%s12722_s2 + $0xcec] ss:$48 sps:$4 sm:$0xff]  }
 0x434   : > { %7225 = vmatprep.subr.bf16.mxu1 %v11766_v5  ;;  %v11787_v4 = vld [vmem:[%s12722_s2 + $0xc8c] ss:$48 sps:$4 sm:$0xff]   ;;  %v11785_v5 = vld [vmem:[%s12722_s2 + $0xc88] ss:$48 sps:$4 sm:$0xff]  }
 0x436   : > { %7183 = vmatpush2.bf16.msra.mxu0 %v11761_v29  ;;  %v11793_v29 = vld [vmem:[%s12722_s2 + $0x11cc] ss:$48 sps:$4 sm:$0xff]  }
 0x437   : > { %7226 = vmatpush2.bf16.msra.mxu1 %v11764_v19  ;;  %7238 = vmatprep.subr.bf16.mxu0 %v11769_v22  ;;  %v11791_v19 = vld [vmem:[%s12722_s2 + $0x11c8] ss:$48 sps:$4 sm:$0xff]   ;;  %v11796_v22 = vld [vmem:[%s12722_s2 + $0x116c] ss:$48 sps:$4 sm:$0xff]  }
 0x438   : > { %10229 = vmatprep.subr.mxu1 %v12348_v13 }
 0x439   : > { %v13836_v40 = vpop.f32.mrf.mxu0  ;;  %7185 = vmatmul.mubr.bf16.vlgmr.msra.gmra.mxu0 %v13579_v7 }
 0x43a   : > { %v13838_v45 = vpop.f32.mrf.mxu1  ;;  %7228 = vmatmul.mubr.bf16.vlgmr.msra.gmra.mxu1 %v11908_v17  ;;  %7239 = vmatpush1.bf16.msra.mxu0 %v11767_v34  ;;  %v11802_v34 = vld [vmem:[%s12722_s2 + $0x10ac] ss:$48 sps:$4 sm:$0xff]   ;;  %v11806_v17 = vld [vmem:[%s12722_s2 + $0xfe8] ss:$48 sps:$4 sm:$0xff]  }
 0x43b   : > { %10230 = vmatpush3.xpose.msra.mxu1 %v6632_v39  ;;  %v6930_v20 = vpop.f32.mrf.mxu0  ;;  %7240 = vmatprep.subr.bf16.mxu0 %v11772_v31  ;;  %v11800_v31 = vld [vmem:[%s12722_s2 + $0x10a8] ss:$48 sps:$4 sm:$0xff]  }
 0x43c   : > { %v6973_v28 = vpop.f32.mrf.mxu1  ;;  %10231 = vmatprep.subr.mxu1 %v12348_v13  ;;  %v6931_v36 = vadd.f32 %v6930_v20, %v3568_v48  ;;  %10233 = vmatprep.mubr.msk.f32.mxu1 %vm12349_vm0, %v12348_v13  ;;  %v11803_v39 = vld [vmem:[%s12722_s2 + $0x1048] ss:$48 sps:$4 sm:$0xff]  }
 0x43d   : > { %7270 = vmatprep.mubr.bf16.mxu0 %v13590_v33  ;;  %v13849_v7 = vpop.f32.mrf.mxu0  ;;  %v11809_v20 = vld [vmem:[%s12722_s2 + $0xf88] ss:$48 sps:$4 sm:$0xff]  }
 0x43e   : > { %v13851_v55 = vpop.f32.mrf.mxu1  ;;  %v13853_v56 = vadd.f32 %v6973_v28, %v6931_v36  ;;  %7241 = vmatpush1.bf16.msra.mxu0 %v11770_v27  ;;  %v11811_v27 = vld [vmem:[%s12722_s2 + $0xf8c] ss:$48 sps:$4 sm:$0xff]  }
 0x43f   : > { %10232 = vmatpush3.xpose.msra.mxu1 %v6628_v32  ;;  %v6934_v12 = vpop.f32.mrf.mxu0  ;;  %7242 = vmatprep.subr.bf16.mxu0 %v11775_v11  ;;  %v11814_v28 = vld [vmem:[%s12722_s2 + $0xf2c] ss:$48 sps:$4 sm:$0xff]   ;;  %v3563_v11 = vsub.s32 6, %v12789_v43  ;;  %v11812_v32 = vld [vmem:[%s12722_s2 + $0xf28] ss:$48 sps:$4 sm:$0xff]  }
 0x440   : > { %10236 = vmatprep.subr.mxu1 %v12348_v13  ;;  %v6935_v33 = vadd.f32 %v6934_v12, %v3568_v48  ;;  %v6977_v26 = vpop.f32.mrf.mxu1  ;;  %v11808_v48 = vld [vmem:[%s12722_s2 + $0xfec] ss:$48 sps:$4 sm:$0xff]  }
 0x441   : > { %v3564_v36 = vrot.slane %v13819_v6, %v3563_v11 }
 0x442   : > { %10234 = vmatmul.mubr.f32.vlgmr.msra.gmra.mxu1 %v13148_v15  ;;  %v13859_v60 = vadd.f32 %v6977_v26, %v6935_v33  ;;  %7243 = vmatpush1.bf16.msra.mxu0 %v11773_v47  ;;  %v11782_v15 = vld [vmem:[%s12722_s2 + $0xce8] ss:$48 sps:$4 sm:$0xff]  }
 0x443   : > { %10240 = vmatprep.mubr.msk.f32.mxu1 %vm12349_vm0, %v12348_v13  ;;  %7244 = vmatprep.subr.bf16.mxu0 %v11778_v10  ;;  %v6933_v47 = vadd.f32 %v13849_v7, %v3564_v36  ;;  %v6929_v10 = vadd.f32 %v13836_v40, %v3564_v36 }
 0x445   : > { %v6976_v33 = vadd.f32 %v13851_v55, %v6933_v47 }
 0x446   : > { %7245 = vmatpush1.bf16.msra.mxu0 %v11776_v59  ;;  %v6972_v59 = vadd.f32 %v13838_v45, %v6929_v10 }
 0x447   : > { %7246 = vmatprep.subr.bf16.mxu0 %v11781_v0 }
 0x44a   : > { %7247 = vmatpush1.bf16.msra.mxu0 %v11779_v2 }
 0x44b   : > { %7248 = vmatprep.subr.bf16.mxu0 %v11784_v3  ;;  %v3534_v3 = vld [vmem:[%s12724_s20 + $0x8] sm:$0xf] }
 0x44c   : > { %v3576_v45 = vrot.slane %v3534_v3, %v13057_v46 }
 0x44e   : > { %7249 = vmatpush1.bf16.msra.mxu0 %v11782_v15  ;;  %v3572_v15 = vrot.slane %v3534_v3, %v13052_v42 }
 0x44f   : > { %7250 = vmatprep.subr.bf16.mxu0 %v11787_v4 }
 0x452   : > { %7251 = vmatpush1.bf16.msra.mxu0 %v11785_v5 }
 0x453   : > { %7252 = vmatprep.subr.bf16.mxu0 %v11790_v23 }
 0x456   : > { %7253 = vmatpush1.bf16.msra.mxu0 %v11788_v16 }
 0x457   : > { %7254 = vmatprep.subr.bf16.mxu0 %v11793_v29 }
 0x45a   : > { %7255 = vmatpush2.bf16.msra.mxu0 %v11791_v19 }
 0x45b   : > { %7256 = vmatprep.subr.bf16.mxu0 %v11796_v22 }
 0x45e   : > { %7257 = vmatpush2.bf16.msra.mxu0 %v11794_v25 }
 0x45f   : > { %7258 = vmatprep.subr.bf16.mxu0 %v11799_v1 }
 0x462   : > { %7259 = vmatpush2.bf16.msra.mxu0 %v11797_v30 }
 0x463   : > { %7260 = vmatprep.subr.bf16.mxu0 %v11802_v34 }
 0x466   : > { %7261 = vmatpush2.bf16.msra.mxu0 %v11800_v31 }
 0x467   : > { %7262 = vmatprep.subr.bf16.mxu0 %v11805_v62 }
 0x46a   : > { %7263 = vmatpush2.bf16.msra.mxu0 %v11803_v39 }
 0x46b   : > { %7264 = vmatprep.subr.bf16.mxu0 %v11808_v48 }
 0x46e   : > { %7265 = vmatpush2.bf16.msra.mxu0 %v11806_v17 }
 0x46f   : > { %7266 = vmatprep.subr.bf16.mxu0 %v11811_v27 }
 0x472   : > { %7267 = vmatpush2.bf16.msra.mxu0 %v11809_v20 }
 0x473   : > { %7268 = vmatprep.subr.bf16.mxu0 %v11814_v28 }
 0x476   : > { %7269 = vmatpush2.bf16.msra.mxu0 %v11812_v32  ;;  %v3580_v32 = vrot.slane %v3534_v3, %v13211_v63 }
 0x477   : > { %10306 = vmatprep.subr.mxu0 %v12348_v13 }
 0x479   : > { %v7014_v12 = vpop.f32.mrf.mxu0  ;;  %7271 = vmatmul.mubr.bf16.vlgmr.msra.gmra.mxu0 %v13661_v35 }
 0x47a   : > { %10310 = vmatprep.mubr.msk.f32.mxu0 %vm12349_vm0, %v12348_v13  ;;  %v7015_v2 = vadd.f32 %v7014_v12, %v6972_v59  ;;  %v7057_v40 = vpop.f32.mrf.mxu1 }
 0x47b   : > { %v7016_v43 = vpop.f32.mrf.mxu0  ;;  %v7058_v5 = vadd.f32 %v7057_v40, %v3572_v15 }
 0x47c   : > { %v13898_v26 = vadd.f32 %v7016_v43, %v13853_v56  ;;  %v7059_v55 = vpop.f32.mrf.mxu1 }
 0x47d   : > { %v7018_v6 = vpop.f32.mrf.mxu0 }
 0x47e   : > { %v7019_v0 = vadd.f32 %v7018_v6, %v6976_v33  ;;  %v7061_v56 = vpop.f32.mrf.mxu1 }
 0x47f   : > { %v7020_v7 = vpop.f32.mrf.mxu0  ;;  %v7062_v25 = vadd.f32 %v7061_v56, %v3572_v15 }
 0x480   : > { %v13902_v35 = vadd.f32 %v7020_v7, %v13859_v60  ;;  %10237 = vmatpush3.msra.mxu1 %v7019_v0  ;;  %v7063_v4 = vpop.f32.mrf.mxu1  ;;  %v7060_v60 = vadd.f32 %v7059_v55, %v3576_v45 }
 0x481   : > { %10238 = vmatprep.subr.mxu1 %v12348_v13  ;;  %v7064_v62 = vadd.f32 %v7063_v4, %v3576_v45 }
 0x482   : > { %10239 = vmatpush3.msra.mxu1 %v7015_v2  ;;  %v13920_v2 = vld [vmem:[%s607_s22] sm:$0x1]  ;;  %s10113_s22 = sshll.u32 %s14259_s1, 1 }
 0x483   : > { %10243 = vmatprep.subr.mxu1 %v12348_v13  ;;  %s8879_s17 = sadd.s32 %s14255_s24, %s10113_s22 }
 0x484   : > { %s10114_s27 = sshll.u32 %s8879_s17, 4 }
 0x485   : > { %s14109_s20 = scalar_lea.hbm %s14260_s14, %s10114_s27 }
 0x4b9   : > { %v7100_v23 = vpop.f32.mrf.mxu0 }
 0x4ba   : > { %v7143_v16 = vpop.f32.mrf.mxu1  ;;  %v7101_v29 = vadd.f32 %v7100_v23, %v7058_v5  ;;  %v3584_v5 = vrot.slane %v3534_v3, %v13214_v61 }
 0x4bb   : > { %v7102_v19 = vpop.f32.mrf.mxu0 }
 0x4bc   : > { %v7145_v22 = vpop.f32.mrf.mxu1  ;;  %v13909_v1 = vadd.f32 %v7143_v16, %v7101_v29  ;;  %v7103_v30 = vadd.f32 %v7102_v19, %v7060_v60 }
 0x4bd   : > { %v7104_v34 = vpop.f32.mrf.mxu0 }
 0x4be   : > { %v7147_v31 = vpop.f32.mrf.mxu1  ;;  %v13911_v39 = vadd.f32 %v7145_v22, %v7103_v30  ;;  %v7105_v48 = vadd.f32 %v7104_v34, %v7062_v25 }
 0x4bf   : > { %v7106_v17 = vpop.f32.mrf.mxu0 }
 0x4c0   : > { %v13913_v27 = vadd.f32 %v7147_v31, %v7105_v48  ;;  %v7107_v20 = vadd.f32 %v7106_v17, %v7064_v62  ;;  %v7149_v28 = vpop.f32.mrf.mxu1 }
 0x4c2   : > { %v13915_v11 = vadd.f32 %v7149_v28, %v7107_v20 }
 0x4f9   : > { %v7186_v36 = vpop.f32.mrf.mxu0 }
 0x4fa   : > { %v7229_v47 = vpop.f32.mrf.mxu1  ;;  %v7187_v12 = vadd.f32 %v7186_v36, %v3580_v32 }
 0x4fb   : > { %v7188_v10 = vpop.f32.mrf.mxu0 }
 0x4fc   : > { %v7231_v43 = vpop.f32.mrf.mxu1  ;;  %v7230_v33 = vadd.f32 %v7229_v47, %v7187_v12  ;;  %v7189_v19 = vadd.f32 %v7188_v10, %v3584_v5 }
 0x4fd   : > { %v7190_v6 = vpop.f32.mrf.mxu0 }
 0x4fe   : > { %v7233_v59 = vpop.f32.mrf.mxu1  ;;  %v7191_v0 = vadd.f32 %v7190_v6, %v3580_v32  ;;  %v7232_v31 = vadd.f32 %v7231_v43, %v7189_v19 }
 0x4ff   : > { %v7192_v4 = vpop.f32.mrf.mxu0 }
 0x500   : > { %v7235_v7 = vpop.f32.mrf.mxu1  ;;  %v7234_v40 = vadd.f32 %v7233_v59, %v7191_v0  ;;  %v7193_v16 = vadd.f32 %v7192_v4, %v3584_v5 }
 0x502   : > { %v7347_v55 = vpop.f32.mrf.mxu1  ;;  %v7236_v25 = vadd.f32 %v7235_v7, %v7193_v16 }
 0x503   : > { %v7348_v56 = vadd.f32 %v7347_v55, %v13920_v2 }
 0x504   : > { %v10235_v15 = vpop.f32.mrf.mxu1 }
 0x505   : > { %v7352_v45 = vsel %vm7351_vm1, %v7348_v56, -inf }
 0x506   : > { %7353 = vmax.xlane.f32.xlu0 %v7352_v45 }
 0x539   : > { %v7272_v23 = vpop.f32.mrf.mxu0 }
 0x53a   : > { %v13925_v60 = vadd.f32 %v7272_v23, %v7230_v33 }
 0x53b   : > { %v7274_v29 = vpop.f32.mrf.mxu0 }
 0x53c   : > { %v7275_v48 = vadd.f32 %v7274_v29, %v7232_v31 }
 0x53d   : > { %v7276_v22 = vpop.f32.mrf.mxu0 }
 0x53e   : > { %v13927_v30 = vadd.f32 %v7276_v22, %v7234_v40 }
 0x53f   : > { %v7278_v34 = vpop.f32.mrf.mxu0 }
 0x540   : > { %v7279_v62 = vadd.f32 %v7278_v34, %v7236_v25 }
 0x542   : > { %10307 = vmatpush3.msra.mxu0 %v7279_v62 }
 0x543   : > { %10308 = vmatprep.subr.mxu0 %v12348_v13 }
 0x544   : > { %10309 = vmatpush3.msra.mxu0 %v7275_v48 }
 0x58f   : > { %v7354_v17 = vpop.xlane.xlu0 %7353 }
 0x590   : > { %v7355_v3 = vsub.f32 %v7348_v56, %v7354_v17 }
 0x592   : > { %v7356_v20 = vmul.f32 1.442695, %v7355_v3 }
 0x594   : > { %11871 = vpow2.f32 %v7356_v20 }
 0x5a1   : > { %v11872_v28 = vpop.eup %11871 }
 0x5a2   : > { %v7358_v32 = vsel %vm7351_vm1, %v11872_v28, 0.0 }
 0x5a3   : > { %7359 = vadd.xlane.f32.xlu0 %v7358_v32 }
 0x62c   : > { %v7360_v36 = vpop.xlane.xlu0 %7359 }
 0x62d   : > { %11873 = vrcp.f32 %v7360_v36 }
 0x63a   : > { %v11874_v47 = vpop.eup %11873 }
 0x63b   : > { %v7362_v12 = vmul.f32 %v11874_v47, %v11872_v28 }
 0x63d   : > { %10241 = vmatmul.mubr.msk.f32.vlgmr.msra.gmra.mxu1 %vm7363_vm2, %v7362_v12 }
 0x63e   : > { %10244 = vmatpush3.xpose.msra.mxu1 %v13516_v41  ;;  %10247 = vmatprep.mubr.msk.f32.mxu1 %vm12349_vm0, %v12348_v13 }
 0x63f   : > { %10245 = vmatprep.subr.mxu1 %v12348_v13 }
 0x642   : > { %10246 = vmatpush3.xpose.msra.mxu1 %v13510_v52 }
 0x643   : > { %10250 = vmatprep.subr.mxu1 %v12348_v13 }
 0x645   : > { %10248 = vmatmul.mubr.f32.vlgmr.msra.gmra.mxu1 %v13155_v21 }
 0x646   : > { %10251 = vmatpush3.msra.mxu1 %v13902_v35  ;;  %10254 = vmatprep.mubr.msk.f32.mxu1 %vm12349_vm0, %v12348_v13 }
 0x647   : > { %10252 = vmatprep.subr.mxu1 %v12348_v13 }
 0x648   : > { %10253 = vmatpush3.msra.mxu1 %v13898_v26 }
 0x649   : > { %10257 = vmatprep.subr.mxu1 %v12348_v13 }
 0x6fd   : > { %v7433_v52 = vpop.f32.mrf.mxu1 }
 0x6fe   : > { %7441 = vst.msk [vmem:[#allocation2] sm:$0x1] %vm13946_vm3, %v7433_v52 }
 0x6ff   : > { %v10242_v21 = vpop.f32.mrf.mxu1 }
 0x705   : > { %v7508_v35 = vpop.f32.mrf.mxu1 }
 0x706   : > { %v7509_v10 = vadd.f32 %v7508_v35, %v13920_v2 }
 0x707   : > { %v10249_v43 = vpop.f32.mrf.mxu1 }
 0x708   : > { %v7512_v33 = vsel %vm7351_vm1, %v7509_v10, -inf }
 0x709   : > { %7513 = vmax.xlane.f32.xlu1 %v7512_v33 }
 0x792   : > { %v7514_v26 = vpop.xlane.xlu1 %7513 }
 0x793   : > { %v7515_v6 = vsub.f32 %v7509_v10, %v7514_v26 }
 0x795   : > { %v7516_v59 = vmul.f32 1.442695, %v7515_v6 }
 0x797   : > { %11875 = vpow2.f32 %v7516_v59 }
 0x7a4   : > { %v11876_v38 = vpop.eup %11875 }
 0x7a5   : > { %v7518_v0 = vsel %vm7351_vm1, %v11876_v38, 0.0 }
 0x7a6   : > { %7519 = vadd.xlane.f32.xlu1 %v7518_v0 }
 0x82f   : > { %v7520_v7 = vpop.xlane.xlu1 %7519 }
 0x830   : > { %11877 = vrcp.f32 %v7520_v7 }
 0x83d   : > { %v11878_v40 = vpop.eup %11877 }
 0x83e   : > { %v7522_v55 = vmul.f32 %v11878_v40, %v11876_v38  ;;  %v11815_v40 = vld [vmem:[%s12731_s7 + $0x78] sm:$0xff]  }
 0x840   : > { %10255 = vmatmul.mubr.msk.f32.vlgmr.msra.gmra.mxu1 %vm7363_vm2, %v7522_v55  ;;  %v11816_v55 = vld [vmem:[%s12731_s7 + $0x38] sm:$0xff]  }
 0x841   : > { %10258 = vmatpush3.xpose.msra.mxu1 %v13681_v53  ;;  %10261 = vmatprep.mubr.msk.f32.mxu1 %vm12349_vm0, %v12348_v13 }
 0x842   : > { %10259 = vmatprep.subr.mxu1 %v12348_v13 }
 0x845   : > { %10260 = vmatpush3.xpose.msra.mxu1 %v13666_v9 }
 0x846   : > { %10264 = vmatprep.subr.mxu1 %v12348_v13 }
 0x848   : > { %10262 = vmatmul.mubr.f32.vlgmr.msra.gmra.mxu1 %v13242_v50 }
 0x849   : > { %10265 = vmatpush3.msra.mxu1 %v13913_v27  ;;  %10268 = vmatprep.mubr.msk.f32.mxu1 %vm12349_vm0, %v12348_v13 }
 0x84a   : > { %10266 = vmatprep.subr.mxu1 %v12348_v13 }
 0x84b   : > { %10267 = vmatpush3.msra.mxu1 %v13909_v1 }
 0x84c   : > { %10271 = vmatprep.subr.mxu1 %v12348_v13 }
 0x900   : > { %v7592_v53 = vpop.f32.mrf.mxu1 }
 0x901   : > { %7596 = vst.msk [vmem:[#allocation2 + $0x1] sm:$0x1] %vm13946_vm3, %v7592_v53  ;;  %v11819_v53 = vld [vmem:[%s12731_s7 + $0x70] sm:$0xff]  }
 0x902   : > { %v10256_v9 = vpop.f32.mrf.mxu1 }
 0x903   : > { %v11820_v9 = vld [vmem:[%s12731_s7 + $0x30] sm:$0xff]  }
 0x908   : > { %v7663_v56 = vpop.f32.mrf.mxu1 }
 0x909   : > { %v7664_v15 = vadd.f32 %v7663_v56, %v13920_v2  ;;  %v11823_v56 = vld [vmem:[%s12731_s7 + $0x68] sm:$0xff]  }
 0x90a   : > { %v10263_v50 = vpop.f32.mrf.mxu1 }
 0x90b   : > { %v7667_v27 = vsel %vm7351_vm1, %v7664_v15, -inf  ;;  %v11827_v50 = vld [vmem:[%s12731_s7 + $0x60] sm:$0xff]  }
 0x90c   : > { %7668 = vmax.xlane.f32.xlu0 %v7667_v27  ;;  %v11828_v27 = vld [vmem:[%s12731_s7 + $0x20] sm:$0xff]  }
 0x995   : > { %v7669_v45 = vpop.xlane.xlu0 %7668 }
 0x996   : > { %v7670_v4 = vsub.f32 %v7664_v15, %v7669_v45  ;;  %v11824_v15 = vld [vmem:[%s12731_s7 + $0x28] sm:$0xff]   ;;  %v11831_v45 = vld [vmem:[%s12731_s7 + $0x58] sm:$0xff]  }
 0x998   : > { %v7671_v5 = vmul.f32 1.442695, %v7670_v4  ;;  %v11832_v4 = vld [vmem:[%s12731_s7 + $0x18] sm:$0xff]  }
 0x99a   : > { %11879 = vpow2.f32 %v7671_v5 }
 0x9a7   : > { %v11880_v23 = vpop.eup %11879 }
 0x9a8   : > { %v7673_v1 = vsel %vm7351_vm1, %v11880_v23, 0.0 }
 0x9a9   : > { %7674 = vadd.xlane.f32.xlu1 %v7673_v1  ;;  %v11818_v1 = vld [vmem:[%s12731_s7 + $0xb8] sm:$0xff]  }
 0xa32   : > { %v7675_v16 = vpop.xlane.xlu1 %7674 }
 0xa33   : > { %11881 = vrcp.f32 %v7675_v16 }
 0xa40   : > { %v11882_v29 = vpop.eup %11881 }
 0xa41   : > { %v7677_v19 = vmul.f32 %v11882_v29, %v11880_v23  ;;  %v11821_v29 = vld [vmem:[%s12731_s7 + $0xf0] sm:$0xff]  }
 0xa43   : > { %10269 = vmatmul.mubr.msk.f32.vlgmr.msra.gmra.mxu1 %vm7363_vm2, %v7677_v19  ;;  %v11822_v19 = vld [vmem:[%s12731_s7 + $0xb0] sm:$0xff]  }
 0xa44   : > { %10272 = vmatpush3.xpose.msra.mxu1 %v13688_v57  ;;  %10275 = vmatprep.mubr.msk.f32.mxu1 %vm12349_vm0, %v12348_v13 }
 0xa45   : > { %10273 = vmatprep.subr.mxu1 %v12348_v13 }
 0xa48   : > { %10274 = vmatpush3.xpose.msra.mxu1 %v13673_v49 }
 0xa49   : > { %10278 = vmatprep.subr.mxu1 %v12348_v13 }
 0xa4b   : > { %10276 = vmatmul.mubr.f32.vlgmr.msra.gmra.mxu1 %v13251_v54 }
 0xa4c   : > { %10279 = vmatpush3.msra.mxu1 %v13915_v11  ;;  %10282 = vmatprep.mubr.msk.f32.mxu1 %vm12349_vm0, %v12348_v13 }
 0xa4d   : > { %10280 = vmatprep.subr.mxu1 %v12348_v13 }
 0xa4e   : > { %10281 = vmatpush3.msra.mxu1 %v13911_v39 }
 0xa4f   : > { %10285 = vmatprep.subr.mxu1 %v12348_v13 }
 0xb03   : > { %v7747_v57 = vpop.f32.mrf.mxu1 }
 0xb04   : > { %7751 = vst.msk [vmem:[#allocation2 + $0x2] sm:$0x1] %vm13946_vm3, %v7747_v57  ;;  %v11825_v57 = vld [vmem:[%s12731_s7 + $0xe8] sm:$0xff]  }
 0xb05   : > { %v10270_v49 = vpop.f32.mrf.mxu1 }
 0xb06   : > { %v11826_v49 = vld [vmem:[%s12731_s7 + $0xa8] sm:$0xff]  }
 0xb0b   : > { %v7818_v22 = vpop.f32.mrf.mxu1 }
 0xb0c   : > { %v7819_v25 = vadd.f32 %v7818_v22, %v13920_v2  ;;  %v11829_v22 = vld [vmem:[%s12731_s7 + $0xe0] sm:$0xff]  }
 0xb0d   : > { %v10277_v54 = vpop.f32.mrf.mxu1 }
 0xb0e   : > { %v7822_v11 = vsel %vm7351_vm1, %v7819_v25, -inf  ;;  %v11833_v54 = vld [vmem:[%s12731_s7 + $0xd8] sm:$0xff]  }
 0xb0f   : > { %7823 = vmax.xlane.f32.xlu0 %v7822_v11  ;;  %v11834_v11 = vld [vmem:[%s12731_s7 + $0x98] sm:$0xff]  }
 0xb98   : > { %v7824_v34 = vpop.xlane.xlu0 %7823 }
 0xb99   : > { %v7825_v31 = vsub.f32 %v7819_v25, %v7824_v34  ;;  %v11830_v25 = vld [vmem:[%s12731_s7 + $0xa0] sm:$0xff]   ;;  %v11835_v34 = vld [vmem:[%s12731_s7 + $0x50] sm:$0xff]  }
 0xb9b   : > { %v7826_v62 = vmul.f32 1.442695, %v7825_v31  ;;  %v11836_v31 = vld [vmem:[%s12731_s7 + $0x10] sm:$0xff]  }
 0xb9d   : > { %11883 = vpow2.f32 %v7826_v62  ;;  %v11837_v62 = vld [vmem:[%s12731_s7 + $0xd0] sm:$0xff]  }
 0xbaa   : > { %v11884_v48 = vpop.eup %11883 }
 0xbab   : > { %v7828_v39 = vsel %vm7351_vm1, %v11884_v48, 0.0 }
 0xbac   : > { %7829 = vadd.xlane.f32.xlu1 %v7828_v39  ;;  %v11839_v39 = vld [vmem:[%s12731_s7 + $0x48] sm:$0xff]  }
 0xc35   : > { %v7830_v17 = vpop.xlane.xlu1 %7829 }
 0xc36   : > { %11885 = vrcp.f32 %v7830_v17  ;;  %v11840_v17 = vld [vmem:[%s12731_s7 + $0x8] sm:$0xff]  }
 0xc43   : > { %v11886_v3 = vpop.eup %11885 }
 0xc44   : > { %v7832_v20 = vmul.f32 %v11886_v3, %v11884_v48  ;;  %v11838_v48 = vld [vmem:[%s12731_s7 + $0x90] sm:$0xff]   ;;  %v11841_v3 = vld [vmem:[%s12731_s7 + $0xc8] sm:$0xff]  }
 0xc46   : > { %10283 = vmatmul.mubr.msk.f32.vlgmr.msra.gmra.mxu1 %vm7363_vm2, %v7832_v20  ;;  %v11842_v20 = vld [vmem:[%s12731_s7 + $0x88] sm:$0xff]  }
 0xc47   : > { %10286 = vmatpush3.xpose.msra.mxu1 %v13766_v37  ;;  %10289 = vmatprep.mubr.msk.f32.mxu1 %vm12349_vm0, %v12348_v13 }
 0xc48   : > { %10287 = vmatprep.subr.mxu1 %v12348_v13 }
 0xc4b   : > { %10288 = vmatpush3.xpose.msra.mxu1 %v13756_v8 }
 0xc4c   : > { %10292 = vmatprep.subr.mxu1 %v12348_v13 }
 0xc4e   : > { %10290 = vmatmul.mubr.f32.vlgmr.msra.gmra.mxu1 %v13407_v14 }
 0xc4f   : > { %10293 = vmatpush3.msra.mxu1 %v13927_v30  ;;  %10296 = vmatprep.mubr.msk.f32.mxu1 %vm12349_vm0, %v12348_v13 }
 0xc50   : > { %10294 = vmatprep.subr.mxu1 %v12348_v13 }
 0xc51   : > { %10295 = vmatpush3.msra.mxu1 %v13925_v60 }
 0xc52   : > { %10299 = vmatprep.subr.mxu1 %v12348_v13 }
 0xd06   : > { %v7902_v37 = vpop.f32.mrf.mxu1 }
 0xd07   : > { %7906 = vst.msk [vmem:[#allocation2 + $0x3] sm:$0x1] %vm13946_vm3, %v7902_v37  ;;  %v11843_v37 = vld [vmem:[%s12731_s7 + $0x40] sm:$0xff]  }
 0xd08   : > { %v10284_v8 = vpop.f32.mrf.mxu1 }
 0xd09   : > { %v11845_v8 = vld [vmem:[%s12731_s7 + $0xc0] sm:$0xff]  }
 0xd0e   : > { %v7973_v28 = vpop.f32.mrf.mxu1 }
 0xd0f   : > { %v7974_v32 = vadd.f32 %v7973_v28, %v13920_v2  ;;  %v11844_v28 = vld [vmem:[%s12731_s7] sm:$0xff]  }
 0xd10   : > { %v10291_v14 = vpop.f32.mrf.mxu1 }
 0xd11   : > { %v7977_v30 = vsel %vm7351_vm1, %v7974_v32, -inf  ;;  %v11847_v14 = vld [vmem:[%s12731_s7 + $0x178] sm:$0xff]  }
 0xd12   : > { %7978 = vmax.xlane.f32.xlu0 %v7977_v30 }
 0xd9b   : > { %v7979_v36 = vpop.xlane.xlu0 %7978 }
 0xd9c   : > { %v7980_v47 = vsub.f32 %v7974_v32, %v7979_v36  ;;  %v11846_v32 = vld [vmem:[%s12731_s7 + $0x80] sm:$0xff]  }
 0xd9e   : > { %v7981_v12 = vmul.f32 1.442695, %v7980_v47 }
 0xda0   : > { %11887 = vpow2.f32 %v7981_v12 }
 0xdad   : > { %v11888_v52 = vpop.eup %11887 }
 0xdae   : > { %v7983_v60 = vsel %vm7351_vm1, %v11888_v52, 0.0 }
 0xdaf   : > { %7984 = vadd.xlane.f32.xlu1 %v7983_v60 }
 0xe38   : > { %v7985_v21 = vpop.xlane.xlu1 %7984 }
 0xe39   : > { %11889 = vrcp.f32 %v7985_v21 }
 0xe46   : > { %v11890_v35 = vpop.eup %11889 }
 0xe47   : > { %v7987_v10 = vmul.f32 %v11890_v35, %v11888_v52 }
 0xe49   : > { %10297 = vmatmul.mubr.msk.f32.vlgmr.msra.gmra.mxu1 %vm7363_vm2, %v7987_v10 }
 0xe4a   : > { %10300 = vmatpush3.xpose.msra.mxu1 %v13768_v44  ;;  %10303 = vmatprep.mubr.msk.f32.mxu1 %vm12349_vm0, %v12348_v13 }
 0xe4b   : > { %10301 = vmatprep.subr.mxu1 %v12348_v13 }
 0xe4e   : > { %10302 = vmatpush3.xpose.msra.mxu1 %v13760_v24 }
 0xe4f   : > { %10154 = vmatprep.subr.bf16.mxu1 %v11815_v40  ;;  %v11861_v40 = vld [vmem:[%s12731_s7 + $0x140] sm:$0xff]  }
 0xe51   : > { %10304 = vmatmul.mubr.f32.vlgmr.msra.gmra.mxu1 %v13412_v51 }
 0xe52   : > { %10155 = vmatpush3.bf16.msra.mxu1 %v11816_v55  ;;  %v11862_v55 = vld [vmem:[%s12731_s7 + $0x100] sm:$0xff]  }
 0xe53   : > { %10156 = vmatprep.subr.bf16.mxu1 %v11819_v53 }
 0xe56   : > { %10157 = vmatpush3.bf16.msra.mxu1 %v11820_v9  ;;  %v11863_v9 = vld [vmem:[%s12739_s28 + $0x38] sm:$0xff]  }
 0xe57   : > { %10158 = vmatprep.subr.bf16.mxu1 %v11823_v56  ;;  %v11864_v56 = vld [vmem:[%s12739_s28 + $0x30] sm:$0xff]  }
 0xe5a   : > { %10159 = vmatpush3.bf16.msra.mxu1 %v11824_v15  ;;  %v11865_v15 = vld [vmem:[%s12739_s28 + $0x28] sm:$0xff]  }
 0xe5b   : > { %10160 = vmatprep.subr.bf16.mxu1 %v11827_v50  ;;  %v11866_v50 = vld [vmem:[%s12739_s28 + $0x20] sm:$0xff]  }
 0xe5e   : > { %10161 = vmatpush3.bf16.msra.mxu1 %v11828_v27  ;;  %v11868_v27 = vld [vmem:[%s12739_s28 + $0x10] sm:$0xff]  }
 0xe5f   : > { %10162 = vmatprep.subr.bf16.mxu1 %v11831_v45  ;;  %v11869_v45 = vld [vmem:[%s12739_s28 + $0x8] sm:$0xff]  }
 0xe62   : > { %10163 = vmatpush3.bf16.msra.mxu1 %v11832_v4  ;;  %v11870_v4 = vld [vmem:[%s12739_s28] sm:$0xff]  }
 0xe63   : > { %10164 = vmatprep.subr.bf16.mxu1 %v11835_v34 }
 0xe66   : > { %10165 = vmatpush3.bf16.msra.mxu1 %v11836_v31 }
 0xe67   : > { %10166 = vmatprep.subr.bf16.mxu1 %v11839_v39 }
 0xe6a   : > { %10167 = vmatpush3.bf16.msra.mxu1 %v11840_v17 }
 0xe6b   : > { %10168 = vmatprep.subr.bf16.mxu1 %v11843_v37  ;;  %v8778_v37 = vld [vmem:[%s677_s30] sm:$0x1] }
 0xe6e   : > { %10169 = vmatpush3.bf16.msra.mxu1 %v11844_v28 }
 0xe6f   : > { %10198 = vmatprep.subr.bf16.mxu1 %v11847_v14 }
 0xf09   : > { %v8057_v43 = vpop.f32.mrf.mxu1 }
 0xf0a   : > { %8061 = vst.msk [vmem:[#allocation2 + $0x4] sm:$0x1] %vm13946_vm3, %v8057_v43 }
 0xf0b   : > { %v10298_v33 = vpop.f32.mrf.mxu1 }
 0xf11   : > { %v8128_v26 = vpop.f32.mrf.mxu1 }
 0xf12   : > { %v8129_v44 = vadd.f32 %v8128_v26, %v13920_v2  ;;  %v11817_v2 = vld [vmem:[%s12731_s7 + $0xf8] sm:$0xff]  }
 0xf13   : > { %v10305_v6 = vpop.f32.mrf.mxu1  ;;  %10176 = vmatprep.subr.bf16.mxu0 %v11817_v2  ;;  %v11848_v26 = vld [vmem:[%s12731_s7 + $0x138] sm:$0xff]  }
 0xf14   : > { %v8132_v59 = vsel %vm7351_vm1, %v8129_v44, -inf  ;;  %v11854_v6 = vld [vmem:[%s12731_s7 + $0x120] sm:$0xff]  }
 0xf15   : > { %8133 = vmax.xlane.f32.xlu0 %v8132_v59  ;;  %v11855_v59 = vld [vmem:[%s12731_s7 + $0x158] sm:$0xff]  }
 0xf9e   : > { %v8134_v24 = vpop.xlane.xlu0 %8133 }
 0xf9f   : > { %v8135_v51 = vsub.f32 %v8129_v44, %v8134_v24  ;;  %v11849_v44 = vld [vmem:[%s12731_s7 + $0x170] sm:$0xff]   ;;  %v11856_v24 = vld [vmem:[%s12731_s7 + $0x118] sm:$0xff]  }
 0xfa1   : > { %v8136_v38 = vmul.f32 1.442695, %v8135_v51  ;;  %v11857_v51 = vld [vmem:[%s12731_s7 + $0x150] sm:$0xff]  }
 0xfa3   : > { %11891 = vpow2.f32 %v8136_v38  ;;  %v11858_v38 = vld [vmem:[%s12731_s7 + $0x110] sm:$0xff]  }
 0xfb0   : > { %v11892_v0 = vpop.eup %11891 }
 0xfb1   : > { %v8138_v7 = vsel %vm7351_vm1, %v11892_v0, 0.0 }
 0xfb2   : > { %8139 = vadd.xlane.f32.xlu1 %v8138_v7  ;;  %v11860_v7 = vld [vmem:[%s12731_s7 + $0x108] sm:$0xff]  }
0x103b   : > { %v8140_v5 = vpop.xlane.xlu1 %8139 }
0x103c   : > { %11893 = vrcp.f32 %v8140_v5 }
0x1049   : > { %v11894_v23 = vpop.eup %11893 }
0x104a   : > { %v8142_v16 = vmul.f32 %v11894_v23, %v11892_v0  ;;  %v11859_v0 = vld [vmem:[%s12731_s7 + $0x148] sm:$0xff]  }
0x104c   : > { %10311 = vmatmul.mubr.msk.f32.vlgmr.msra.gmra.mxu0 %vm7363_vm2, %v8142_v16 }
0x104d   : > { %10177 = vmatpush3.bf16.msra.mxu0 %v11818_v1 }
0x104e   : > { %10178 = vmatprep.subr.bf16.mxu0 %v11821_v29 }
0x1051   : > { %10179 = vmatpush3.bf16.msra.mxu0 %v11822_v19 }
0x1052   : > { %10180 = vmatprep.subr.bf16.mxu0 %v11825_v57 }
0x1055   : > { %10181 = vmatpush3.bf16.msra.mxu0 %v11826_v49 }
0x1056   : > { %10182 = vmatprep.subr.bf16.mxu0 %v11829_v22 }
0x1059   : > { %10183 = vmatpush3.bf16.msra.mxu0 %v11830_v25  ;;  %v8351_v25 = vld [vmem:[%s660_s6] sm:$0x1] }
0x105a   : > { %10184 = vmatprep.subr.bf16.mxu0 %v11833_v54 }
0x105d   : > { %10185 = vmatpush3.bf16.msra.mxu0 %v11834_v11 }
0x105e   : > { %10186 = vmatprep.subr.bf16.mxu0 %v11837_v62 }
0x1061   : > { %10187 = vmatpush3.bf16.msra.mxu0 %v11838_v48 }
0x1062   : > { %10188 = vmatprep.subr.bf16.mxu0 %v11841_v3 }
0x1065   : > { %10189 = vmatpush3.bf16.msra.mxu0 %v11842_v20 }
0x1066   : > { %10190 = vmatprep.subr.bf16.mxu0 %v11845_v8 }
0x1069   : > { %10191 = vmatpush3.bf16.msra.mxu0 %v11846_v32 }
0x106a   : > { %10313 = vmatprep.subr.bf16.mxu0 %v12348_v13 }
0x110c   : > { %v8212_v30 = vpop.f32.mrf.mxu0 }
0x110d   : > { %8216 = vst.msk [vmem:[#allocation2 + $0x5] sm:$0x1] %vm13946_vm3, %v8212_v30 }
0x110e   : > { %v10312_v36 = vpop.f32.mrf.mxu0 }
0x1114   : > { %v8217_v47 = vld [vmem:[#allocation2] sm:$0x3f] }
0x1115   : > { %v8226_v12 = vrot.slane %v8217_v47, %v13057_v46  ;;  %v8234_v52 = vrot.slane %v8217_v47, %v13214_v61  ;;  %v8222_v60 = vrot.slane %v8217_v47, %v13052_v42  ;;  %v8230_v21 = vrot.slane %v8217_v47, %v13211_v63  ;;  %v11850_v42 = vld [vmem:[%s12731_s7 + $0x130] sm:$0xff]   ;;  %v11851_v63 = vld [vmem:[%s12731_s7 + $0x168] sm:$0xff]  }
0x1116   : > { %v8242_v35 = vrot.slane %v8217_v47, %v13313_v18  ;;  %v11852_v61 = vld [vmem:[%s12731_s7 + $0x128] sm:$0xff]   ;;  %v11853_v18 = vld [vmem:[%s12731_s7 + $0x160] sm:$0xff]   ;;  %v8238_v2 = vrot.slane %v8217_v47, %v13306_v58  ;;  %s12350_s7 = smov [#allocation20]  }
0x1117   : > { %v8250_v10 = vpack.c.bf16 %v8226_v12, %v8226_v12  ;;  %v8252_v43 = vpack.c.bf16 %v8234_v52, %v8234_v52  ;;  %v8249_v33 = vpack.c.bf16 %v8222_v60, %v8222_v60  ;;  %v8251_v41 = vpack.c.bf16 %v8230_v21, %v8230_v21  ;;  %v11867_v58 = vld [vmem:[%s12739_s28 + $0x18] sm:$0xff]   ;;  %s12193_s10 = sshll.u32 %s12350_s7, 4  ;;  %s12194_s10 = int_to_ptr.vmem [resolvable:$false] %s12193_s10 }
0x1118   : > { %v8254_v46 = vpack.c.bf16 %v8242_v35, %v8242_v35  ;;  %v8253_v53 = vpack.c.bf16 %v8238_v2, %v8238_v2  ;;  %s12195_s6 = scalar_lea.vmem %s12194_s10, 32  ;;  %p12196_p11 = scmp.lt.s32.totalorder %s14111_s23, %s12194_s10 }
0x1119   : > { %8672 = vmatprep.mubr.bf16.mxu1 %v8250_v10  ;;  %8712 = vmatprep.mubr.bf16.mxu0 %v8252_v43  ;;  %p12197_p0 = scmp.lt.s32.totalorder %s12195_s6, %s12189_s12 }
0x111a   : > { %8673 = vmatmul.mubr.bf16.vlgmr.msra.gmra.mxu1 %v8249_v33  ;;  %8713 = vmatmul.mubr.bf16.vlgmr.msra.gmra.mxu0 %v8251_v41 }
0x111b   : > { %10199 = vmatpush3.bf16.msra.mxu1 %v11848_v26  ;;  %8752 = vmatprep.mubr.bf16.mxu1 %v8254_v46  ;;  %p12198_p8 = por %p12197_p0, %p12196_p11 }
0x111c   : > { %10200 = vmatprep.subr.bf16.mxu1 %v11849_v44  ;;  %10329 = vmatprep.mubr.msk.bf16.mxu0 %vm12349_vm0, %v12348_v13 }
0x111d   : > { %10314 = vmatpush3.bf16.msra.mxu0 %v11863_v9  ;;  %p12199_p9 = pnand %p12198_p8, %p12192_p13 }
0x111e   : > { %10315 = vmatprep.subr.bf16.mxu0 %v12348_v13 }
0x111f   : > { %10201 = vmatpush3.bf16.msra.mxu1 %v11850_v42 }
0x1120   : > { %10202 = vmatprep.subr.bf16.mxu1 %v11851_v63 }
0x1121   : > { %10316 = vmatpush3.bf16.msra.mxu0 %v11864_v56 }
0x1122   : > { %10317 = vmatprep.subr.bf16.mxu0 %v12348_v13 }
0x1123   : > { %10203 = vmatpush3.bf16.msra.mxu1 %v11852_v61 }
0x1124   : > { %10204 = vmatprep.subr.bf16.mxu1 %v11853_v18 }
0x1125   : > { %10318 = vmatpush3.bf16.msra.mxu0 %v11865_v15 }
0x1126   : > { %10319 = vmatprep.subr.bf16.mxu0 %v12348_v13 }
0x1127   : > { %10205 = vmatpush3.bf16.msra.mxu1 %v11854_v6 }
0x1128   : > { %10206 = vmatprep.subr.bf16.mxu1 %v11855_v59 }
0x1129   : > { %10320 = vmatpush3.bf16.msra.mxu0 %v11866_v50 }
0x112a   : > { %10321 = vmatprep.subr.bf16.mxu0 %v12348_v13 }
0x112b   : > { %10207 = vmatpush3.bf16.msra.mxu1 %v11856_v24 }
0x112c   : > { %10208 = vmatprep.subr.bf16.mxu1 %v11857_v51 }
0x112d   : > { %10322 = vmatpush3.bf16.msra.mxu0 %v11867_v58 }
0x112e   : > { %10323 = vmatprep.subr.bf16.mxu0 %v12348_v13 }
0x112f   : > { %10209 = vmatpush3.bf16.msra.mxu1 %v11858_v38 }
0x1130   : > { %10210 = vmatprep.subr.bf16.mxu1 %v11859_v0 }
0x1131   : > { %10324 = vmatpush3.bf16.msra.mxu0 %v11868_v27 }
0x1132   : > { %10325 = vmatprep.subr.bf16.mxu0 %v12348_v13 }
0x1133   : > { %10211 = vmatpush3.bf16.msra.mxu1 %v11860_v7 }
0x1134   : > { %10212 = vmatprep.subr.bf16.mxu1 %v11861_v40 }
0x1135   : > { %10326 = vmatpush3.bf16.msra.mxu0 %v11869_v45 }
0x1136   : > { %10327 = vmatprep.subr.bf16.mxu0 %v12348_v13 }
0x1137   : > { %10213 = vmatpush3.bf16.msra.mxu1 %v11862_v55 }
0x1139   : > { %10328 = vmatpush3.bf16.msra.mxu0 %v11870_v4 }
0x113a   : > { %8753 = vmatmul.mubr.bf16.vlgmr.msra.gmra.mxu1 %v8253_v53 }
0x11da   : > { %v10170_v5 = vpop.f32.mrf.mxu1  ;;  %v10192_v23 = vpop.f32.mrf.mxu0 }
0x11dc   : > { %v10171_v1 = vpop.f32.mrf.mxu1  ;;  %v10193_v16 = vpop.f32.mrf.mxu0 }
0x11dd   : > { %v10172_v22 = vadd.f32 %v10171_v1, %v10170_v5  ;;  %v10194_v13 = vadd.f32 %v10193_v16, %v10192_v23 }
0x11de   : > { %v10173_v29 = vpop.f32.mrf.mxu1  ;;  %v10195_v19 = vpop.f32.mrf.mxu0 }
0x11df   : > { %v8675_v54 = vadd.f32 %v10172_v22, %v8351_v25 }
0x11e0   : > { %v10174_v57 = vpop.f32.mrf.mxu1  ;;  %v10196_v49 = vpop.f32.mrf.mxu0 }
0x11e1   : > { %v8715_v31 = vadd.f32 %v10194_v13, %v8675_v54 }
0x11fa   : > { %v10214_v11 = vpop.f32.mrf.mxu1 }
0x11fc   : > { %v10215_v34 = vpop.f32.mrf.mxu1 }
0x11fd   : > { %v10216_v62 = vadd.f32 %v10215_v34, %v10214_v11 }
0x11fe   : > { %v10217_v48 = vpop.f32.mrf.mxu1 }
0x11ff   : > { %v8755_v39 = vadd.f32 %v10216_v62, %v8715_v31 }
0x1200   : > { %v10218_v17 = vpop.f32.mrf.mxu1 }
0x1201   : > { %v8760_v3 = vmax.f32 %v8755_v39, 0.0 }
0x1203   : > { %v8761_v20 = vpack.c.bf16 %v8760_v3, %v8760_v3 }
0x1205   : > { %10330 = vmatmul.mubr.bf16.vlgmr.msra.gmra.mxu0 %v8761_v20 }
0x12c5   : > { %v8861_v8 = vpop.f32.mrf.mxu0 }
0x12c6   : > { %v8862_v28 = vadd.f32 %v8861_v8, %v8778_v37 }
0x12c7   : > { %v10331_v32 = vpop.f32.mrf.mxu0 }
0x12c8   : > { %8867 = vst [vmem:[%s760_s4] sm:$0x1] %v8862_v28 }
0x12c9   : > { %v8864_v14 = vpop.f32.mrf.mxu0 }
0x12ca   : > { %12202 = shalt.err (!%p12199_p9)
}
0x12cb   : > { %s12203_s8 = scalar_lea.hbm %s14109_s20, 16  ;;  %s12207_s15 = scalar_lea.hbm %s14260_s14, 96 }
0x12cc   : > { %p12204_p10 = scmp.ne.s32.totalorder %s14109_s20, %s12203_s8  ;;  %p12208_p7 = scmp.lt.s32.totalorder %s14109_s20, %s14260_s14 }
0x12cd   : > { %p12209_p2 = scmp.lt.s32.totalorder %s12207_s15, %s12203_s8 }
0x12ce   : > { %p12205_p5 = pnand %p12204_p10, %p12605_p12 }
0x12cf   : > { %p12210_p4 = por %p12209_p2, %p12208_p7 }
0x12d0   : > { %p12206_p1 = pneg %p12205_p5 }
0x12d2   : > { %p12211_p6 = pnand %p12210_p4, %p12206_p1 }
0x12d4   : > { %12214 = shalt.err (!%p12211_p6)
}
0x12d5   : > { %10373 = dma.vmem_to_hbm [thread:$0]  (%p12605_p12), %s14111_s23, 16, %s14109_s20, %s8869_s16   ;;  %v10332_v30 = vpop.f32.mrf.mxu0 }
0x12d6 PF: > { %s14261_s29 = sld [smem:[#allocation34_spill]] }
0x12d7   : > { %s14262_s25 = sld [smem:[#allocation29_spill]] }
0x12dc   : > { %p10411_p13 = scmp.ge.s32.totalorder %s14261_s29, 2 }
0x12dd   : > { %s8895_s9 = sand.u32 1, %s14262_s25  }
0x12de   : > { %p10407_p11 = pnand %p10411_p13, %p12614_p3  ;;  %s8896_s5 = scalar_lea.sflag [#allocation5], %s8895_s9 }
0x12e0   : > { %p10408_p0 = pneg %p10407_p11 }
0x12e2   : > { %12284 = dma.done.wait (%p10408_p0), %s8896_s5, 16  }
0x12e3   : > { %12286 = vsyncadd (%p10408_p0), %s8896_s5, 4294967280  ;;  %s42_s27 = sadd.s32 1, %s14261_s29   ;;  %s14264_s3 = sld [smem:[#allocation28_spill]] }
0x12e4   : > { %p39_p8 = scmp.ge.s32.totalorder %s42_s27, 8   ;;  %s14265_s19 = sld [smem:[#allocation38_spill]] }
0x12e5   : > { %s14266_s13 = sld [smem:[#allocation30_spill]]  ;;  %s14271_s17 = smov %s12293_s18 }
0x12e6   : > { %s14267_s22 = sld [smem:[#allocation39_spill]]  ;;  %s14273_s20 = smov %s12305_s21 }
0x12e7   : > { %s14268_s23 = sld [smem:[#allocation33_spill]]  ;;  %s14275_s24 = smov %s12325_s26 }
0x12e8   : > { %s14269_s25 = sld [smem:[#allocation36_spill]] }
0x12e9   : > { %s14270_s1 = sld [smem:[#allocation37_spill]]  ;;  %s14272_s18 = smov %s14264_s3 }
0x12eb   : > { %s14274_s21 = smov %s14266_s13  ;;  %41 = sbr.rel (!%p39_p8) target bundleno = 32 (0x20), region = 221 }
0x12ef   : > { %s14276_s26 = smov %s14270_s1 }
0x12f0   :  { %8900 = vsyncpa [#allocation4], 1 }
0x12f1   :  { %8902 = vsyncpa [#allocation4 + $0x1], 1 }
0x12f2   :  { %8903 = vsyncpa [#allocation7], 1 }
0x12f3   :  { %8905 = vsyncpa [#allocation7 + $0x1], 1 }
0x12f4   :  { %8906 = vsyncpa [#allocation10], 1 }
0x12f5   :  { %8908 = vsyncpa [#allocation10 + $0x1], 1 }
0x12f6   :  { %8909 = vsyncpa [#allocation13], 1 }
0x12f7   :  { %8911 = vsyncpa [#allocation13 + $0x1], 1 }
0x12f8   :  { %8912 = vsyncpa [#allocation16], 1 }
0x12f9   :  { %8914 = vsyncpa [#allocation16 + $0x1], 1 }
0x12fa   :  { %8915 = vsyncpa [#allocation19], 1 }
0x12fb   :  { %8917 = vsyncpa [#allocation19 + $0x1], 1 }
0x12fc   :  { %8918 = vsyncpa [#allocation5], 1 }
0x12fd   :  { %8920 = vsyncpa [#allocation5 + $0x1], 1 }

</bundles_post_ra>
